<compile_context>
chip_gen: v5e
topology: v5e:2x2
jax: 0.10.0
libtpu: 0.0.40
codegen_flags: <defaults>
</compile_context>

<pallas_src>
import functools

import jax
import jax.numpy as jnp
from jax.experimental import pallas as pl
from jax.experimental.pallas import tpu as pltpu

PRELU_SLOPE = 0.25  # PyTorch nn.PReLU() default init


def _round_up(x, m):
    return ((x + m - 1) // m) * m


# --------------------------------------------------------------------------
# Pallas kernels: single-K-block matmul + bias + PReLU (+ fused residual)
# --------------------------------------------------------------------------
def _mm_kernel(a_ref, w_ref, b_ref, o_ref, *, apply_act, slope):
    y = jnp.dot(a_ref[...], w_ref[...], preferred_element_type=jnp.float32)
    y = y + b_ref[...]
    if apply_act:
        y = jnp.where(y >= 0.0, y, jnp.float32(slope) * y)
    o_ref[...] = y.astype(o_ref.dtype)


def _mm_res_kernel(a_ref, w_ref, b_ref, r_ref, o_ref, *, apply_act, slope,
                   res_sign):
    y = jnp.dot(a_ref[...], w_ref[...], preferred_element_type=jnp.float32)
    y = y + b_ref[...]
    if apply_act:
        y = jnp.where(y >= 0.0, y, jnp.float32(slope) * y)
    y = y + jnp.float32(res_sign) * r_ref[...]
    o_ref[...] = y.astype(o_ref.dtype)


def matmul_bias_act(a, w, b, slope=None, residual=None, res_sign=1.0):
    """out = prelu(a @ w + b) [+ res_sign * residual].

    a: [M, K] f32, w: [K, N] f32, b: [N] f32, residual: [M, N] f32 (optional).
    A and W are cast to bf16 (f32 MXU accumulation)."""
    M, K = a.shape
    K2, N = w.shape
    assert K == K2

    # --- tiling: K collapsed into one block, lane-dense N, large M tiles.
    Kp = _round_up(K, 16)                      # bf16 sublane packing; no 128 pad
    Np = _round_up(N, 128)
    TN = 256 if (Np % 256 == 0 and Np >= 256) else 128
    if M >= 1024:
        TM = 512                               # >=2 M blocks -> both v7x cores busy
        Mp = _round_up(M, TM)
    else:
        TM = _round_up(M, 16)
        Mp = TM

    a_p = jnp.pad(a.astype(jnp.bfloat16), ((0, Mp - M), (0, Kp - K)))
    w_p = jnp.pad(w.astype(jnp.bfloat16), ((0, Kp - K), (0, Np - N)))
    b_p = jnp.pad(b.astype(jnp.float32).reshape(1, -1), ((0, 0), (0, Np - N)))

    in_arrays = [a_p, w_p, b_p]
    in_specs = [
        pl.BlockSpec((TM, Kp), lambda i, j: (i, 0)),
        pl.BlockSpec((Kp, TN), lambda i, j: (0, j)),
        pl.BlockSpec((1, TN), lambda i, j: (0, j)),
    ]

    if residual is not None:
        r_p = jnp.pad(residual.astype(jnp.float32),
                      ((0, Mp - M), (0, Np - N)))
        in_arrays.append(r_p)
        in_specs.append(pl.BlockSpec((TM, TN), lambda i, j: (i, j)))
        kernel = functools.partial(
            _mm_res_kernel,
            apply_act=slope is not None,
            slope=0.0 if slope is None else float(slope),
            res_sign=float(res_sign))
    else:
        kernel = functools.partial(
            _mm_kernel,
            apply_act=slope is not None,
            slope=0.0 if slope is None else float(slope))

    out = pl.pallas_call(
        kernel,
        out_shape=jax.ShapeDtypeStruct((Mp, Np), jnp.float32),
        grid_spec=pltpu.PrefetchScalarGridSpec(
            num_scalar_prefetch=0,
            grid=(Mp // TM, Np // TN),
            in_specs=in_specs,
            out_specs=pl.BlockSpec((TM, TN), lambda i, j: (i, j)),
        ),
        compiler_params=pltpu.CompilerParams(
            dimension_semantics=("parallel", "parallel"),
            vmem_limit_bytes=32 * 1024 * 1024),
    )(*in_arrays)
    return out[:M, :N]


# --------------------------------------------------------------------------
# Conv / ConvTranspose (NHWC) built on the Pallas matmul
# --------------------------------------------------------------------------
def conv2d_nhwc(x, w, b, stride=1, padding=0, slope=None,
                residual=None, res_sign=1.0):
    """PyTorch-semantics Conv2d on NHWC activations.
    x: [N,H,W,Cin], w: [Cout,Cin,kh,kw] (PyTorch layout), b: [Cout].
    stride>1 uses a space-to-depth lowering: only (k/stride)^2 shifted taps."""
    N, H, W, C = x.shape
    Cout, Cin, kh, kw = w.shape
    assert C == Cin
    Ho = (H + 2 * padding - kh) // stride + 1
    Wo = (W + 2 * padding - kw) // stride + 1

    if stride == 1:
        xp = jnp.pad(x, ((0, 0), (padding, padding), (padding, padding), (0, 0)))
        taps = [xp[:, di:di + Ho, dj:dj + Wo, :]
                for di in range(kh) for dj in range(kw)]
        patches = jnp.concatenate(taps, axis=-1) if len(taps) > 1 else taps[0]
        patches = patches.reshape(N * Ho * Wo, kh * kw * Cin)
        # K rows ordered (di, dj, ci)
        wm = w.transpose(2, 3, 1, 0).reshape(kh * kw * Cin, Cout)
    else:
        s = stride
        m = -(-kh // s)                    # ceil(k / s)
        k2 = s * m
        wz = jnp.pad(w, ((0, 0), (0, 0), (0, k2 - kh), (0, k2 - kw)))
        Hn = s * (Ho + m - 1)
        Wn = s * (Wo + m - 1)
        xp = jnp.pad(x, ((0, 0),
                         (padding, max(0, Hn - H - padding)),
                         (padding, max(0, Wn - W - padding)),
                         (0, 0)))[:, :Hn, :Wn, :]
        Ha, Wa = Hn // s, Wn // s
        # space-to-depth: channel index ordered (ra, rb, ci)
        xs = xp.reshape(N, Ha, s, Wa, s, C).transpose(0, 1, 3, 2, 4, 5)
        xs = xs.reshape(N, Ha, Wa, s * s * C)
        taps = [xs[:, da:da + Ho, db:db + Wo, :]
                for da in range(m) for db in range(m)]
        patches = jnp.concatenate(taps, axis=-1) if len(taps) > 1 else taps[0]
        patches = patches.reshape(N * Ho * Wo, m * m * s * s * Cin)
        # weight rows ordered (da, db, ra, rb, ci)
        wm = wz.reshape(Cout, Cin, m, s, m, s)      # [co, ci, da, ra, db, rb]
        wm = wm.transpose(2, 4, 3, 5, 1, 0)         # [da, db, ra, rb, ci, co]
        wm = wm.reshape(m * m * s * s * Cin, Cout)

    res_flat = None
    if residual is not None:
        res_flat = residual.reshape(N * Ho * Wo, Cout)
    y = matmul_bias_act(patches, wm, b, slope, res_flat, res_sign)
    return y.reshape(N, Ho, Wo, Cout)


def conv_transpose2d_nhwc(x, w, b, stride, padding, slope=None):
    """PyTorch-semantics ConvTranspose2d on NHWC via pixel-shuffle decomposition.
    x: [N,H,W,Cin], w: [Cin,Cout,kh,kw], b: [Cout]."""
    N, H, W, C = x.shape
    Cin, Cout, kh, kw = w.shape
    assert C == Cin
    s = stride
    Ho = (H - 1) * s - 2 * padding + kh
    Wo = (W - 1) * s - 2 * padding + kw
    m = -(-kh // s)                        # ceil(k / s)
    k2 = s * m
    wz = jnp.pad(w, ((0, 0), (0, 0), (0, k2 - kh), (0, k2 - kw)))

    # stride-1 conv in LR space with m x m taps over a (m-1)-padded input
    xp = jnp.pad(x, ((0, 0), (m - 1, m - 1), (m - 1, m - 1), (0, 0)))
    Ha, Wa = H + m - 1, W + m - 1
    taps = [xp[:, dy:dy + Ha, dx:dx + Wa, :]
            for dy in range(m) for dx in range(m)]
    patches = jnp.concatenate(taps, axis=-1) if len(taps) > 1 else taps[0]
    patches = patches.reshape(N * Ha * Wa, m * m * Cin)

    # weight rows ordered (dy, dx, ci); columns ordered (r, c, co)
    wm = wz.reshape(Cin, Cout, m, s, m, s)          # [ci, co, qy, r, qx, c]
    wm = jnp.flip(wm, axis=(2, 4))                  # qy -> dy = m-1-qy (and x)
    wm = wm.transpose(2, 4, 0, 3, 5, 1)             # [dy, dx, ci, r, c, co]
    wm = wm.reshape(m * m * Cin, s * s * Cout)
    bm = jnp.tile(b, s * s)

    y = matmul_bias_act(patches, wm, bm, slope)     # [N*Ha*Wa, s*s*Cout]
    # depth-to-space + crop by `padding`
    y = y.reshape(N, Ha, Wa, s, s, Cout).transpose(0, 1, 3, 2, 4, 5)
    y = y.reshape(N, Ha * s, Wa * s, Cout)
    return y[:, padding:padding + Ho, padding:padding + Wo, :]


# --------------------------------------------------------------------------
# DBPN parameters (deterministic synthetic init, PyTorch layouts) and forward
# --------------------------------------------------------------------------
def _conv_params(key, cout, cin, k):
    kw_, kb_ = jax.random.split(key)
    fan_in = cin * k * k
    w = jax.random.normal(kw_, (cout, cin, k, k), jnp.float32) / jnp.sqrt(fan_in)
    b = jax.random.normal(kb_, (cout,), jnp.float32) * 0.01
    return w, b


def _deconv_params(key, cin, cout, k):
    kw_, kb_ = jax.random.split(key)
    fan_in = cin * k * k
    w = jax.random.normal(kw_, (cin, cout, k, k), jnp.float32) / jnp.sqrt(fan_in)
    b = jax.random.normal(kb_, (cout,), jnp.float32) * 0.01
    return w, b


def init_dbpn_params(key, in_ch, out_ch, num_features, bp_stages, proj_filter):
    ki = iter(jax.random.split(key, 64))
    params = {
        'fe1': _conv_params(next(ki), 128, in_ch, 3),            # 3x3, prelu
        'fe2': _conv_params(next(ki), num_features, 128, 1),     # 1x1, prelu
    }
    units = []
    for _ in range(bp_stages - 1):
        units.append({'type': 'up',
                      'deconv1': _deconv_params(next(ki), num_features, num_features, proj_filter),
                      'conv1':   _conv_params(next(ki), num_features, num_features, proj_filter),
                      'deconv2': _deconv_params(next(ki), num_features, num_features, proj_filter)})
        units.append({'type': 'down',
                      'conv1':   _conv_params(next(ki), num_features, num_features, proj_filter),
                      'deconv1': _deconv_params(next(ki), num_features, num_features, proj_filter),
                      'conv2':   _conv_params(next(ki), num_features, num_features, proj_filter)})
    params['bp_units'] = units
    params['last_up'] = {'type': 'up',
                         'deconv1': _deconv_params(next(ki), num_features, num_features, proj_filter),
                         'conv1':   _conv_params(next(ki), num_features, num_features, proj_filter),
                         'deconv2': _deconv_params(next(ki), num_features, num_features, proj_filter)}
    params['conv_hr'] = _conv_params(next(ki), out_ch, num_features, 1)  # 1x1, no act
    return params


def dbpn_forward(params, x_nchw, stride, padding):
    s = PRELU_SLOPE
    x = jnp.transpose(x_nchw, (0, 2, 3, 1))                        # NCHW -> NHWC once
    x = conv2d_nhwc(x, *params['fe1'], stride=1, padding=1, slope=s)   # 3x3, same padding
    x = conv2d_nhwc(x, *params['fe2'], stride=1, padding=0, slope=s)   # 1x1

    def upproj(p, x):
        h0 = conv_transpose2d_nhwc(x, *p['deconv1'], stride, padding, s)
        # (l0 - x) fused into conv1's epilogue
        lm = conv2d_nhwc(h0, *p['conv1'], stride, padding, s,
                         residual=x, res_sign=-1.0)
        h1 = conv_transpose2d_nhwc(lm, *p['deconv2'], stride, padding, s)
        return h0 + h1

    def downproj(p, x):
        l0 = conv2d_nhwc(x, *p['conv1'], stride, padding, s)
        h0 = conv_transpose2d_nhwc(l0, *p['deconv1'], stride, padding, s)
        # (l0 + l1) fused into conv2's epilogue
        return conv2d_nhwc(h0 - x, *p['conv2'], stride, padding, s,
                           residual=l0, res_sign=1.0)

    for unit in params['bp_units']:
        x = upproj(unit, x) if unit['type'] == 'up' else downproj(unit, x)

    x = upproj(params['last_up'], x)
    x = conv2d_nhwc(x, *params['conv_hr'], stride=1, padding=0, slope=None)  # no act
    return jnp.transpose(x, (0, 3, 1, 2))                          # NHWC -> NCHW once


# --------------------------------------------------------------------------
if __name__ == "__main__":
    # DBPN(in_channels=3, out_channels=3, num_features=16, bp_stages=2,
    #      upscale_factor=4) -> stride=4, padding=2, projection_filter=8
    in_ch, out_ch, num_features, bp_stages, upscale = 3, 3, 16, 2, 4
    stride, padding, proj_filter = 4, 2, 8

    key = jax.random.PRNGKey(0)
    k_params, k_x = jax.random.split(key)
    params = init_dbpn_params(k_params, in_ch, out_ch, num_features,
                              bp_stages, proj_filter)

    x = jax.random.normal(k_x, (2, in_ch, 8, 8), jnp.float32)  # small LR input

    fwd = jax.jit(lambda inp: dbpn_forward(params, inp, stride, padding))
    y = fwd(x)
    jax.block_until_ready(y)

    assert y.shape == (2, out_ch, 8 * upscale, 8 * upscale), y.shape
    assert y.dtype == jnp.float32
    print("KERNEL_OK")
</pallas_src>

<mosaic_0001>
module attributes {stable_mosaic.version = 11 : i64} {
  func.func @_mm_kernel(%arg0: i32, %arg1: i32, %arg2: memref<128x32xbf16, #tpu.memory_space<vmem>>, %arg3: memref<32x128xbf16, #tpu.memory_space<vmem>>, %arg4: memref<1x128xf32, #tpu.memory_space<vmem>>, %arg5: memref<128x128xf32, #tpu.memory_space<vmem>>) attributes {dimension_semantics = [#tpu.dimension_semantics<parallel>, #tpu.dimension_semantics<parallel>], iteration_bounds = array<i64: 1, 1>, scalar_prefetch = 0 : i64, scratch_operands = 0 : i64, tpu.core_type = #tpu.core_type<tc>, window_params = [{transform_indices = @transform_0, window_bounds = array<i64: 128, 32>}, {transform_indices = @transform_1, window_bounds = array<i64: 32, 128>}, {transform_indices = @transform_2, window_bounds = array<i64: 1, 128>}, {transform_indices = @transform_3, window_bounds = array<i64: 128, 128>}]} {
    %c0 = arith.constant 0 : index
    %c0_0 = arith.constant 0 : index
    %0 = vector.load %arg2[%c0, %c0_0] : memref<128x32xbf16, #tpu.memory_space<vmem>>, vector<128x32xbf16>
    %c0_1 = arith.constant 0 : index
    %c0_2 = arith.constant 0 : index
    %1 = vector.load %arg3[%c0_1, %c0_2] : memref<32x128xbf16, #tpu.memory_space<vmem>>, vector<32x128xbf16>
    %cst = arith.constant dense<0.000000e+00> : vector<128x128xf32>
    %2 = tpu.matmul %0, %1, %cst {dimension_numbers = #tpu.dot_dimension_numbers<[1], [0], [0], [1], [0, 0, 1, 1], [], []>} : vector<128x32xbf16>, vector<32x128xbf16>, vector<128x128xf32> -> vector<128x128xf32>
    %c0_3 = arith.constant 0 : index
    %c0_4 = arith.constant 0 : index
    %3 = vector.load %arg4[%c0_3, %c0_4] : memref<1x128xf32, #tpu.memory_space<vmem>>, vector<1x128xf32>
    %4 = vector.broadcast %3 : vector<1x128xf32> to vector<128x128xf32>
    %5 = arith.addf %2, %4 : vector<128x128xf32>
    %cst_5 = arith.constant 0.000000e+00 : f32
    %6 = vector.broadcast %cst_5 : f32 to vector<128x128xf32>
    %7 = arith.cmpf oge, %5, %6 : vector<128x128xf32>
    %cst_6 = arith.constant 2.500000e-01 : f32
    %8 = vector.broadcast %cst_6 : f32 to vector<128x128xf32>
    %9 = arith.mulf %8, %5 : vector<128x128xf32>
    %10 = arith.select %7, %5, %9 : vector<128x128xi1>, vector<128x128xf32>
    %c0_7 = arith.constant 0 : index
    %c0_8 = arith.constant 0 : index
    %11 = vector.load %arg5[%c0_7, %c0_8] : memref<128x128xf32, #tpu.memory_space<vmem>>, vector<128x128xf32>
    tpu.vector_store %arg5[%c0_7, %c0_8], %10 {strides = array<i32>} : memref<128x128xf32, #tpu.memory_space<vmem>>, vector<128x128xf32>,
    return
  }
  func.func @transform_0(%arg0: i32, %arg1: i32) -> (i32, i32) {
    %c0_i32 = arith.constant 0 : i32
    %c0_i32_0 = arith.constant 0 : i32
    return %arg0, %c0_i32 : i32, i32
  }
  func.func @transform_1(%arg0: i32, %arg1: i32) -> (i32, i32) {
    %c0_i32 = arith.constant 0 : i32
    %c0_i32_0 = arith.constant 0 : i32
    return %c0_i32, %arg1 : i32, i32
  }
  func.func @transform_2(%arg0: i32, %arg1: i32) -> (i32, i32) {
    %c0_i32 = arith.constant 0 : i32
    %c0_i32_0 = arith.constant 0 : i32
    return %c0_i32, %arg1 : i32, i32
  }
  func.func @transform_3(%arg0: i32, %arg1: i32) -> (i32, i32) {
    %c0_i32 = arith.constant 0 : i32
    return %arg0, %arg1 : i32, i32
  }
}

module attributes {stable_mosaic.version = 11 : i64} {
  func.func @_mm_kernel(%arg0: i32, %arg1: i32, %arg2: memref<128x128xbf16, #tpu.memory_space<vmem>>, %arg3: memref<128x128xbf16, #tpu.memory_space<vmem>>, %arg4: memref<1x128xf32, #tpu.memory_space<vmem>>, %arg5: memref<128x128xf32, #tpu.memory_space<vmem>>) attributes {dimension_semantics = [#tpu.dimension_semantics<parallel>, #tpu.dimension_semantics<parallel>], iteration_bounds = array<i64: 1, 1>, scalar_prefetch = 0 : i64, scratch_operands = 0 : i64, tpu.core_type = #tpu.core_type<tc>, window_params = [{transform_indices = @transform_0, window_bounds = array<i64: 128, 128>}, {transform_indices = @transform_1, window_bounds = array<i64: 128, 128>}, {transform_indices = @transform_2, window_bounds = array<i64: 1, 128>}, {transform_indices = @transform_3, window_bounds = array<i64: 128, 128>}]} {
    %c0 = arith.constant 0 : index
    %c0_0 = arith.constant 0 : index
    %0 = vector.load %arg2[%c0, %c0_0] : memref<128x128xbf16, #tpu.memory_space<vmem>>, vector<128x128xbf16>
    %c0_1 = arith.constant 0 : index
    %c0_2 = arith.constant 0 : index
    %1 = vector.load %arg3[%c0_1, %c0_2] : memref<128x128xbf16, #tpu.memory_space<vmem>>, vector<128x128xbf16>
    %cst = arith.constant dense<0.000000e+00> : vector<128x128xf32>
    %2 = tpu.matmul %0, %1, %cst {dimension_numbers = #tpu.dot_dimension_numbers<[1], [0], [0], [1], [0, 0, 1, 1], [], []>} : vector<128x128xbf16>, vector<128x128xbf16>, vector<128x128xf32> -> vector<128x128xf32>
    %c0_3 = arith.constant 0 : index
    %c0_4 = arith.constant 0 : index
    %3 = vector.load %arg4[%c0_3, %c0_4] : memref<1x128xf32, #tpu.memory_space<vmem>>, vector<1x128xf32>
    %4 = vector.broadcast %3 : vector<1x128xf32> to vector<128x128xf32>
    %5 = arith.addf %2, %4 : vector<128x128xf32>
    %cst_5 = arith.constant 0.000000e+00 : f32
    %6 = vector.broadcast %cst_5 : f32 to vector<128x128xf32>
    %7 = arith.cmpf oge, %5, %6 : vector<128x128xf32>
    %cst_6 = arith.constant 2.500000e-01 : f32
    %8 = vector.broadcast %cst_6 : f32 to vector<128x128xf32>
    %9 = arith.mulf %8, %5 : vector<128x128xf32>
    %10 = arith.select %7, %5, %9 : vector<128x128xi1>, vector<128x128xf32>
    %c0_7 = arith.constant 0 : index
    %c0_8 = arith.constant 0 : index
    %11 = vector.load %arg5[%c0_7, %c0_8] : memref<128x128xf32, #tpu.memory_space<vmem>>, vector<128x128xf32>
    tpu.vector_store %arg5[%c0_7, %c0_8], %10 {strides = array<i32>} : memref<128x128xf32, #tpu.memory_space<vmem>>, vector<128x128xf32>,
    return
  }
  func.func @transform_0(%arg0: i32, %arg1: i32) -> (i32, i32) {
    %c0_i32 = arith.constant 0 : i32
    %c0_i32_0 = arith.constant 0 : i32
    return %arg0, %c0_i32 : i32, i32
  }
  func.func @transform_1(%arg0: i32, %arg1: i32) -> (i32, i32) {
    %c0_i32 = arith.constant 0 : i32
    %c0_i32_0 = arith.constant 0 : i32
    return %c0_i32, %arg1 : i32, i32
  }
  func.func @transform_2(%arg0: i32, %arg1: i32) -> (i32, i32) {
    %c0_i32 = arith.constant 0 : i32
    %c0_i32_0 = arith.constant 0 : i32
    return %c0_i32, %arg1 : i32, i32
  }
  func.func @transform_3(%arg0: i32, %arg1: i32) -> (i32, i32) {
    %c0_i32 = arith.constant 0 : i32
    return %arg0, %arg1 : i32, i32
  }
}

module attributes {stable_mosaic.version = 11 : i64} {
  func.func @_mm_kernel(%arg0: i32, %arg1: i32, %arg2: memref<176x64xbf16, #tpu.memory_space<vmem>>, %arg3: memref<64x256xbf16, #tpu.memory_space<vmem>>, %arg4: memref<1x256xf32, #tpu.memory_space<vmem>>, %arg5: memref<176x256xf32, #tpu.memory_space<vmem>>) attributes {dimension_semantics = [#tpu.dimension_semantics<parallel>, #tpu.dimension_semantics<parallel>], iteration_bounds = array<i64: 1, 1>, scalar_prefetch = 0 : i64, scratch_operands = 0 : i64, tpu.core_type = #tpu.core_type<tc>, window_params = [{transform_indices = @transform_0, window_bounds = array<i64: 176, 64>}, {transform_indices = @transform_1, window_bounds = array<i64: 64, 256>}, {transform_indices = @transform_2, window_bounds = array<i64: 1, 256>}, {transform_indices = @transform_3, window_bounds = array<i64: 176, 256>}]} {
    %c0 = arith.constant 0 : index
    %c0_0 = arith.constant 0 : index
    %0 = vector.load %arg2[%c0, %c0_0] : memref<176x64xbf16, #tpu.memory_space<vmem>>, vector<176x64xbf16>
    %c0_1 = arith.constant 0 : index
    %c0_2 = arith.constant 0 : index
    %1 = vector.load %arg3[%c0_1, %c0_2] : memref<64x256xbf16, #tpu.memory_space<vmem>>, vector<64x256xbf16>
    %cst = arith.constant dense<0.000000e+00> : vector<176x256xf32>
    %2 = tpu.matmul %0, %1, %cst {dimension_numbers = #tpu.dot_dimension_numbers<[1], [0], [0], [1], [0, 0, 1, 1], [], []>} : vector<176x64xbf16>, vector<64x256xbf16>, vector<176x256xf32> -> vector<176x256xf32>
    %c0_3 = arith.constant 0 : index
    %c0_4 = arith.constant 0 : index
    %3 = vector.load %arg4[%c0_3, %c0_4] : memref<1x256xf32, #tpu.memory_space<vmem>>, vector<1x256xf32>
    %4 = vector.broadcast %3 : vector<1x256xf32> to vector<176x256xf32>
    %5 = arith.addf %2, %4 : vector<176x256xf32>
    %cst_5 = arith.constant 0.000000e+00 : f32
    %6 = vector.broadcast %cst_5 : f32 to vector<176x256xf32>
    %7 = arith.cmpf oge, %5, %6 : vector<176x256xf32>
    %cst_6 = arith.constant 2.500000e-01 : f32
    %8 = vector.broadcast %cst_6 : f32 to vector<176x256xf32>
    %9 = arith.mulf %8, %5 : vector<176x256xf32>
    %10 = arith.select %7, %5, %9 : vector<176x256xi1>, vector<176x256xf32>
    %c0_7 = arith.constant 0 : index
    %c0_8 = arith.constant 0 : index
    %11 = vector.load %arg5[%c0_7, %c0_8] : memref<176x256xf32, #tpu.memory_space<vmem>>, vector<176x256xf32>
    tpu.vector_store %arg5[%c0_7, %c0_8], %10 {strides = array<i32>} : memref<176x256xf32, #tpu.memory_space<vmem>>, vector<176x256xf32>,
    return
  }
  func.func @transform_0(%arg0: i32, %arg1: i32) -> (i32, i32) {
    %c0_i32 = arith.constant 0 : i32
    %c0_i32_0 = arith.constant 0 : i32
    return %arg0, %c0_i32 : i32, i32
  }
  func.func @transform_1(%arg0: i32, %arg1: i32) -> (i32, i32) {
    %c0_i32 = arith.constant 0 : i32
    %c0_i32_0 = arith.constant 0 : i32
    return %c0_i32, %arg1 : i32, i32
  }
  func.func @transform_2(%arg0: i32, %arg1: i32) -> (i32, i32) {
    %c0_i32 = arith.constant 0 : i32
    %c0_i32_0 = arith.constant 0 : i32
    return %c0_i32, %arg1 : i32, i32
  }
  func.func @transform_3(%arg0: i32, %arg1: i32) -> (i32, i32) {
    %c0_i32 = arith.constant 0 : i32
    return %arg0, %arg1 : i32, i32
  }
}

module attributes {stable_mosaic.version = 11 : i64} {
  func.func @_mm_res_kernel(%arg0: i32, %arg1: i32, %arg2: memref<128x1024xbf16, #tpu.memory_space<vmem>>, %arg3: memref<1024x128xbf16, #tpu.memory_space<vmem>>, %arg4: memref<1x128xf32, #tpu.memory_space<vmem>>, %arg5: memref<128x128xf32, #tpu.memory_space<vmem>>, %arg6: memref<128x128xf32, #tpu.memory_space<vmem>>) attributes {dimension_semantics = [#tpu.dimension_semantics<parallel>, #tpu.dimension_semantics<parallel>], iteration_bounds = array<i64: 1, 1>, scalar_prefetch = 0 : i64, scratch_operands = 0 : i64, tpu.core_type = #tpu.core_type<tc>, window_params = [{transform_indices = @transform_0, window_bounds = array<i64: 128, 1024>}, {transform_indices = @transform_1, window_bounds = array<i64: 1024, 128>}, {transform_indices = @transform_2, window_bounds = array<i64: 1, 128>}, {transform_indices = @transform_3, window_bounds = array<i64: 128, 128>}, {transform_indices = @transform_4, window_bounds = array<i64: 128, 128>}]} {
    %c0 = arith.constant 0 : index
    %c0_0 = arith.constant 0 : index
    %0 = vector.load %arg2[%c0, %c0_0] : memref<128x1024xbf16, #tpu.memory_space<vmem>>, vector<128x1024xbf16>
    %c0_1 = arith.constant 0 : index
    %c0_2 = arith.constant 0 : index
    %1 = vector.load %arg3[%c0_1, %c0_2] : memref<1024x128xbf16, #tpu.memory_space<vmem>>, vector<1024x128xbf16>
    %cst = arith.constant dense<0.000000e+00> : vector<128x128xf32>
    %2 = tpu.matmul %0, %1, %cst {dimension_numbers = #tpu.dot_dimension_numbers<[1], [0], [0], [1], [0, 0, 1, 1], [], []>} : vector<128x1024xbf16>, vector<1024x128xbf16>, vector<128x128xf32> -> vector<128x128xf32>
    %c0_3 = arith.constant 0 : index
    %c0_4 = arith.constant 0 : index
    %3 = vector.load %arg4[%c0_3, %c0_4] : memref<1x128xf32, #tpu.memory_space<vmem>>, vector<1x128xf32>
    %4 = vector.broadcast %3 : vector<1x128xf32> to vector<128x128xf32>
    %5 = arith.addf %2, %4 : vector<128x128xf32>
    %cst_5 = arith.constant 0.000000e+00 : f32
    %6 = vector.broadcast %cst_5 : f32 to vector<128x128xf32>
    %7 = arith.cmpf oge, %5, %6 : vector<128x128xf32>
    %cst_6 = arith.constant 2.500000e-01 : f32
    %8 = vector.broadcast %cst_6 : f32 to vector<128x128xf32>
    %9 = arith.mulf %8, %5 : vector<128x128xf32>
    %10 = arith.select %7, %5, %9 : vector<128x128xi1>, vector<128x128xf32>
    %c0_7 = arith.constant 0 : index
    %c0_8 = arith.constant 0 : index
    %11 = vector.load %arg5[%c0_7, %c0_8] : memref<128x128xf32, #tpu.memory_space<vmem>>, vector<128x128xf32>
    %cst_9 = arith.constant -1.000000e+00 : f32
    %12 = vector.broadcast %cst_9 : f32 to vector<128x128xf32>
    %13 = arith.mulf %12, %11 : vector<128x128xf32>
    %14 = arith.addf %10, %13 : vector<128x128xf32>
    %c0_10 = arith.constant 0 : index
    %c0_11 = arith.constant 0 : index
    %15 = vector.load %arg6[%c0_10, %c0_11] : memref<128x128xf32, #tpu.memory_space<vmem>>, vector<128x128xf32>
    tpu.vector_store %arg6[%c0_10, %c0_11], %14 {strides = array<i32>} : memref<128x128xf32, #tpu.memory_space<vmem>>, vector<128x128xf32>,
    return
  }
  func.func @transform_0(%arg0: i32, %arg1: i32) -> (i32, i32) {
    %c0_i32 = arith.constant 0 : i32
    %c0_i32_0 = arith.constant 0 : i32
    return %arg0, %c0_i32 : i32, i32
  }
  func.func @transform_1(%arg0: i32, %arg1: i32) -> (i32, i32) {
    %c0_i32 = arith.constant 0 : i32
    %c0_i32_0 = arith.constant 0 : i32
    return %c0_i32, %arg1 : i32, i32
  }
  func.func @transform_2(%arg0: i32, %arg1: i32) -> (i32, i32) {
    %c0_i32 = arith.constant 0 : i32
    %c0_i32_0 = arith.constant 0 : i32
    return %c0_i32, %arg1 : i32, i32
  }
  func.func @transform_3(%arg0: i32, %arg1: i32) -> (i32, i32) {
    %c0_i32 = arith.constant 0 : i32
    return %arg0, %arg1 : i32, i32
  }
  func.func @transform_4(%arg0: i32, %arg1: i32) -> (i32, i32) {
    %c0_i32 = arith.constant 0 : i32
    return %arg0, %arg1 : i32, i32
  }
}

module attributes {stable_mosaic.version = 11 : i64} {
  func.func @_mm_kernel(%arg0: i32, %arg1: i32, %arg2: memref<128x1024xbf16, #tpu.memory_space<vmem>>, %arg3: memref<1024x128xbf16, #tpu.memory_space<vmem>>, %arg4: memref<1x128xf32, #tpu.memory_space<vmem>>, %arg5: memref<128x128xf32, #tpu.memory_space<vmem>>) attributes {dimension_semantics = [#tpu.dimension_semantics<parallel>, #tpu.dimension_semantics<parallel>], iteration_bounds = array<i64: 1, 1>, scalar_prefetch = 0 : i64, scratch_operands = 0 : i64, tpu.core_type = #tpu.core_type<tc>, window_params = [{transform_indices = @transform_0, window_bounds = array<i64: 128, 1024>}, {transform_indices = @transform_1, window_bounds = array<i64: 1024, 128>}, {transform_indices = @transform_2, window_bounds = array<i64: 1, 128>}, {transform_indices = @transform_3, window_bounds = array<i64: 128, 128>}]} {
    %c0 = arith.constant 0 : index
    %c0_0 = arith.constant 0 : index
    %0 = vector.load %arg2[%c0, %c0_0] : memref<128x1024xbf16, #tpu.memory_space<vmem>>, vector<128x1024xbf16>
    %c0_1 = arith.constant 0 : index
    %c0_2 = arith.constant 0 : index
    %1 = vector.load %arg3[%c0_1, %c0_2] : memref<1024x128xbf16, #tpu.memory_space<vmem>>, vector<1024x128xbf16>
    %cst = arith.constant dense<0.000000e+00> : vector<128x128xf32>
    %2 = tpu.matmul %0, %1, %cst {dimension_numbers = #tpu.dot_dimension_numbers<[1], [0], [0], [1], [0, 0, 1, 1], [], []>} : vector<128x1024xbf16>, vector<1024x128xbf16>, vector<128x128xf32> -> vector<128x128xf32>
    %c0_3 = arith.constant 0 : index
    %c0_4 = arith.constant 0 : index
    %3 = vector.load %arg4[%c0_3, %c0_4] : memref<1x128xf32, #tpu.memory_space<vmem>>, vector<1x128xf32>
    %4 = vector.broadcast %3 : vector<1x128xf32> to vector<128x128xf32>
    %5 = arith.addf %2, %4 : vector<128x128xf32>
    %cst_5 = arith.constant 0.000000e+00 : f32
    %6 = vector.broadcast %cst_5 : f32 to vector<128x128xf32>
    %7 = arith.cmpf oge, %5, %6 : vector<128x128xf32>
    %cst_6 = arith.constant 2.500000e-01 : f32
    %8 = vector.broadcast %cst_6 : f32 to vector<128x128xf32>
    %9 = arith.mulf %8, %5 : vector<128x128xf32>
    %10 = arith.select %7, %5, %9 : vector<128x128xi1>, vector<128x128xf32>
    %c0_7 = arith.constant 0 : index
    %c0_8 = arith.constant 0 : index
    %11 = vector.load %arg5[%c0_7, %c0_8] : memref<128x128xf32, #tpu.memory_space<vmem>>, vector<128x128xf32>
    tpu.vector_store %arg5[%c0_7, %c0_8], %10 {strides = array<i32>} : memref<128x128xf32, #tpu.memory_space<vmem>>, vector<128x128xf32>,
    return
  }
  func.func @transform_0(%arg0: i32, %arg1: i32) -> (i32, i32) {
    %c0_i32 = arith.constant 0 : i32
    %c0_i32_0 = arith.constant 0 : i32
    return %arg0, %c0_i32 : i32, i32
  }
  func.func @transform_1(%arg0: i32, %arg1: i32) -> (i32, i32) {
    %c0_i32 = arith.constant 0 : i32
    %c0_i32_0 = arith.constant 0 : i32
    return %c0_i32, %arg1 : i32, i32
  }
  func.func @transform_2(%arg0: i32, %arg1: i32) -> (i32, i32) {
    %c0_i32 = arith.constant 0 : i32
    %c0_i32_0 = arith.constant 0 : i32
    return %c0_i32, %arg1 : i32, i32
  }
  func.func @transform_3(%arg0: i32, %arg1: i32) -> (i32, i32) {
    %c0_i32 = arith.constant 0 : i32
    return %arg0, %arg1 : i32, i32
  }
}

module attributes {stable_mosaic.version = 11 : i64} {
  func.func @_mm_res_kernel(%arg0: i32, %arg1: i32, %arg2: memref<128x1024xbf16, #tpu.memory_space<vmem>>, %arg3: memref<1024x128xbf16, #tpu.memory_space<vmem>>, %arg4: memref<1x128xf32, #tpu.memory_space<vmem>>, %arg5: memref<128x128xf32, #tpu.memory_space<vmem>>, %arg6: memref<128x128xf32, #tpu.memory_space<vmem>>) attributes {dimension_semantics = [#tpu.dimension_semantics<parallel>, #tpu.dimension_semantics<parallel>], iteration_bounds = array<i64: 1, 1>, scalar_prefetch = 0 : i64, scratch_operands = 0 : i64, tpu.core_type = #tpu.core_type<tc>, window_params = [{transform_indices = @transform_0, window_bounds = array<i64: 128, 1024>}, {transform_indices = @transform_1, window_bounds = array<i64: 1024, 128>}, {transform_indices = @transform_2, window_bounds = array<i64: 1, 128>}, {transform_indices = @transform_3, window_bounds = array<i64: 128, 128>}, {transform_indices = @transform_4, window_bounds = array<i64: 128, 128>}]} {
    %c0 = arith.constant 0 : index
    %c0_0 = arith.constant 0 : index
    %0 = vector.load %arg2[%c0, %c0_0] : memref<128x1024xbf16, #tpu.memory_space<vmem>>, vector<128x1024xbf16>
    %c0_1 = arith.constant 0 : index
    %c0_2 = arith.constant 0 : index
    %1 = vector.load %arg3[%c0_1, %c0_2] : memref<1024x128xbf16, #tpu.memory_space<vmem>>, vector<1024x128xbf16>
    %cst = arith.constant dense<0.000000e+00> : vector<128x128xf32>
    %2 = tpu.matmul %0, %1, %cst {dimension_numbers = #tpu.dot_dimension_numbers<[1], [0], [0], [1], [0, 0, 1, 1], [], []>} : vector<128x1024xbf16>, vector<1024x128xbf16>, vector<128x128xf32> -> vector<128x128xf32>
    %c0_3 = arith.constant 0 : index
    %c0_4 = arith.constant 0 : index
    %3 = vector.load %arg4[%c0_3, %c0_4] : memref<1x128xf32, #tpu.memory_space<vmem>>, vector<1x128xf32>
    %4 = vector.broadcast %3 : vector<1x128xf32> to vector<128x128xf32>
    %5 = arith.addf %2, %4 : vector<128x128xf32>
    %cst_5 = arith.constant 0.000000e+00 : f32
    %6 = vector.broadcast %cst_5 : f32 to vector<128x128xf32>
    %7 = arith.cmpf oge, %5, %6 : vector<128x128xf32>
    %cst_6 = arith.constant 2.500000e-01 : f32
    %8 = vector.broadcast %cst_6 : f32 to vector<128x128xf32>
    %9 = arith.mulf %8, %5 : vector<128x128xf32>
    %10 = arith.select %7, %5, %9 : vector<128x128xi1>, vector<128x128xf32>
    %c0_7 = arith.constant 0 : index
    %c0_8 = arith.constant 0 : index
    %11 = vector.load %arg5[%c0_7, %c0_8] : memref<128x128xf32, #tpu.memory_space<vmem>>, vector<128x128xf32>
    %cst_9 = arith.constant 1.000000e+00 : f32
    %12 = vector.broadcast %cst_9 : f32 to vector<128x128xf32>
    %13 = arith.mulf %12, %11 : vector<128x128xf32>
    %14 = arith.addf %10, %13 : vector<128x128xf32>
    %c0_10 = arith.constant 0 : index
    %c0_11 = arith.constant 0 : index
    %15 = vector.load %arg6[%c0_10, %c0_11] : memref<128x128xf32, #tpu.memory_space<vmem>>, vector<128x128xf32>
    tpu.vector_store %arg6[%c0_10, %c0_11], %14 {strides = array<i32>} : memref<128x128xf32, #tpu.memory_space<vmem>>, vector<128x128xf32>,
    return
  }
  func.func @transform_0(%arg0: i32, %arg1: i32) -> (i32, i32) {
    %c0_i32 = arith.constant 0 : i32
    %c0_i32_0 = arith.constant 0 : i32
    return %arg0, %c0_i32 : i32, i32
  }
  func.func @transform_1(%arg0: i32, %arg1: i32) -> (i32, i32) {
    %c0_i32 = arith.constant 0 : i32
    %c0_i32_0 = arith.constant 0 : i32
    return %c0_i32, %arg1 : i32, i32
  }
  func.func @transform_2(%arg0: i32, %arg1: i32) -> (i32, i32) {
    %c0_i32 = arith.constant 0 : i32
    %c0_i32_0 = arith.constant 0 : i32
    return %c0_i32, %arg1 : i32, i32
  }
  func.func @transform_3(%arg0: i32, %arg1: i32) -> (i32, i32) {
    %c0_i32 = arith.constant 0 : i32
    return %arg0, %arg1 : i32, i32
  }
  func.func @transform_4(%arg0: i32, %arg1: i32) -> (i32, i32) {
    %c0_i32 = arith.constant 0 : i32
    return %arg0, %arg1 : i32, i32
  }
}

module attributes {stable_mosaic.version = 11 : i64} {
  func.func @_mm_kernel(%arg0: i32, %arg1: i32, %arg2: memref<512x16xbf16, #tpu.memory_space<vmem>>, %arg3: memref<16x128xbf16, #tpu.memory_space<vmem>>, %arg4: memref<1x128xf32, #tpu.memory_space<vmem>>, %arg5: memref<512x128xf32, #tpu.memory_space<vmem>>) attributes {dimension_semantics = [#tpu.dimension_semantics<parallel>, #tpu.dimension_semantics<parallel>], iteration_bounds = array<i64: 4, 1>, scalar_prefetch = 0 : i64, scratch_operands = 0 : i64, tpu.core_type = #tpu.core_type<tc>, window_params = [{transform_indices = @transform_0, window_bounds = array<i64: 512, 16>}, {transform_indices = @transform_1, window_bounds = array<i64: 16, 128>}, {transform_indices = @transform_2, window_bounds = array<i64: 1, 128>}, {transform_indices = @transform_3, window_bounds = array<i64: 512, 128>}]} {
    %c0 = arith.constant 0 : index
    %c0_0 = arith.constant 0 : index
    %0 = vector.load %arg2[%c0, %c0_0] : memref<512x16xbf16, #tpu.memory_space<vmem>>, vector<512x16xbf16>
    %c0_1 = arith.constant 0 : index
    %c0_2 = arith.constant 0 : index
    %1 = vector.load %arg3[%c0_1, %c0_2] : memref<16x128xbf16, #tpu.memory_space<vmem>>, vector<16x128xbf16>
    %cst = arith.constant dense<0.000000e+00> : vector<512x128xf32>
    %2 = tpu.matmul %0, %1, %cst {dimension_numbers = #tpu.dot_dimension_numbers<[1], [0], [0], [1], [0, 0, 1, 1], [], []>} : vector<512x16xbf16>, vector<16x128xbf16>, vector<512x128xf32> -> vector<512x128xf32>
    %c0_3 = arith.constant 0 : index
    %c0_4 = arith.constant 0 : index
    %3 = vector.load %arg4[%c0_3, %c0_4] : memref<1x128xf32, #tpu.memory_space<vmem>>, vector<1x128xf32>
    %4 = vector.broadcast %3 : vector<1x128xf32> to vector<512x128xf32>
    %5 = arith.addf %2, %4 : vector<512x128xf32>
    %c0_5 = arith.constant 0 : index
    %c0_6 = arith.constant 0 : index
    %6 = vector.load %arg5[%c0_5, %c0_6] : memref<512x128xf32, #tpu.memory_space<vmem>>, vector<512x128xf32>
    tpu.vector_store %arg5[%c0_5, %c0_6], %5 {strides = array<i32>} : memref<512x128xf32, #tpu.memory_space<vmem>>, vector<512x128xf32>,
    return
  }
  func.func @transform_0(%arg0: i32, %arg1: i32) -> (i32, i32) {
    %c0_i32 = arith.constant 0 : i32
    %c0_i32_0 = arith.constant 0 : i32
    return %arg0, %c0_i32 : i32, i32
  }
  func.func @transform_1(%arg0: i32, %arg1: i32) -> (i32, i32) {
    %c0_i32 = arith.constant 0 : i32
    %c0_i32_0 = arith.constant 0 : i32
    return %c0_i32, %arg1 : i32, i32
  }
  func.func @transform_2(%arg0: i32, %arg1: i32) -> (i32, i32) {
    %c0_i32 = arith.constant 0 : i32
    %c0_i32_0 = arith.constant 0 : i32
    return %c0_i32, %arg1 : i32, i32
  }
  func.func @transform_3(%arg0: i32, %arg1: i32) -> (i32, i32) {
    %c0_i32 = arith.constant 0 : i32
    return %arg0, %arg1 : i32, i32
  }
}

</mosaic_0001>

<bundles_post_ra>
// kernel: _lambda_.13
= control target key start
LH: loop header
LB: loop body
LE: loop exit
PB: predicated region body
PF: predicated region fallthrough
CT: control target
= control target key end

     0   :  { %8 = vsyncpa [#allocation3], 0  ;;  %s576_s0 = inlined_call_operand.vmem [shape: bf16[128,128], index: 0, kind: input, shape index: {}]   ;;  %s577_s1 = inlined_call_operand.hbm [shape: bf16[128,128], index: 1, kind: input, shape index: {}]   ;;  %s578_s2 = inlined_call_operand.hbm [shape: f32[1,128], index: 2, kind: input, shape index: {}]   ;;  %s579_s3 = inlined_call_operand.vmem [shape: f32[128,128], index: 3, kind: output, shape index: {}]  }
   0x1   :  { %s16_s14 = sshll.u32 %s577_s1, 4  ;;  %s17_s14 = int_to_ptr.hbm [resolvable:$true] %s16_s14 }
   0x2   :  { %9 = vsyncpa [#allocation5], 0  ;;  %s456_s15 = smov [#allocation2]   ;;  %s30_s19 = sshll.u32 %s578_s2, 4  ;;  %s31_s19 = int_to_ptr.hbm [resolvable:$true] %s30_s19 }
   0x3   :  { %s18_s16 = sshll.u32 %s456_s15, 4  ;;  %s457_s20 = smov 64   ;;  %s19_s16 = int_to_ptr.vmem [resolvable:$true] %s18_s16 }
   0x4   :  { %s458_s21 = smov 4   ;;  %s459_s22 = smov [#allocation4]  }
   0x5   :  { %24 = dma.hbm_to_vmem [thread:$0]  %s17_s14, 1024, %s19_s16, [#allocation3], %s457_s20, %s457_s20, %s458_s21  }
   0x6   :  { %s32_s23 = sshll.u32 %s459_s22, 4  ;;  %s33_s23 = int_to_ptr.vmem [resolvable:$true] %s32_s23 }
   0x7   :  { %35 = dma.hbm_to_vmem [thread:$0]  %s31_s19, 16, %s33_s23, [#allocation5]  }
   0x8   :  { %452 = dma.done.wait [#allocation3], 1024  }
   0x9   :  { %453 = vsyncadd [#allocation3], 4294966272 }
   0xa   :  { %454 = dma.done.wait [#allocation5], 16  }
   0xb   :  { %455 = vsyncadd [#allocation5], 4294967280  ;;  %v374_v0 = vld [vmem:[#allocation2 + $0x38] sm:$0xff]  ;;  %v373_v1 = vld [vmem:[#allocation2 + $0x30] sm:$0xff] }
   0xc   :  { %176 = vmatpush.bf16.msra.mxu0 %v374_v0  ;;  %375 = vmatpush.bf16.msra.mxu1 %v374_v0  ;;  %v372_v2 = vld [vmem:[#allocation2 + $0x28] sm:$0xff]  ;;  %v371_v3 = vld [vmem:[#allocation2 + $0x20] sm:$0xff]  ;;  %v370_v4 = vld [vmem:[#allocation2 + $0x18] sm:$0xff] }
   0xd   :  { %376 = vmatpush.bf16.msra.mxu2 %v374_v0  ;;  %377 = vmatpush.bf16.msra.mxu3 %v374_v0  ;;  %v369_v5 = vld [vmem:[#allocation2 + $0x10] sm:$0xff]  ;;  %v368_v6 = vld [vmem:[#allocation2 + $0x8] sm:$0xff]  ;;  %v367_v7 = vld [vmem:[#allocation2] sm:$0xff] }
   0xe   :  { %v359_v8 = vld [vmem:[%s576_s0] sm:$0xff]  ;;  %v361_v9 = vld [vmem:[%s576_s0 + $0x10] sm:$0xff]  ;;  %v360_v12 = vld [vmem:[%s576_s0 + $0x8] sm:$0xff] }
   0xf   :  { %v363_v10 = vld [vmem:[%s576_s0 + $0x20] sm:$0xff]  ;;  %v365_v11 = vld [vmem:[%s576_s0 + $0x30] sm:$0xff]  ;;  %v362_v13 = vld [vmem:[%s576_s0 + $0x18] sm:$0xff] }
  0x10   :  { %177 = vmatpush.bf16.msra.mxu0 %v373_v1  ;;  %378 = vmatpush.bf16.msra.mxu1 %v373_v1  ;;  %v364_v14 = vld [vmem:[%s576_s0 + $0x28] sm:$0xff]  ;;  %v366_v15 = vld [vmem:[%s576_s0 + $0x38] sm:$0xff]  ;;  %v510_v16 = vld [vmem:[#allocation4] ss:$0 sm:$0xff] }
  0x11   :  { %379 = vmatpush.bf16.msra.mxu2 %v373_v1  ;;  %380 = vmatpush.bf16.msra.mxu3 %v373_v1 }
  0x14   :  { %178 = vmatpush.bf16.msra.mxu0 %v372_v2  ;;  %381 = vmatpush.bf16.msra.mxu1 %v372_v2 }
  0x15   :  { %382 = vmatpush.bf16.msra.mxu2 %v372_v2  ;;  %383 = vmatpush.bf16.msra.mxu3 %v372_v2 }
  0x18   :  { %179 = vmatpush.bf16.msra.mxu0 %v371_v3  ;;  %384 = vmatpush.bf16.msra.mxu1 %v371_v3 }
  0x19   :  { %385 = vmatpush.bf16.msra.mxu2 %v371_v3  ;;  %386 = vmatpush.bf16.msra.mxu3 %v371_v3 }
  0x1c   :  { %180 = vmatpush.bf16.msra.mxu0 %v370_v4  ;;  %387 = vmatpush.bf16.msra.mxu1 %v370_v4 }
  0x1d   :  { %388 = vmatpush.bf16.msra.mxu2 %v370_v4  ;;  %389 = vmatpush.bf16.msra.mxu3 %v370_v4 }
  0x20   :  { %181 = vmatpush.bf16.msra.mxu0 %v369_v5  ;;  %390 = vmatpush.bf16.msra.mxu1 %v369_v5 }
  0x21   :  { %391 = vmatpush.bf16.msra.mxu2 %v369_v5  ;;  %392 = vmatpush.bf16.msra.mxu3 %v369_v5 }
  0x24   :  { %182 = vmatpush.bf16.msra.mxu0 %v368_v6  ;;  %393 = vmatpush.bf16.msra.mxu1 %v368_v6 }
  0x25   :  { %394 = vmatpush.bf16.msra.mxu2 %v368_v6  ;;  %395 = vmatpush.bf16.msra.mxu3 %v368_v6 }
  0x28   :  { %183 = vmatpush.bf16.msra.mxu0 %v367_v7  ;;  %396 = vmatpush.bf16.msra.mxu1 %v367_v7 }
  0x29   :  { %397 = vmatpush.bf16.msra.mxu2 %v367_v7  ;;  %398 = vmatpush.bf16.msra.mxu3 %v367_v7 }
  0x2b   :  { %184 = vmatmul.bf16.vlgmr.msra.gmra.mxu0 %v359_v8  ;;  %194 = vmatmul.bf16.vlgmr.msra.gmra.mxu1 %v361_v9 }
  0x2c   :  { %204 = vmatmul.bf16.vlgmr.msra.gmra.mxu2 %v363_v10  ;;  %214 = vmatmul.bf16.vlgmr.msra.gmra.mxu3 %v365_v11 }
  0x3b   :  { %189 = vmatmul.bf16.gmra.mxu0 %v360_v12  ;;  %199 = vmatmul.bf16.gmra.mxu1 %v362_v13 }
  0x3c   :  { %209 = vmatmul.bf16.gmra.mxu2 %v364_v14  ;;  %219 = vmatmul.bf16.gmra.mxu3 %v366_v15 }
  0xa8   :  { %v185_v17 = vpop.f32.mrf.mxu0  ;;  %v195_v18 = vpop.f32.mrf.mxu1 }
  0xa9   :  { %v186_v19 = vadd.f32 %v510_v16, %v185_v17  ;;  %v196_v20 = vadd.f32 %v510_v16, %v195_v18 }
  0xab   :  { %vm225_vm0 = vcmp.ge.f32.partialorder %v186_v19, 0.0  ;;  %v241_v21 = vmul.f32 0.25, %v186_v19  ;;  %vm229_vm1 = vcmp.ge.f32.partialorder %v196_v20, 0.0  ;;  %v245_v22 = vmul.f32 0.25, %v196_v20 }
  0xad   :  { %v257_v23 = vsel %vm225_vm0, %v186_v19, %v241_v21  ;;  %v261_v24 = vsel %vm229_vm1, %v196_v20, %v245_v22 }
  0xae   :  { %273 = vst [vmem:[%s579_s3] sm:$0xff] %v257_v23 }
  0xaf   :  { %277 = vst [vmem:[%s579_s3 + $0x20] sm:$0xff] %v261_v24  ;;  %v205_v25 = vpop.f32.mrf.mxu2  ;;  %v215_v26 = vpop.f32.mrf.mxu3 }
  0xb0   :  { %v206_v27 = vadd.f32 %v510_v16, %v205_v25  ;;  %v216_v28 = vadd.f32 %v510_v16, %v215_v26  ;;  %v187_v29 = vpop.f32.mrf.mxu0  ;;  %v197_v30 = vpop.f32.mrf.mxu1 }
  0xb1   :  { %v188_v31 = vadd.f32 %v510_v16, %v187_v29  ;;  %v198_v32 = vadd.f32 %v510_v16, %v197_v30 }
  0xb2   :  { %vm233_vm2 = vcmp.ge.f32.partialorder %v206_v27, 0.0  ;;  %v249_v33 = vmul.f32 0.25, %v206_v27  ;;  %vm237_vm3 = vcmp.ge.f32.partialorder %v216_v28, 0.0  ;;  %v253_v34 = vmul.f32 0.25, %v216_v28 }
  0xb3   :  { %vm226_vm4 = vcmp.ge.f32.partialorder %v188_v31, 0.0  ;;  %v242_v35 = vmul.f32 0.25, %v188_v31  ;;  %vm230_vm5 = vcmp.ge.f32.partialorder %v198_v32, 0.0  ;;  %v246_v36 = vmul.f32 0.25, %v198_v32 }
  0xb4   :  { %v265_v37 = vsel %vm233_vm2, %v206_v27, %v249_v33  ;;  %v269_v38 = vsel %vm237_vm3, %v216_v28, %v253_v34 }
  0xb5   :  { %281 = vst [vmem:[%s579_s3 + $0x40] sm:$0xff] %v265_v37  ;;  %v258_v39 = vsel %vm226_vm4, %v188_v31, %v242_v35  ;;  %v262_v40 = vsel %vm230_vm5, %v198_v32, %v246_v36 }
  0xb6   :  { %285 = vst [vmem:[%s579_s3 + $0x60] sm:$0xff] %v269_v38 }
  0xb7   :  { %274 = vst [vmem:[%s579_s3 + $0x8] sm:$0xff] %v258_v39  ;;  %v207_v41 = vpop.f32.mrf.mxu2  ;;  %v217_v42 = vpop.f32.mrf.mxu3 }
  0xb8   :  { %278 = vst [vmem:[%s579_s3 + $0x28] sm:$0xff] %v262_v40  ;;  %v208_v43 = vadd.f32 %v510_v16, %v207_v41  ;;  %v218_v44 = vadd.f32 %v510_v16, %v217_v42  ;;  %v190_v45 = vpop.f32.mrf.mxu0  ;;  %v200_v46 = vpop.f32.mrf.mxu1 }
  0xb9   :  { %v191_v47 = vadd.f32 %v510_v16, %v190_v45  ;;  %v201_v48 = vadd.f32 %v510_v16, %v200_v46 }
  0xba   :  { %vm234_vm6 = vcmp.ge.f32.partialorder %v208_v43, 0.0  ;;  %v250_v49 = vmul.f32 0.25, %v208_v43  ;;  %vm238_vm7 = vcmp.ge.f32.partialorder %v218_v44, 0.0  ;;  %v254_v50 = vmul.f32 0.25, %v218_v44 }
  0xbb   :  { %vm227_vm8 = vcmp.ge.f32.partialorder %v191_v47, 0.0  ;;  %v243_v51 = vmul.f32 0.25, %v191_v47  ;;  %vm231_vm9 = vcmp.ge.f32.partialorder %v201_v48, 0.0  ;;  %v247_v52 = vmul.f32 0.25, %v201_v48 }
  0xbc   :  { %v266_v53 = vsel %vm234_vm6, %v208_v43, %v250_v49  ;;  %v270_v54 = vsel %vm238_vm7, %v218_v44, %v254_v50 }
  0xbd   :  { %282 = vst [vmem:[%s579_s3 + $0x48] sm:$0xff] %v266_v53  ;;  %v259_v55 = vsel %vm227_vm8, %v191_v47, %v243_v51  ;;  %v263_v56 = vsel %vm231_vm9, %v201_v48, %v247_v52 }
  0xbe   :  { %286 = vst [vmem:[%s579_s3 + $0x68] sm:$0xff] %v270_v54 }
  0xbf   :  { %275 = vst [vmem:[%s579_s3 + $0x10] sm:$0xff] %v259_v55  ;;  %v210_v57 = vpop.f32.mrf.mxu2  ;;  %v220_v58 = vpop.f32.mrf.mxu3 }
  0xc0   :  { %279 = vst [vmem:[%s579_s3 + $0x30] sm:$0xff] %v263_v56  ;;  %v211_v59 = vadd.f32 %v510_v16, %v210_v57  ;;  %v221_v60 = vadd.f32 %v510_v16, %v220_v58  ;;  %v192_v61 = vpop.f32.mrf.mxu0  ;;  %v202_v62 = vpop.f32.mrf.mxu1 }
  0xc1   :  { %v193_v63 = vadd.f32 %v510_v16, %v192_v61  ;;  %v203_v0 = vadd.f32 %v510_v16, %v202_v62 }
  0xc2   :  { %vm235_vm10 = vcmp.ge.f32.partialorder %v211_v59, 0.0  ;;  %v251_v1 = vmul.f32 0.25, %v211_v59  ;;  %vm239_vm11 = vcmp.ge.f32.partialorder %v221_v60, 0.0  ;;  %v255_v2 = vmul.f32 0.25, %v221_v60 }
  0xc3   :  { %vm228_vm12 = vcmp.ge.f32.partialorder %v193_v63, 0.0  ;;  %v244_v3 = vmul.f32 0.25, %v193_v63  ;;  %vm232_vm13 = vcmp.ge.f32.partialorder %v203_v0, 0.0  ;;  %v248_v4 = vmul.f32 0.25, %v203_v0 }
  0xc4   :  { %v267_v5 = vsel %vm235_vm10, %v211_v59, %v251_v1  ;;  %v271_v6 = vsel %vm239_vm11, %v221_v60, %v255_v2 }
  0xc5   :  { %283 = vst [vmem:[%s579_s3 + $0x50] sm:$0xff] %v267_v5  ;;  %v260_v7 = vsel %vm228_vm12, %v193_v63, %v244_v3  ;;  %v264_v8 = vsel %vm232_vm13, %v203_v0, %v248_v4 }
  0xc6   :  { %287 = vst [vmem:[%s579_s3 + $0x70] sm:$0xff] %v271_v6 }
  0xc7   :  { %276 = vst [vmem:[%s579_s3 + $0x18] sm:$0xff] %v260_v7  ;;  %v212_v9 = vpop.f32.mrf.mxu2  ;;  %v222_v10 = vpop.f32.mrf.mxu3 }
  0xc8   :  { %280 = vst [vmem:[%s579_s3 + $0x38] sm:$0xff] %v264_v8  ;;  %v213_v11 = vadd.f32 %v510_v16, %v212_v9  ;;  %v223_v12 = vadd.f32 %v510_v16, %v222_v10 }
  0xca   :  { %vm236_vm14 = vcmp.ge.f32.partialorder %v213_v11, 0.0  ;;  %v252_v13 = vmul.f32 0.25, %v213_v11  ;;  %vm240_vm15 = vcmp.ge.f32.partialorder %v223_v12, 0.0  ;;  %v256_v14 = vmul.f32 0.25, %v223_v12 }
  0xcc   :  { %v268_v15 = vsel %vm236_vm14, %v213_v11, %v252_v13  ;;  %v272_v17 = vsel %vm240_vm15, %v223_v12, %v256_v14 }
  0xcd   :  { %284 = vst [vmem:[%s579_s3 + $0x58] sm:$0xff] %v268_v15 }
  0xce   :  { %288 = vst [vmem:[%s579_s3 + $0x78] sm:$0xff] %v272_v17 }
  0xcf   :  { %293 = vsyncpa [#allocation3], 1 }
  0xd0   :  { %294 = vsyncpa [#allocation5], 1 }

// kernel: _lambda_.12
= control target key start
LH: loop header
LB: loop body
LE: loop exit
PB: predicated region body
PF: predicated region fallthrough
CT: control target
= control target key end

     0   :  { %8 = vsyncpa [#allocation3], 0  ;;  %s514_s0 = inlined_call_operand.vmem [shape: bf16[128,32], index: 0, kind: input, shape index: {}]   ;;  %s515_s1 = inlined_call_operand.hbm [shape: bf16[32,128], index: 1, kind: input, shape index: {}]   ;;  %s516_s2 = inlined_call_operand.hbm [shape: f32[1,128], index: 2, kind: input, shape index: {}]   ;;  %s517_s3 = inlined_call_operand.vmem [shape: f32[128,128], index: 3, kind: output, shape index: {}]  }
   0x1   :  { %s16_s14 = sshll.u32 %s515_s1, 4  ;;  %s17_s14 = int_to_ptr.hbm [resolvable:$true] %s16_s14 }
   0x2   :  { %9 = vsyncpa [#allocation5], 0  ;;  %s386_s15 = smov [#allocation2]   ;;  %s30_s19 = sshll.u32 %s516_s2, 4  ;;  %s31_s19 = int_to_ptr.hbm [resolvable:$true] %s30_s19 }
   0x3   :  { %s18_s16 = sshll.u32 %s386_s15, 4  ;;  %s387_s20 = smov 64   ;;  %s19_s16 = int_to_ptr.vmem [resolvable:$true] %s18_s16 }
   0x4   :  { %s388_s21 = smov 4   ;;  %s389_s22 = smov [#allocation4]  }
   0x5   :  { %24 = dma.hbm_to_vmem [thread:$0]  %s17_s14, 256, %s19_s16, [#allocation3], %s387_s20, %s387_s20, %s388_s21  }
   0x6   :  { %s32_s23 = sshll.u32 %s389_s22, 4  ;;  %s33_s23 = int_to_ptr.vmem [resolvable:$true] %s32_s23 }
   0x7   :  { %35 = dma.hbm_to_vmem [thread:$0]  %s31_s19, 16, %s33_s23, [#allocation5]  }
   0x8   :  { %382 = dma.done.wait [#allocation3], 256  }
   0x9   :  { %383 = vsyncadd [#allocation3], 4294967040 }
   0xa   :  { %384 = dma.done.wait [#allocation5], 16  }
   0xb   :  { %385 = vsyncadd [#allocation5], 4294967280  ;;  %v322_v0 = vld [vmem:[#allocation2 + $0x8] sm:$0xff]  ;;  %v321_v1 = vld [vmem:[#allocation2] sm:$0xff]  ;;  %vm121_vm0 = vcmask 261120  }
   0xc   :  { %152 = vmatpush.bf16.msra.mxu0 %v322_v0  ;;  %323 = vmatpush.bf16.msra.mxu1 %v322_v0  ;;  %v313_v2 = vld [vmem:[%s514_s0] sm:$0xff]  ;;  %v315_v3 = vld [vmem:[%s514_s0 + $0x10] sm:$0xff]  ;;  %v314_v6 = vld [vmem:[%s514_s0 + $0x8] sm:$0xff] }
   0xd   :  { %324 = vmatpush.bf16.msra.mxu2 %v322_v0  ;;  %325 = vmatpush.bf16.msra.mxu3 %v322_v0  ;;  %v317_v4 = vld [vmem:[%s514_s0 + $0x20] sm:$0xff]  ;;  %v319_v5 = vld [vmem:[%s514_s0 + $0x30] sm:$0xff]  ;;  %v316_v7 = vld [vmem:[%s514_s0 + $0x18] sm:$0xff] }
   0xe   :  { %v318_v8 = vld [vmem:[%s514_s0 + $0x28] sm:$0xff]  ;;  %v320_v9 = vld [vmem:[%s514_s0 + $0x38] sm:$0xff]  ;;  %v448_v10 = vld [vmem:[#allocation4] ss:$0 sm:$0xff] }
  0x10   :  { %153 = vmatpush.bf16.msra.mxu0 %v321_v1  ;;  %326 = vmatpush.bf16.msra.mxu1 %v321_v1 }
  0x11   :  { %327 = vmatpush.bf16.msra.mxu2 %v321_v1  ;;  %328 = vmatpush.bf16.msra.mxu3 %v321_v1 }
  0x13   :  { %305 = vmatmul.msk.bf16.vlgmr.msra.gmra.mxu0 %vm121_vm0, %v313_v2  ;;  %307 = vmatmul.msk.bf16.vlgmr.msra.gmra.mxu1 %vm121_vm0, %v315_v3 }
  0x14   :  { %309 = vmatmul.msk.bf16.vlgmr.msra.gmra.mxu2 %vm121_vm0, %v317_v4  ;;  %311 = vmatmul.msk.bf16.vlgmr.msra.gmra.mxu3 %vm121_vm0, %v319_v5 }
  0x23   :  { %306 = vmatmul.msk.bf16.gmra.mxu0 %vm121_vm0, %v314_v6  ;;  %308 = vmatmul.msk.bf16.gmra.mxu1 %vm121_vm0, %v316_v7 }
  0x24   :  { %310 = vmatmul.msk.bf16.gmra.mxu2 %vm121_vm0, %v318_v8  ;;  %312 = vmatmul.msk.bf16.gmra.mxu3 %vm121_vm0, %v320_v9 }
  0x90   :  { %v155_v11 = vpop.f32.mrf.mxu0  ;;  %v165_v12 = vpop.f32.mrf.mxu1 }
  0x91   :  { %v156_v13 = vadd.f32 %v448_v10, %v155_v11  ;;  %v166_v14 = vadd.f32 %v448_v10, %v165_v12 }
  0x93   :  { %vm195_vm1 = vcmp.ge.f32.partialorder %v156_v13, 0.0  ;;  %v211_v15 = vmul.f32 0.25, %v156_v13  ;;  %vm199_vm2 = vcmp.ge.f32.partialorder %v166_v14, 0.0  ;;  %v215_v16 = vmul.f32 0.25, %v166_v14 }
  0x95   :  { %v227_v17 = vsel %vm195_vm1, %v156_v13, %v211_v15  ;;  %v231_v18 = vsel %vm199_vm2, %v166_v14, %v215_v16 }
  0x96   :  { %243 = vst [vmem:[%s517_s3] sm:$0xff] %v227_v17 }
  0x97   :  { %247 = vst [vmem:[%s517_s3 + $0x20] sm:$0xff] %v231_v18  ;;  %v175_v19 = vpop.f32.mrf.mxu2  ;;  %v185_v20 = vpop.f32.mrf.mxu3 }
  0x98   :  { %v176_v21 = vadd.f32 %v448_v10, %v175_v19  ;;  %v186_v22 = vadd.f32 %v448_v10, %v185_v20  ;;  %v157_v23 = vpop.f32.mrf.mxu0  ;;  %v167_v24 = vpop.f32.mrf.mxu1 }
  0x99   :  { %v158_v25 = vadd.f32 %v448_v10, %v157_v23  ;;  %v168_v26 = vadd.f32 %v448_v10, %v167_v24 }
  0x9a   :  { %vm203_vm3 = vcmp.ge.f32.partialorder %v176_v21, 0.0  ;;  %v219_v27 = vmul.f32 0.25, %v176_v21  ;;  %vm207_vm4 = vcmp.ge.f32.partialorder %v186_v22, 0.0  ;;  %v223_v28 = vmul.f32 0.25, %v186_v22 }
  0x9b   :  { %vm196_vm5 = vcmp.ge.f32.partialorder %v158_v25, 0.0  ;;  %v212_v29 = vmul.f32 0.25, %v158_v25  ;;  %vm200_vm6 = vcmp.ge.f32.partialorder %v168_v26, 0.0  ;;  %v216_v30 = vmul.f32 0.25, %v168_v26 }
  0x9c   :  { %v235_v31 = vsel %vm203_vm3, %v176_v21, %v219_v27  ;;  %v239_v32 = vsel %vm207_vm4, %v186_v22, %v223_v28 }
  0x9d   :  { %251 = vst [vmem:[%s517_s3 + $0x40] sm:$0xff] %v235_v31  ;;  %v228_v33 = vsel %vm196_vm5, %v158_v25, %v212_v29  ;;  %v232_v34 = vsel %vm200_vm6, %v168_v26, %v216_v30 }
  0x9e   :  { %255 = vst [vmem:[%s517_s3 + $0x60] sm:$0xff] %v239_v32 }
  0x9f   :  { %244 = vst [vmem:[%s517_s3 + $0x8] sm:$0xff] %v228_v33  ;;  %v177_v35 = vpop.f32.mrf.mxu2  ;;  %v187_v36 = vpop.f32.mrf.mxu3 }
  0xa0   :  { %248 = vst [vmem:[%s517_s3 + $0x28] sm:$0xff] %v232_v34  ;;  %v178_v37 = vadd.f32 %v448_v10, %v177_v35  ;;  %v188_v38 = vadd.f32 %v448_v10, %v187_v36  ;;  %v160_v39 = vpop.f32.mrf.mxu0  ;;  %v170_v40 = vpop.f32.mrf.mxu1 }
  0xa1   :  { %v161_v41 = vadd.f32 %v448_v10, %v160_v39  ;;  %v171_v42 = vadd.f32 %v448_v10, %v170_v40 }
  0xa2   :  { %vm204_vm7 = vcmp.ge.f32.partialorder %v178_v37, 0.0  ;;  %v220_v43 = vmul.f32 0.25, %v178_v37  ;;  %vm208_vm8 = vcmp.ge.f32.partialorder %v188_v38, 0.0  ;;  %v224_v44 = vmul.f32 0.25, %v188_v38 }
  0xa3   :  { %vm197_vm9 = vcmp.ge.f32.partialorder %v161_v41, 0.0  ;;  %v213_v45 = vmul.f32 0.25, %v161_v41  ;;  %vm201_vm10 = vcmp.ge.f32.partialorder %v171_v42, 0.0  ;;  %v217_v46 = vmul.f32 0.25, %v171_v42 }
  0xa4   :  { %v236_v47 = vsel %vm204_vm7, %v178_v37, %v220_v43  ;;  %v240_v48 = vsel %vm208_vm8, %v188_v38, %v224_v44 }
  0xa5   :  { %252 = vst [vmem:[%s517_s3 + $0x48] sm:$0xff] %v236_v47  ;;  %v229_v49 = vsel %vm197_vm9, %v161_v41, %v213_v45  ;;  %v233_v50 = vsel %vm201_vm10, %v171_v42, %v217_v46 }
  0xa6   :  { %256 = vst [vmem:[%s517_s3 + $0x68] sm:$0xff] %v240_v48 }
  0xa7   :  { %245 = vst [vmem:[%s517_s3 + $0x10] sm:$0xff] %v229_v49  ;;  %v180_v51 = vpop.f32.mrf.mxu2  ;;  %v190_v52 = vpop.f32.mrf.mxu3 }
  0xa8   :  { %249 = vst [vmem:[%s517_s3 + $0x30] sm:$0xff] %v233_v50  ;;  %v181_v53 = vadd.f32 %v448_v10, %v180_v51  ;;  %v191_v54 = vadd.f32 %v448_v10, %v190_v52  ;;  %v162_v55 = vpop.f32.mrf.mxu0  ;;  %v172_v56 = vpop.f32.mrf.mxu1 }
  0xa9   :  { %v163_v57 = vadd.f32 %v448_v10, %v162_v55  ;;  %v173_v58 = vadd.f32 %v448_v10, %v172_v56 }
  0xaa   :  { %vm205_vm11 = vcmp.ge.f32.partialorder %v181_v53, 0.0  ;;  %v221_v59 = vmul.f32 0.25, %v181_v53  ;;  %vm209_vm12 = vcmp.ge.f32.partialorder %v191_v54, 0.0  ;;  %v225_v60 = vmul.f32 0.25, %v191_v54 }
  0xab   :  { %vm198_vm13 = vcmp.ge.f32.partialorder %v163_v57, 0.0  ;;  %v214_v61 = vmul.f32 0.25, %v163_v57  ;;  %vm202_vm14 = vcmp.ge.f32.partialorder %v173_v58, 0.0  ;;  %v218_v62 = vmul.f32 0.25, %v173_v58 }
  0xac   :  { %v237_v63 = vsel %vm205_vm11, %v181_v53, %v221_v59  ;;  %v241_v0 = vsel %vm209_vm12, %v191_v54, %v225_v60 }
  0xad   :  { %253 = vst [vmem:[%s517_s3 + $0x50] sm:$0xff] %v237_v63  ;;  %v230_v1 = vsel %vm198_vm13, %v163_v57, %v214_v61  ;;  %v234_v2 = vsel %vm202_vm14, %v173_v58, %v218_v62 }
  0xae   :  { %257 = vst [vmem:[%s517_s3 + $0x70] sm:$0xff] %v241_v0 }
  0xaf   :  { %246 = vst [vmem:[%s517_s3 + $0x18] sm:$0xff] %v230_v1  ;;  %v182_v3 = vpop.f32.mrf.mxu2  ;;  %v192_v4 = vpop.f32.mrf.mxu3 }
  0xb0   :  { %250 = vst [vmem:[%s517_s3 + $0x38] sm:$0xff] %v234_v2  ;;  %v183_v5 = vadd.f32 %v448_v10, %v182_v3  ;;  %v193_v6 = vadd.f32 %v448_v10, %v192_v4 }
  0xb2   :  { %vm206_vm15 = vcmp.ge.f32.partialorder %v183_v5, 0.0  ;;  %v222_v7 = vmul.f32 0.25, %v183_v5  ;;  %vm210_vm0 = vcmp.ge.f32.partialorder %v193_v6, 0.0  ;;  %v226_v8 = vmul.f32 0.25, %v193_v6 }
  0xb4   :  { %v238_v9 = vsel %vm206_vm15, %v183_v5, %v222_v7  ;;  %v242_v11 = vsel %vm210_vm0, %v193_v6, %v226_v8 }
  0xb5   :  { %254 = vst [vmem:[%s517_s3 + $0x58] sm:$0xff] %v238_v9 }
  0xb6   :  { %258 = vst [vmem:[%s517_s3 + $0x78] sm:$0xff] %v242_v11 }
  0xb7   :  { %263 = vsyncpa [#allocation3], 1 }
  0xb8   :  { %264 = vsyncpa [#allocation5], 1 }

// kernel: tile.22
= control target key start
LH: loop header
LB: loop body
LE: loop exit
PB: predicated region body
PF: predicated region fallthrough
CT: control target
= control target key end

     0   :  { %s28_s0 = inlined_call_operand.vmem [shape: f32[16], index: 0, kind: input, shape index: {}]   ;;  %s29_s1 = inlined_call_operand.vmem [shape: f32[16,16], index: 1, kind: output, shape index: {}]  }
   0x1   :  { %v4_v0 = vld [vmem:[%s28_s0] ss:$0 sm:$0xff] }
   0x2   :  { %5 = vst [vmem:[%s29_s1] sm:$0xff] %v4_v0 }
   0x3   :  { %8 = vst [vmem:[%s29_s1 + $0x8] sm:$0xff] %v4_v0 }

// kernel: tile.23
= control target key start
LH: loop header
LB: loop body
LE: loop exit
PB: predicated region body
PF: predicated region fallthrough
CT: control target
= control target key end

     0   :  { %s7_s6 = smov 3  ;;  %s21_s9 = smov 3  ;;  %vm4_vm0 = vcmask 130048   ;;  %vm11_vm1 = vcmask 1048448   ;;  %vm18_vm2 = vcmask 917248   ;;  %vm25_vm3 = vcmask 786048   ;;  %s129_s0 = inlined_call_operand.vmem [shape: f32[16,16], index: 0, kind: input, shape index: {}]   ;;  %s130_s1 = inlined_call_operand.vmem [shape: f32[1,256], index: 1, kind: output, shape index: {}]  }
   0x1   :  { %v67_v0 = vld [vmem:[%s129_s0 + $0x7] ss:$8 sm:%s7_s6]   ;;  %s82_s10 = smov 112   ;;  %v69_v1 = vld [vmem:[%s129_s0 + $0x5] ss:$8 sm:%s21_s9]   ;;  %s83_s13 = smov 80  }
   0x2   :  { %9 = vrot.lane.b32.xlu0 %v67_v0, %s82_s10  ;;  %23 = vrot.lane.b32.xlu1 %v69_v1, %s83_s13  ;;  %s14_s14 = smov 3  ;;  %s28_s15 = smov 3  ;;  %vm32_vm4 = vcmask 654848   ;;  %vm39_vm5 = vcmask 523648   ;;  %vm46_vm6 = vcmask 392448   ;;  %vm53_vm7 = vcmask 261248  }
   0x3   :  { %s35_s16 = smov 3  ;;  %v68_v3 = vld [vmem:[%s129_s0 + $0x6] ss:$8 sm:%s14_s14]   ;;  %s84_s21 = smov 48   ;;  %v70_v4 = vld [vmem:[%s129_s0 + $0x4] ss:$8 sm:%s28_s15]  }
   0x4   :  { %v71_v2 = vld [vmem:[%s129_s0 + $0x3] ss:$8 sm:%s35_s16]   ;;  %s42_s24 = smov 3  ;;  %s85_s25 = smov 96  }
   0x5   :  { %37 = vrot.lane.b32.xlu2 %v71_v2, %s84_s21  ;;  %s86_s26 = smov 64   ;;  %s49_s27 = smov 3  ;;  %v72_v5 = vld [vmem:[%s129_s0 + $0x2] ss:$8 sm:%s42_s24]  }
   0x6   :  { %v73_v6 = vld [vmem:[%s129_s0 + $0x1] ss:$8 sm:%s49_s27]   ;;  %s87_s3 = smov 32   ;;  %s88_s4 = smov 16  }
   0x7   :  { %s2_s5 = smov 3 }
   0x8   :  { %v3_v7 = vld [vmem:[%s129_s0] ss:$8 sm:%s2_s5]  }
   0x9   :  { %5 = vst.msk [vmem:[#allocation0] ss:$8 sm:$0x3] %vm4_vm0, %v3_v7  }
   0xa   :  { %16 = vrot.lane.b32.xlu0 %v68_v3, %s85_s25  ;;  %30 = vrot.lane.b32.xlu1 %v70_v4, %s86_s26 }
   0xd   :  { %44 = vrot.lane.b32.xlu2 %v72_v5, %s87_s3 }
  0x12   :  { %51 = vrot.lane.b32.xlu0 %v73_v6, %s88_s4 }
  0x5f   :  { %v38_v8 = vpop.permute.xlu2 %37  }
  0x67   :  { %v45_v9 = vpop.permute.xlu2 %44  }
  0x74   :  { %v10_v10 = vpop.permute.xlu0 %9   ;;  %v24_v11 = vpop.permute.xlu1 %23  }
  0x75   :  { %12 = vst.msk [vmem:[#allocation0] ss:$8 sm:$0x3] %vm11_vm1, %v10_v10  }
  0x7c   :  { %v17_v12 = vpop.permute.xlu0 %16   ;;  %v31_v13 = vpop.permute.xlu1 %30  }
  0x7d   :  { %19 = vst.msk [vmem:[#allocation0] ss:$8 sm:$0x3] %vm18_vm2, %v17_v12  }
  0x7e   :  { %26 = vst.msk [vmem:[#allocation0] ss:$8 sm:$0x3] %vm25_vm3, %v24_v11  }
  0x7f   :  { %33 = vst.msk [vmem:[#allocation0] ss:$8 sm:$0x3] %vm32_vm4, %v31_v13  }
  0x80   :  { %40 = vst.msk [vmem:[#allocation0] ss:$8 sm:$0x3] %vm39_vm5, %v38_v8  }
  0x81   :  { %47 = vst.msk [vmem:[#allocation0] ss:$8 sm:$0x3] %vm46_vm6, %v45_v9  }
  0x84   :  { %v52_v14 = vpop.permute.xlu0 %51  }
  0x85   :  { %54 = vst.msk [vmem:[#allocation0] ss:$8 sm:$0x3] %vm53_vm7, %v52_v14  }
  0x8c   :  { %v57_v15 = vld [vmem:[#allocation0] sm:$0x1]  ;;  %v62_v16 = vld [vmem:[#allocation0 + $0x8] sm:$0x1] }
  0x8d   :  { %60 = vst [vmem:[%s130_s1] sm:$0x1] %v57_v15 }
  0x8e   :  { %74 = vst [vmem:[%s130_s1 + $0x1] sm:$0x1] %v62_v16 }

// kernel: _lambda_.14
= control target key start
LH: loop header
LB: loop body
LE: loop exit
PB: predicated region body
PF: predicated region fallthrough
CT: control target
= control target key end

     0   :  { %vm146_vm0 = vcmask 523264   ;;  %s919_s1 = inlined_call_operand.vmem [shape: bf16[64,256], index: 1, kind: input, shape index: {}]   ;;  %s920_s0 = inlined_call_operand.vmem [shape: bf16[176,64], index: 0, kind: input, shape index: {}]   ;;  %s921_s2 = inlined_call_operand.vmem [shape: f32[1,256], index: 2, kind: input, shape index: {}]   ;;  %s922_s3 = inlined_call_operand.vmem [shape: f32[176,256], index: 3, kind: output, shape index: {}]  }
   0x1   :  { %v558_v0 = vld [vmem:[%s919_s1 + $0x30] sm:$0xf]  ;;  %v604_v1 = vld [vmem:[%s919_s1 + $0x34] sm:$0xf0]  ;;  %v603_v2 = vld [vmem:[%s919_s1 + $0x34] sm:$0xf] }
   0x2   :  { %v559_v3 = vor.u32 %v604_v1, %v558_v0  ;;  %v560_v4 = vld [vmem:[%s919_s1 + $0x38] sm:$0xf0]  ;;  %v550_v5 = vld [vmem:[%s919_s1 + $0x20] sm:$0xf]  ;;  %v602_v6 = vld [vmem:[%s919_s1 + $0x24] sm:$0xf0] }
   0x3   :  { %v563_v7 = vor.u32 %v603_v2, %v560_v4  ;;  %v601_v8 = vld [vmem:[%s919_s1 + $0x24] sm:$0xf]  ;;  %v552_v9 = vld [vmem:[%s919_s1 + $0x28] sm:$0xf0]  ;;  %v551_v10 = vor.u32 %v602_v6, %v550_v5  ;;  %v542_v12 = vld [vmem:[%s919_s1 + $0x10] sm:$0xf] }
   0x4   :  { %184 = vmatpush.bf16.msra.mxu0 %v559_v3  ;;  %605 = vmatpush.bf16.msra.mxu2 %v559_v3  ;;  %v555_v11 = vor.u32 %v601_v8, %v552_v9  ;;  %v600_v13 = vld [vmem:[%s919_s1 + $0x14] sm:$0xf0]  ;;  %v599_v14 = vld [vmem:[%s919_s1 + $0x14] sm:$0xf]  ;;  %v544_v15 = vld [vmem:[%s919_s1 + $0x18] sm:$0xf0] }
   0x5   :  { %248 = vmatpush.bf16.msra.mxu1 %v563_v7  ;;  %609 = vmatpush.bf16.msra.mxu3 %v563_v7  ;;  %v543_v16 = vor.u32 %v600_v13, %v542_v12  ;;  %v547_v17 = vor.u32 %v599_v14, %v544_v15  ;;  %v534_v18 = vld [vmem:[%s919_s1] sm:$0xf]  ;;  %v598_v19 = vld [vmem:[%s919_s1 + $0x4] sm:$0xf0]  ;;  %v597_v20 = vld [vmem:[%s919_s1 + $0x4] sm:$0xf] }
   0x6   :  { %v536_v21 = vld [vmem:[%s919_s1 + $0x8] sm:$0xf0]  ;;  %v535_v22 = vor.u32 %v598_v19, %v534_v18  ;;  %v586_v24 = vld [vmem:[%s920_s0] sm:$0xff]  ;;  %v592_v25 = vld [vmem:[%s920_s0 + $0x30] sm:$0xff] }
   0x7   :  { %v539_v23 = vor.u32 %v597_v20, %v536_v21  ;;  %v587_v26 = vld [vmem:[%s920_s0 + $0x8] sm:$0xff]  ;;  %v593_v27 = vld [vmem:[%s920_s0 + $0x38] sm:$0xff]  ;;  %v588_v28 = vld [vmem:[%s920_s0 + $0x10] sm:$0xff] }
   0x8   :  { %185 = vmatpush.bf16.msra.mxu0 %v551_v10  ;;  %606 = vmatpush.bf16.msra.mxu2 %v551_v10  ;;  %v594_v29 = vld [vmem:[%s920_s0 + $0x40] sm:$0xff]  ;;  %v589_v30 = vld [vmem:[%s920_s0 + $0x18] sm:$0xff]  ;;  %v595_v31 = vld [vmem:[%s920_s0 + $0x48] sm:$0xff] }
   0x9   :  { %249 = vmatpush.bf16.msra.mxu1 %v555_v11  ;;  %610 = vmatpush.bf16.msra.mxu3 %v555_v11  ;;  %v590_v32 = vld [vmem:[%s920_s0 + $0x20] sm:$0xff]  ;;  %v596_v33 = vld [vmem:[%s920_s0 + $0x50] sm:$0xff]  ;;  %v591_v34 = vld [vmem:[%s920_s0 + $0x28] sm:$0xff] }
   0xa   :  { %v45_v35 = vld [vmem:[%s921_s2] sm:$0x3] }
   0xb   :  { %v739_v36 = vperm.slane %v45_v35, 0  ;;  %v741_v37 = vperm.slane %v45_v35, 1 }
   0xc   :  { %186 = vmatpush.bf16.msra.mxu0 %v543_v16  ;;  %607 = vmatpush.bf16.msra.mxu2 %v543_v16 }
   0xd   :  { %250 = vmatpush.bf16.msra.mxu1 %v547_v17  ;;  %611 = vmatpush.bf16.msra.mxu3 %v547_v17 }
  0x10   :  { %187 = vmatpush.bf16.msra.mxu0 %v535_v22  ;;  %608 = vmatpush.bf16.msra.mxu2 %v535_v22 }
  0x11   :  { %251 = vmatpush.bf16.msra.mxu1 %v539_v23  ;;  %612 = vmatpush.bf16.msra.mxu3 %v539_v23 }
  0x13   :  { %564 = vmatmul.msk.bf16.vlgmr.msra.gmra.mxu0 %vm146_vm0, %v586_v24  ;;  %570 = vmatmul.msk.bf16.vlgmr.msra.gmra.mxu2 %vm146_vm0, %v592_v25 }
  0x14   :  { %575 = vmatmul.msk.bf16.vlgmr.msra.gmra.mxu1 %vm146_vm0, %v586_v24  ;;  %581 = vmatmul.msk.bf16.vlgmr.msra.gmra.mxu3 %vm146_vm0, %v592_v25 }
  0x23   :  { %565 = vmatmul.msk.bf16.gmra.mxu0 %vm146_vm0, %v587_v26  ;;  %571 = vmatmul.msk.bf16.gmra.mxu2 %vm146_vm0, %v593_v27 }
  0x24   :  { %576 = vmatmul.msk.bf16.gmra.mxu1 %vm146_vm0, %v587_v26  ;;  %582 = vmatmul.msk.bf16.gmra.mxu3 %vm146_vm0, %v593_v27 }
  0x33   :  { %566 = vmatmul.msk.bf16.gmra.mxu0 %vm146_vm0, %v588_v28  ;;  %572 = vmatmul.msk.bf16.gmra.mxu2 %vm146_vm0, %v594_v29 }
  0x34   :  { %577 = vmatmul.msk.bf16.gmra.mxu1 %vm146_vm0, %v588_v28  ;;  %583 = vmatmul.msk.bf16.gmra.mxu3 %vm146_vm0, %v594_v29 }
  0x43   :  { %567 = vmatmul.msk.bf16.gmra.mxu0 %vm146_vm0, %v589_v30  ;;  %573 = vmatmul.msk.bf16.gmra.mxu2 %vm146_vm0, %v595_v31 }
  0x44   :  { %578 = vmatmul.msk.bf16.gmra.mxu1 %vm146_vm0, %v589_v30  ;;  %584 = vmatmul.msk.bf16.gmra.mxu3 %vm146_vm0, %v595_v31 }
  0x53   :  { %568 = vmatmul.msk.bf16.gmra.mxu0 %vm146_vm0, %v590_v32  ;;  %574 = vmatmul.msk.bf16.gmra.mxu2 %vm146_vm0, %v596_v33 }
  0x54   :  { %579 = vmatmul.msk.bf16.gmra.mxu1 %vm146_vm0, %v590_v32  ;;  %585 = vmatmul.msk.bf16.gmra.mxu3 %vm146_vm0, %v596_v33 }
  0x63   :  { %569 = vmatmul.msk.bf16.gmra.mxu0 %vm146_vm0, %v591_v34 }
  0x64   :  { %580 = vmatmul.msk.bf16.gmra.mxu1 %vm146_vm0, %v591_v34 }
  0x90   :  { %v189_v38 = vpop.f32.mrf.mxu0 }
  0x91   :  { %v190_v39 = vadd.f32 %v189_v38, %v739_v36  ;;  %v253_v40 = vpop.f32.mrf.mxu1 }
  0x92   :  { %v254_v41 = vadd.f32 %v253_v40, %v741_v37 }
  0x93   :  { %vm308_vm1 = vcmp.ge.f32.partialorder %v190_v39, 0.0  ;;  %v352_v42 = vmul.f32 0.25, %v190_v39 }
  0x94   :  { %vm309_vm2 = vcmp.ge.f32.partialorder %v254_v41, 0.0  ;;  %v353_v43 = vmul.f32 0.25, %v254_v41 }
  0x95   :  { %v396_v44 = vsel %vm308_vm1, %v190_v39, %v352_v42 }
  0x96   :  { %440 = vst [vmem:[%s922_s3] sm:$0xff] %v396_v44  ;;  %v397_v45 = vsel %vm309_vm2, %v254_v41, %v353_v43  ;;  %v219_v46 = vpop.f32.mrf.mxu2 }
  0x97   :  { %441 = vst [vmem:[%s922_s3 + $0x8] sm:$0xff] %v397_v45  ;;  %v220_v47 = vadd.f32 %v219_v46, %v739_v36  ;;  %v283_v48 = vpop.f32.mrf.mxu3 }
  0x98   :  { %v284_v49 = vadd.f32 %v283_v48, %v741_v37  ;;  %v191_v50 = vpop.f32.mrf.mxu0 }
  0x99   :  { %vm332_vm3 = vcmp.ge.f32.partialorder %v220_v47, 0.0  ;;  %v376_v51 = vmul.f32 0.25, %v220_v47  ;;  %v192_v52 = vadd.f32 %v191_v50, %v739_v36  ;;  %v255_v53 = vpop.f32.mrf.mxu1 }
  0x9a   :  { %vm333_vm4 = vcmp.ge.f32.partialorder %v284_v49, 0.0  ;;  %v377_v54 = vmul.f32 0.25, %v284_v49  ;;  %v256_v55 = vadd.f32 %v255_v53, %v741_v37 }
  0x9b   :  { %v420_v56 = vsel %vm332_vm3, %v220_v47, %v376_v51  ;;  %vm310_vm5 = vcmp.ge.f32.partialorder %v192_v52, 0.0  ;;  %v354_v57 = vmul.f32 0.25, %v192_v52 }
  0x9c   :  { %464 = vst [vmem:[%s922_s3 + $0xc0] sm:$0xff] %v420_v56  ;;  %v421_v58 = vsel %vm333_vm4, %v284_v49, %v377_v54  ;;  %vm311_vm6 = vcmp.ge.f32.partialorder %v256_v55, 0.0  ;;  %v355_v59 = vmul.f32 0.25, %v256_v55 }
  0x9d   :  { %465 = vst [vmem:[%s922_s3 + $0xc8] sm:$0xff] %v421_v58  ;;  %v398_v60 = vsel %vm310_vm5, %v192_v52, %v354_v57 }
  0x9e   :  { %442 = vst [vmem:[%s922_s3 + $0x10] sm:$0xff] %v398_v60  ;;  %v399_v61 = vsel %vm311_vm6, %v256_v55, %v355_v59  ;;  %v221_v62 = vpop.f32.mrf.mxu2 }
  0x9f   :  { %443 = vst [vmem:[%s922_s3 + $0x18] sm:$0xff] %v399_v61  ;;  %v222_v63 = vadd.f32 %v221_v62, %v739_v36  ;;  %v285_v0 = vpop.f32.mrf.mxu3 }
  0xa0   :  { %v286_v1 = vadd.f32 %v285_v0, %v741_v37  ;;  %v194_v2 = vpop.f32.mrf.mxu0 }
  0xa1   :  { %vm334_vm7 = vcmp.ge.f32.partialorder %v222_v63, 0.0  ;;  %v378_v3 = vmul.f32 0.25, %v222_v63  ;;  %v195_v4 = vadd.f32 %v194_v2, %v739_v36  ;;  %v258_v5 = vpop.f32.mrf.mxu1 }
  0xa2   :  { %vm335_vm8 = vcmp.ge.f32.partialorder %v286_v1, 0.0  ;;  %v379_v6 = vmul.f32 0.25, %v286_v1  ;;  %v259_v7 = vadd.f32 %v258_v5, %v741_v37 }
  0xa3   :  { %v422_v8 = vsel %vm334_vm7, %v222_v63, %v378_v3  ;;  %vm312_vm9 = vcmp.ge.f32.partialorder %v195_v4, 0.0  ;;  %v356_v9 = vmul.f32 0.25, %v195_v4 }
  0xa4   :  { %466 = vst [vmem:[%s922_s3 + $0xd0] sm:$0xff] %v422_v8  ;;  %v423_v10 = vsel %vm335_vm8, %v286_v1, %v379_v6  ;;  %vm313_vm10 = vcmp.ge.f32.partialorder %v259_v7, 0.0  ;;  %v357_v11 = vmul.f32 0.25, %v259_v7 }
  0xa5   :  { %467 = vst [vmem:[%s922_s3 + $0xd8] sm:$0xff] %v423_v10  ;;  %v400_v12 = vsel %vm312_vm9, %v195_v4, %v356_v9 }
  0xa6   :  { %444 = vst [vmem:[%s922_s3 + $0x20] sm:$0xff] %v400_v12  ;;  %v401_v13 = vsel %vm313_vm10, %v259_v7, %v357_v11  ;;  %v224_v14 = vpop.f32.mrf.mxu2 }
  0xa7   :  { %445 = vst [vmem:[%s922_s3 + $0x28] sm:$0xff] %v401_v13  ;;  %v225_v15 = vadd.f32 %v224_v14, %v739_v36  ;;  %v288_v16 = vpop.f32.mrf.mxu3 }
  0xa8   :  { %v289_v17 = vadd.f32 %v288_v16, %v741_v37  ;;  %v196_v18 = vpop.f32.mrf.mxu0 }
  0xa9   :  { %vm336_vm11 = vcmp.ge.f32.partialorder %v225_v15, 0.0  ;;  %v380_v19 = vmul.f32 0.25, %v225_v15  ;;  %v197_v20 = vadd.f32 %v196_v18, %v739_v36  ;;  %v260_v21 = vpop.f32.mrf.mxu1 }
  0xaa   :  { %vm337_vm12 = vcmp.ge.f32.partialorder %v289_v17, 0.0  ;;  %v381_v22 = vmul.f32 0.25, %v289_v17  ;;  %v261_v23 = vadd.f32 %v260_v21, %v741_v37 }
  0xab   :  { %v424_v24 = vsel %vm336_vm11, %v225_v15, %v380_v19  ;;  %vm314_vm13 = vcmp.ge.f32.partialorder %v197_v20, 0.0  ;;  %v358_v25 = vmul.f32 0.25, %v197_v20 }
  0xac   :  { %468 = vst [vmem:[%s922_s3 + $0xe0] sm:$0xff] %v424_v24  ;;  %v425_v26 = vsel %vm337_vm12, %v289_v17, %v381_v22  ;;  %vm315_vm14 = vcmp.ge.f32.partialorder %v261_v23, 0.0  ;;  %v359_v27 = vmul.f32 0.25, %v261_v23 }
  0xad   :  { %469 = vst [vmem:[%s922_s3 + $0xe8] sm:$0xff] %v425_v26  ;;  %v402_v28 = vsel %vm314_vm13, %v197_v20, %v358_v25 }
  0xae   :  { %446 = vst [vmem:[%s922_s3 + $0x30] sm:$0xff] %v402_v28  ;;  %v403_v29 = vsel %vm315_vm14, %v261_v23, %v359_v27  ;;  %v226_v30 = vpop.f32.mrf.mxu2 }
  0xaf   :  { %447 = vst [vmem:[%s922_s3 + $0x38] sm:$0xff] %v403_v29  ;;  %v227_v31 = vadd.f32 %v226_v30, %v739_v36  ;;  %v290_v32 = vpop.f32.mrf.mxu3 }
  0xb0   :  { %v291_v33 = vadd.f32 %v290_v32, %v741_v37  ;;  %v199_v34 = vpop.f32.mrf.mxu0 }
  0xb1   :  { %vm338_vm15 = vcmp.ge.f32.partialorder %v227_v31, 0.0  ;;  %v382_v35 = vmul.f32 0.25, %v227_v31  ;;  %v200_v38 = vadd.f32 %v199_v34, %v739_v36  ;;  %v263_v39 = vpop.f32.mrf.mxu1 }
  0xb2   :  { %vm339_vm0 = vcmp.ge.f32.partialorder %v291_v33, 0.0  ;;  %v383_v40 = vmul.f32 0.25, %v291_v33  ;;  %v264_v41 = vadd.f32 %v263_v39, %v741_v37 }
  0xb3   :  { %v426_v42 = vsel %vm338_vm15, %v227_v31, %v382_v35  ;;  %vm316_vm1 = vcmp.ge.f32.partialorder %v200_v38, 0.0  ;;  %v360_v43 = vmul.f32 0.25, %v200_v38 }
  0xb4   :  { %470 = vst [vmem:[%s922_s3 + $0xf0] sm:$0xff] %v426_v42  ;;  %v427_v44 = vsel %vm339_vm0, %v291_v33, %v383_v40  ;;  %vm317_vm2 = vcmp.ge.f32.partialorder %v264_v41, 0.0  ;;  %v361_v45 = vmul.f32 0.25, %v264_v41 }
  0xb5   :  { %471 = vst [vmem:[%s922_s3 + $0xf8] sm:$0xff] %v427_v44  ;;  %v404_v46 = vsel %vm316_vm1, %v200_v38, %v360_v43 }
  0xb6   :  { %448 = vst [vmem:[%s922_s3 + $0x40] sm:$0xff] %v404_v46  ;;  %v405_v47 = vsel %vm317_vm2, %v264_v41, %v361_v45  ;;  %v229_v48 = vpop.f32.mrf.mxu2 }
  0xb7   :  { %449 = vst [vmem:[%s922_s3 + $0x48] sm:$0xff] %v405_v47  ;;  %v230_v49 = vadd.f32 %v229_v48, %v739_v36  ;;  %v293_v50 = vpop.f32.mrf.mxu3 }
  0xb8   :  { %v294_v51 = vadd.f32 %v293_v50, %v741_v37  ;;  %v201_v52 = vpop.f32.mrf.mxu0 }
  0xb9   :  { %vm340_vm3 = vcmp.ge.f32.partialorder %v230_v49, 0.0  ;;  %v384_v53 = vmul.f32 0.25, %v230_v49  ;;  %v202_v54 = vadd.f32 %v201_v52, %v739_v36  ;;  %v265_v55 = vpop.f32.mrf.mxu1 }
  0xba   :  { %vm341_vm4 = vcmp.ge.f32.partialorder %v294_v51, 0.0  ;;  %v385_v56 = vmul.f32 0.25, %v294_v51  ;;  %v266_v57 = vadd.f32 %v265_v55, %v741_v37 }
  0xbb   :  { %v428_v58 = vsel %vm340_vm3, %v230_v49, %v384_v53  ;;  %vm318_vm5 = vcmp.ge.f32.partialorder %v202_v54, 0.0  ;;  %v362_v59 = vmul.f32 0.25, %v202_v54 }
  0xbc   :  { %472 = vst [vmem:[%s922_s3 + $0x100] sm:$0xff] %v428_v58  ;;  %v429_v60 = vsel %vm341_vm4, %v294_v51, %v385_v56  ;;  %vm319_vm6 = vcmp.ge.f32.partialorder %v266_v57, 0.0  ;;  %v363_v61 = vmul.f32 0.25, %v266_v57 }
  0xbd   :  { %473 = vst [vmem:[%s922_s3 + $0x108] sm:$0xff] %v429_v60  ;;  %v406_v62 = vsel %vm318_vm5, %v202_v54, %v362_v59 }
  0xbe   :  { %450 = vst [vmem:[%s922_s3 + $0x50] sm:$0xff] %v406_v62  ;;  %v407_v63 = vsel %vm319_vm6, %v266_v57, %v363_v61  ;;  %v231_v0 = vpop.f32.mrf.mxu2 }
  0xbf   :  { %451 = vst [vmem:[%s922_s3 + $0x58] sm:$0xff] %v407_v63  ;;  %v232_v1 = vadd.f32 %v231_v0, %v739_v36  ;;  %v295_v2 = vpop.f32.mrf.mxu3 }
  0xc0   :  { %v296_v3 = vadd.f32 %v295_v2, %v741_v37  ;;  %v204_v4 = vpop.f32.mrf.mxu0 }
  0xc1   :  { %vm342_vm7 = vcmp.ge.f32.partialorder %v232_v1, 0.0  ;;  %v386_v5 = vmul.f32 0.25, %v232_v1  ;;  %v205_v6 = vadd.f32 %v204_v4, %v739_v36  ;;  %v268_v7 = vpop.f32.mrf.mxu1 }
  0xc2   :  { %vm343_vm8 = vcmp.ge.f32.partialorder %v296_v3, 0.0  ;;  %v387_v8 = vmul.f32 0.25, %v296_v3  ;;  %v269_v9 = vadd.f32 %v268_v7, %v741_v37 }
  0xc3   :  { %v430_v10 = vsel %vm342_vm7, %v232_v1, %v386_v5  ;;  %vm320_vm9 = vcmp.ge.f32.partialorder %v205_v6, 0.0  ;;  %v364_v11 = vmul.f32 0.25, %v205_v6 }
  0xc4   :  { %474 = vst [vmem:[%s922_s3 + $0x110] sm:$0xff] %v430_v10  ;;  %v431_v12 = vsel %vm343_vm8, %v296_v3, %v387_v8  ;;  %vm321_vm10 = vcmp.ge.f32.partialorder %v269_v9, 0.0  ;;  %v365_v13 = vmul.f32 0.25, %v269_v9 }
  0xc5   :  { %475 = vst [vmem:[%s922_s3 + $0x118] sm:$0xff] %v431_v12  ;;  %v408_v14 = vsel %vm320_vm9, %v205_v6, %v364_v11 }
  0xc6   :  { %452 = vst [vmem:[%s922_s3 + $0x60] sm:$0xff] %v408_v14  ;;  %v409_v15 = vsel %vm321_vm10, %v269_v9, %v365_v13  ;;  %v234_v16 = vpop.f32.mrf.mxu2 }
  0xc7   :  { %453 = vst [vmem:[%s922_s3 + $0x68] sm:$0xff] %v409_v15  ;;  %v235_v17 = vadd.f32 %v234_v16, %v739_v36  ;;  %v298_v18 = vpop.f32.mrf.mxu3 }
  0xc8   :  { %v299_v19 = vadd.f32 %v298_v18, %v741_v37  ;;  %v206_v20 = vpop.f32.mrf.mxu0 }
  0xc9   :  { %vm344_vm11 = vcmp.ge.f32.partialorder %v235_v17, 0.0  ;;  %v388_v21 = vmul.f32 0.25, %v235_v17  ;;  %v207_v22 = vadd.f32 %v206_v20, %v739_v36  ;;  %v270_v23 = vpop.f32.mrf.mxu1 }
  0xca   :  { %vm345_vm12 = vcmp.ge.f32.partialorder %v299_v19, 0.0  ;;  %v389_v24 = vmul.f32 0.25, %v299_v19  ;;  %v271_v25 = vadd.f32 %v270_v23, %v741_v37 }
  0xcb   :  { %v432_v26 = vsel %vm344_vm11, %v235_v17, %v388_v21  ;;  %vm322_vm13 = vcmp.ge.f32.partialorder %v207_v22, 0.0  ;;  %v366_v27 = vmul.f32 0.25, %v207_v22 }
  0xcc   :  { %476 = vst [vmem:[%s922_s3 + $0x120] sm:$0xff] %v432_v26  ;;  %v433_v28 = vsel %vm345_vm12, %v299_v19, %v389_v24  ;;  %vm323_vm14 = vcmp.ge.f32.partialorder %v271_v25, 0.0  ;;  %v367_v29 = vmul.f32 0.25, %v271_v25 }
  0xcd   :  { %477 = vst [vmem:[%s922_s3 + $0x128] sm:$0xff] %v433_v28  ;;  %v410_v30 = vsel %vm322_vm13, %v207_v22, %v366_v27 }
  0xce   :  { %454 = vst [vmem:[%s922_s3 + $0x70] sm:$0xff] %v410_v30  ;;  %v411_v31 = vsel %vm323_vm14, %v271_v25, %v367_v29  ;;  %v236_v32 = vpop.f32.mrf.mxu2 }
  0xcf   :  { %455 = vst [vmem:[%s922_s3 + $0x78] sm:$0xff] %v411_v31  ;;  %v237_v33 = vadd.f32 %v236_v32, %v739_v36  ;;  %v300_v34 = vpop.f32.mrf.mxu3 }
  0xd0   :  { %v301_v35 = vadd.f32 %v300_v34, %v741_v37  ;;  %v209_v38 = vpop.f32.mrf.mxu0 }
  0xd1   :  { %vm346_vm15 = vcmp.ge.f32.partialorder %v237_v33, 0.0  ;;  %v390_v39 = vmul.f32 0.25, %v237_v33  ;;  %v210_v40 = vadd.f32 %v209_v38, %v739_v36  ;;  %v273_v41 = vpop.f32.mrf.mxu1 }
  0xd2   :  { %vm347_vm0 = vcmp.ge.f32.partialorder %v301_v35, 0.0  ;;  %v391_v42 = vmul.f32 0.25, %v301_v35  ;;  %v274_v43 = vadd.f32 %v273_v41, %v741_v37 }
  0xd3   :  { %v434_v44 = vsel %vm346_vm15, %v237_v33, %v390_v39  ;;  %vm324_vm1 = vcmp.ge.f32.partialorder %v210_v40, 0.0  ;;  %v368_v45 = vmul.f32 0.25, %v210_v40 }
  0xd4   :  { %478 = vst [vmem:[%s922_s3 + $0x130] sm:$0xff] %v434_v44  ;;  %v435_v46 = vsel %vm347_vm0, %v301_v35, %v391_v42  ;;  %vm325_vm2 = vcmp.ge.f32.partialorder %v274_v43, 0.0  ;;  %v369_v47 = vmul.f32 0.25, %v274_v43 }
  0xd5   :  { %479 = vst [vmem:[%s922_s3 + $0x138] sm:$0xff] %v435_v46  ;;  %v412_v48 = vsel %vm324_vm1, %v210_v40, %v368_v45 }
  0xd6   :  { %456 = vst [vmem:[%s922_s3 + $0x80] sm:$0xff] %v412_v48  ;;  %v413_v49 = vsel %vm325_vm2, %v274_v43, %v369_v47  ;;  %v239_v50 = vpop.f32.mrf.mxu2 }
  0xd7   :  { %457 = vst [vmem:[%s922_s3 + $0x88] sm:$0xff] %v413_v49  ;;  %v240_v51 = vadd.f32 %v239_v50, %v739_v36  ;;  %v303_v52 = vpop.f32.mrf.mxu3 }
  0xd8   :  { %v304_v53 = vadd.f32 %v303_v52, %v741_v37  ;;  %v211_v54 = vpop.f32.mrf.mxu0 }
  0xd9   :  { %vm348_vm3 = vcmp.ge.f32.partialorder %v240_v51, 0.0  ;;  %v392_v55 = vmul.f32 0.25, %v240_v51  ;;  %v212_v56 = vadd.f32 %v211_v54, %v739_v36  ;;  %v275_v57 = vpop.f32.mrf.mxu1 }
  0xda   :  { %vm349_vm4 = vcmp.ge.f32.partialorder %v304_v53, 0.0  ;;  %v393_v58 = vmul.f32 0.25, %v304_v53  ;;  %v276_v59 = vadd.f32 %v275_v57, %v741_v37 }
  0xdb   :  { %v436_v60 = vsel %vm348_vm3, %v240_v51, %v392_v55  ;;  %vm326_vm5 = vcmp.ge.f32.partialorder %v212_v56, 0.0  ;;  %v370_v61 = vmul.f32 0.25, %v212_v56 }
  0xdc   :  { %480 = vst [vmem:[%s922_s3 + $0x140] sm:$0xff] %v436_v60  ;;  %v437_v62 = vsel %vm349_vm4, %v304_v53, %v393_v58  ;;  %vm327_vm6 = vcmp.ge.f32.partialorder %v276_v59, 0.0  ;;  %v371_v63 = vmul.f32 0.25, %v276_v59 }
  0xdd   :  { %481 = vst [vmem:[%s922_s3 + $0x148] sm:$0xff] %v437_v62  ;;  %v414_v0 = vsel %vm326_vm5, %v212_v56, %v370_v61 }
  0xde   :  { %458 = vst [vmem:[%s922_s3 + $0x90] sm:$0xff] %v414_v0  ;;  %v415_v1 = vsel %vm327_vm6, %v276_v59, %v371_v63  ;;  %v241_v2 = vpop.f32.mrf.mxu2 }
  0xdf   :  { %459 = vst [vmem:[%s922_s3 + $0x98] sm:$0xff] %v415_v1  ;;  %v242_v3 = vadd.f32 %v241_v2, %v739_v36  ;;  %v305_v4 = vpop.f32.mrf.mxu3 }
  0xe0   :  { %v306_v5 = vadd.f32 %v305_v4, %v741_v37  ;;  %v214_v6 = vpop.f32.mrf.mxu0 }
  0xe1   :  { %vm350_vm7 = vcmp.ge.f32.partialorder %v242_v3, 0.0  ;;  %v394_v7 = vmul.f32 0.25, %v242_v3  ;;  %v215_v8 = vadd.f32 %v214_v6, %v739_v36  ;;  %v278_v9 = vpop.f32.mrf.mxu1 }
  0xe2   :  { %vm351_vm8 = vcmp.ge.f32.partialorder %v306_v5, 0.0  ;;  %v395_v10 = vmul.f32 0.25, %v306_v5  ;;  %v279_v11 = vadd.f32 %v278_v9, %v741_v37 }
  0xe3   :  { %v438_v12 = vsel %vm350_vm7, %v242_v3, %v394_v7  ;;  %vm328_vm9 = vcmp.ge.f32.partialorder %v215_v8, 0.0  ;;  %v372_v13 = vmul.f32 0.25, %v215_v8 }
  0xe4   :  { %482 = vst [vmem:[%s922_s3 + $0x150] sm:$0xff] %v438_v12  ;;  %v439_v14 = vsel %vm351_vm8, %v306_v5, %v395_v10  ;;  %vm329_vm10 = vcmp.ge.f32.partialorder %v279_v11, 0.0  ;;  %v373_v15 = vmul.f32 0.25, %v279_v11 }
  0xe5   :  { %483 = vst [vmem:[%s922_s3 + $0x158] sm:$0xff] %v439_v14  ;;  %v416_v16 = vsel %vm328_vm9, %v215_v8, %v372_v13 }
  0xe6   :  { %460 = vst [vmem:[%s922_s3 + $0xa0] sm:$0xff] %v416_v16  ;;  %v417_v17 = vsel %vm329_vm10, %v279_v11, %v373_v15 }
  0xe7   :  { %461 = vst [vmem:[%s922_s3 + $0xa8] sm:$0xff] %v417_v17 }
  0xe8   :  { %v216_v18 = vpop.f32.mrf.mxu0 }
  0xe9   :  { %v217_v19 = vadd.f32 %v216_v18, %v739_v36  ;;  %v280_v20 = vpop.f32.mrf.mxu1 }
  0xea   :  { %v281_v21 = vadd.f32 %v280_v20, %v741_v37 }
  0xeb   :  { %vm330_vm11 = vcmp.ge.f32.partialorder %v217_v19, 0.0  ;;  %v374_v22 = vmul.f32 0.25, %v217_v19 }
  0xec   :  { %vm331_vm12 = vcmp.ge.f32.partialorder %v281_v21, 0.0  ;;  %v375_v23 = vmul.f32 0.25, %v281_v21 }
  0xed   :  { %v418_v24 = vsel %vm330_vm11, %v217_v19, %v374_v22 }
  0xee   :  { %462 = vst [vmem:[%s922_s3 + $0xb0] sm:$0xff] %v418_v24  ;;  %v419_v25 = vsel %vm331_vm12, %v281_v21, %v375_v23 }
  0xef   :  { %463 = vst [vmem:[%s922_s3 + $0xb8] sm:$0xff] %v419_v25 }

// kernel: _lambda_.15
= control target key start
LH: loop header
LB: loop body
LE: loop exit
PB: predicated region body
PF: predicated region fallthrough
CT: control target
= control target key end

     0   :  { %s2832_s1 = inlined_call_operand.vmem [shape: bf16[1024,128], index: 1, kind: input, shape index: {}]   ;;  %s2833_s2 = inlined_call_operand.vmem [shape: f32[1,128], index: 2, kind: input, shape index: {}]   ;;  %s2834_s0 = inlined_call_operand.vmem [shape: bf16[128,1024], index: 0, kind: input, shape index: {}]   ;;  %s2835_s3 = inlined_call_operand.vmem [shape: f32[128,128], index: 3, kind: input, shape index: {}]   ;;  %s2836_s4 = inlined_call_operand.vmem [shape: f32[128,128], index: 4, kind: output, shape index: {}]  }
   0x1   :  { %v2008_v0 = vld [vmem:[%s2832_s1 + $0x38] sm:$0xff]  ;;  %v2007_v4 = vld [vmem:[%s2832_s1 + $0x30] sm:$0xff]  ;;  %v2006_v8 = vld [vmem:[%s2832_s1 + $0x28] sm:$0xff] }
   0x2   :  { %v2016_v1 = vld [vmem:[%s2832_s1 + $0x78] sm:$0xff]  ;;  %917 = vmatpush.bf16.msra.mxu0 %v2008_v0  ;;  %v2015_v5 = vld [vmem:[%s2832_s1 + $0x70] sm:$0xff]  ;;  %v2014_v9 = vld [vmem:[%s2832_s1 + $0x68] sm:$0xff] }
   0x3   :  { %v2024_v2 = vld [vmem:[%s2832_s1 + $0xb8] sm:$0xff]  ;;  %966 = vmatpush.bf16.msra.mxu1 %v2016_v1  ;;  %v2023_v6 = vld [vmem:[%s2832_s1 + $0xb0] sm:$0xff]  ;;  %v2022_v10 = vld [vmem:[%s2832_s1 + $0xa8] sm:$0xff] }
   0x4   :  { %v2032_v3 = vld [vmem:[%s2832_s1 + $0xf8] sm:$0xff]  ;;  %1015 = vmatpush.bf16.msra.mxu2 %v2024_v2  ;;  %v2031_v7 = vld [vmem:[%s2832_s1 + $0xf0] sm:$0xff]  ;;  %v2030_v11 = vld [vmem:[%s2832_s1 + $0xe8] sm:$0xff] }
   0x5   :  { %1064 = vmatpush.bf16.msra.mxu3 %v2032_v3  ;;  %v2005_v12 = vld [vmem:[%s2832_s1 + $0x20] sm:$0xff]  ;;  %v2004_v16 = vld [vmem:[%s2832_s1 + $0x18] sm:$0xff]  ;;  %v2003_v20 = vld [vmem:[%s2832_s1 + $0x10] sm:$0xff] }
   0x6   :  { %918 = vmatpush.bf16.msra.mxu0 %v2007_v4  ;;  %v2013_v13 = vld [vmem:[%s2832_s1 + $0x60] sm:$0xff]  ;;  %v2012_v17 = vld [vmem:[%s2832_s1 + $0x58] sm:$0xff]  ;;  %v2011_v21 = vld [vmem:[%s2832_s1 + $0x50] sm:$0xff] }
   0x7   :  { %967 = vmatpush.bf16.msra.mxu1 %v2015_v5  ;;  %v2021_v14 = vld [vmem:[%s2832_s1 + $0xa0] sm:$0xff]  ;;  %v2020_v18 = vld [vmem:[%s2832_s1 + $0x98] sm:$0xff]  ;;  %v2019_v22 = vld [vmem:[%s2832_s1 + $0x90] sm:$0xff] }
   0x8   :  { %1016 = vmatpush.bf16.msra.mxu2 %v2023_v6  ;;  %v2029_v15 = vld [vmem:[%s2832_s1 + $0xe0] sm:$0xff]  ;;  %v2028_v19 = vld [vmem:[%s2832_s1 + $0xd8] sm:$0xff]  ;;  %v2027_v23 = vld [vmem:[%s2832_s1 + $0xd0] sm:$0xff] }
   0x9   :  { %1065 = vmatpush.bf16.msra.mxu3 %v2031_v7  ;;  %v2002_v24 = vld [vmem:[%s2832_s1 + $0x8] sm:$0xff]  ;;  %v2001_v28 = vld [vmem:[%s2832_s1] sm:$0xff]  ;;  %v2056_v40 = vld [vmem:[%s2832_s1 + $0x1b8] sm:$0xff] }
   0xa   :  { %919 = vmatpush.bf16.msra.mxu0 %v2006_v8  ;;  %v2010_v25 = vld [vmem:[%s2832_s1 + $0x48] sm:$0xff]  ;;  %v2009_v29 = vld [vmem:[%s2832_s1 + $0x40] sm:$0xff]  ;;  %v2040_v41 = vld [vmem:[%s2832_s1 + $0x138] sm:$0xff] }
   0xb   :  { %968 = vmatpush.bf16.msra.mxu1 %v2014_v9  ;;  %v2018_v26 = vld [vmem:[%s2832_s1 + $0x88] sm:$0xff]  ;;  %v2017_v30 = vld [vmem:[%s2832_s1 + $0x80] sm:$0xff]  ;;  %v2064_v46 = vld [vmem:[%s2832_s1 + $0x1f8] sm:$0xff] }
   0xc   :  { %1017 = vmatpush.bf16.msra.mxu2 %v2022_v10  ;;  %v2026_v27 = vld [vmem:[%s2832_s1 + $0xc8] sm:$0xff]  ;;  %v2025_v31 = vld [vmem:[%s2832_s1 + $0xc0] sm:$0xff]  ;;  %v2048_v47 = vld [vmem:[%s2832_s1 + $0x178] sm:$0xff] }
   0xd   :  { %1066 = vmatpush.bf16.msra.mxu3 %v2030_v11  ;;  %v1427_v32 = vld [vmem:[%s2834_s0] sm:$0xf]  ;;  %v1937_v34 = vld [vmem:[%s2834_s0 + $0x4] sm:$0xf]  ;;  %v1435_v36 = vld [vmem:[%s2834_s0 + $0x8] sm:$0xf] }
   0xe   :  { %920 = vmatpush.bf16.msra.mxu0 %v2005_v12  ;;  %v1941_v33 = vld [vmem:[%s2834_s0 + $0x1c] sm:$0xf0]  ;;  %v1429_v35 = vld [vmem:[%s2834_s0 + $0x20] sm:$0xf0]  ;;  %v1942_v37 = vld [vmem:[%s2834_s0 + $0x24] sm:$0xf0] }
   0xf   :  { %969 = vmatpush.bf16.msra.mxu1 %v2013_v13  ;;  %v1938_v38 = vld [vmem:[%s2834_s0 + $0xc] sm:$0xf]  ;;  %v1428_v42 = vor.u32 %v1941_v33, %v1427_v32  ;;  %v1432_v43 = vor.u32 %v1937_v34, %v1429_v35  ;;  %v1436_v44 = vor.u32 %v1942_v37, %v1435_v36  ;;  %v2055_v48 = vld [vmem:[%s2832_s1 + $0x1b0] sm:$0xff]  ;;  %v1459_v56 = vld [vmem:[%s2834_s0 + $0x40] sm:$0xf] }
  0x10   :  { %1018 = vmatpush.bf16.msra.mxu2 %v2021_v14  ;;  %v1437_v39 = vld [vmem:[%s2834_s0 + $0x28] sm:$0xf0]  ;;  %v2039_v49 = vld [vmem:[%s2832_s1 + $0x130] sm:$0xff]  ;;  %v1949_v57 = vld [vmem:[%s2834_s0 + $0x5c] sm:$0xf0] }
  0x11   :  { %1067 = vmatpush.bf16.msra.mxu3 %v2029_v15  ;;  %v1440_v45 = vor.u32 %v1938_v38, %v1437_v39  ;;  %v2063_v50 = vld [vmem:[%s2832_s1 + $0x1f0] sm:$0xff]  ;;  %v2054_v52 = vld [vmem:[%s2832_s1 + $0x1a8] sm:$0xff]  ;;  %v1945_v58 = vld [vmem:[%s2834_s0 + $0x44] sm:$0xf]  ;;  %v1460_v0 = vor.u32 %v1949_v57, %v1459_v56 }
  0x12   :  { %921 = vmatpush.bf16.msra.mxu0 %v2004_v16  ;;  %v2047_v51 = vld [vmem:[%s2832_s1 + $0x170] sm:$0xff]  ;;  %v2038_v53 = vld [vmem:[%s2832_s1 + $0x128] sm:$0xff]  ;;  %v1461_v59 = vld [vmem:[%s2834_s0 + $0x60] sm:$0xf0] }
  0x13   :  { %970 = vmatpush.bf16.msra.mxu1 %v2012_v17  ;;  %v2062_v54 = vld [vmem:[%s2832_s1 + $0x1e8] sm:$0xff]  ;;  %v1464_v1 = vor.u32 %v1945_v58, %v1461_v59  ;;  %v2053_v4 = vld [vmem:[%s2832_s1 + $0x1a0] sm:$0xff]  ;;  %v2051_v36 = vld [vmem:[%s2832_s1 + $0x190] sm:$0xff] }
  0x14   :  { %1019 = vmatpush.bf16.msra.mxu2 %v2020_v18  ;;  %v2046_v55 = vld [vmem:[%s2832_s1 + $0x168] sm:$0xff]  ;;  %v2037_v5 = vld [vmem:[%s2832_s1 + $0x120] sm:$0xff]  ;;  %v2035_v37 = vld [vmem:[%s2832_s1 + $0x110] sm:$0xff] }
  0x15   :  { %1068 = vmatpush.bf16.msra.mxu3 %v2028_v19  ;;  %v1467_v60 = vld [vmem:[%s2834_s0 + $0x48] sm:$0xf]  ;;  %v1946_v62 = vld [vmem:[%s2834_s0 + $0x4c] sm:$0xf]  ;;  %v2061_v6 = vld [vmem:[%s2832_s1 + $0x1e0] sm:$0xff] }
  0x16   :  { %922 = vmatpush.bf16.msra.mxu0 %v2003_v20  ;;  %v1950_v61 = vld [vmem:[%s2834_s0 + $0x64] sm:$0xf0]  ;;  %v1469_v63 = vld [vmem:[%s2834_s0 + $0x68] sm:$0xf0]  ;;  %v2045_v7 = vld [vmem:[%s2832_s1 + $0x160] sm:$0xff] }
  0x17   :  { %971 = vmatpush.bf16.msra.mxu1 %v2011_v21  ;;  %v1468_v2 = vor.u32 %v1950_v61, %v1467_v60  ;;  %v1472_v3 = vor.u32 %v1946_v62, %v1469_v63  ;;  %v1491_v8 = vld [vmem:[%s2834_s0 + $0x80] sm:$0xf]  ;;  %v1953_v10 = vld [vmem:[%s2834_s0 + $0x84] sm:$0xf]  ;;  %v1499_v12 = vld [vmem:[%s2834_s0 + $0x88] sm:$0xf] }
  0x18   :  { %1020 = vmatpush.bf16.msra.mxu2 %v2019_v22  ;;  %v1957_v9 = vld [vmem:[%s2834_s0 + $0x9c] sm:$0xf0]  ;;  %v1493_v11 = vld [vmem:[%s2834_s0 + $0xa0] sm:$0xf0]  ;;  %v1958_v13 = vld [vmem:[%s2834_s0 + $0xa4] sm:$0xf0] }
  0x19   :  { %1069 = vmatpush.bf16.msra.mxu3 %v2027_v23  ;;  %v1954_v14 = vld [vmem:[%s2834_s0 + $0x8c] sm:$0xf]  ;;  %v1492_v16 = vor.u32 %v1957_v9, %v1491_v8  ;;  %v1496_v17 = vor.u32 %v1953_v10, %v1493_v11  ;;  %v1500_v18 = vor.u32 %v1958_v13, %v1499_v12  ;;  %v2052_v20 = vld [vmem:[%s2832_s1 + $0x198] sm:$0xff]  ;;  %v2059_v38 = vld [vmem:[%s2832_s1 + $0x1d0] sm:$0xff] }
  0x1a   :  { %923 = vmatpush.bf16.msra.mxu0 %v2002_v24  ;;  %v1501_v15 = vld [vmem:[%s2834_s0 + $0xa8] sm:$0xf0]  ;;  %v2036_v21 = vld [vmem:[%s2832_s1 + $0x118] sm:$0xff]  ;;  %v1523_v24 = vld [vmem:[%s2834_s0 + $0xc0] sm:$0xf] }
  0x1b   :  { %972 = vmatpush.bf16.msra.mxu1 %v2010_v25  ;;  %v1504_v19 = vor.u32 %v1954_v14, %v1501_v15  ;;  %v2060_v22 = vld [vmem:[%s2832_s1 + $0x1d8] sm:$0xff]  ;;  %v1965_v25 = vld [vmem:[%s2834_s0 + $0xdc] sm:$0xf0]  ;;  %v2043_v39 = vld [vmem:[%s2832_s1 + $0x150] sm:$0xff] }
  0x1c   :  { %1021 = vmatpush.bf16.msra.mxu2 %v2018_v26  ;;  %v2044_v23 = vld [vmem:[%s2832_s1 + $0x158] sm:$0xff]  ;;  %v1961_v26 = vld [vmem:[%s2834_s0 + $0xc4] sm:$0xf]  ;;  %v1524_v32 = vor.u32 %v1965_v25, %v1523_v24  ;;  %v1587_v56 = vld [vmem:[%s2834_s0 + $0x140] sm:$0xf] }
  0x1d   :  { %1070 = vmatpush.bf16.msra.mxu3 %v2026_v27  ;;  %v1525_v27 = vld [vmem:[%s2834_s0 + $0xe0] sm:$0xf0]  ;;  %v1981_v57 = vld [vmem:[%s2834_s0 + $0x15c] sm:$0xf0]  ;;  %v1595_v60 = vld [vmem:[%s2834_s0 + $0x148] sm:$0xf] }
  0x1e   :  { %924 = vmatpush.bf16.msra.mxu0 %v2001_v28  ;;  %v1531_v28 = vld [vmem:[%s2834_s0 + $0xc8] sm:$0xf]  ;;  %v1528_v33 = vor.u32 %v1961_v26, %v1525_v27  ;;  %v1977_v58 = vld [vmem:[%s2834_s0 + $0x144] sm:$0xf]  ;;  %v1978_v62 = vld [vmem:[%s2834_s0 + $0x14c] sm:$0xf] }
  0x1f   :  { %973 = vmatpush.bf16.msra.mxu1 %v2009_v29  ;;  %v1966_v29 = vld [vmem:[%s2834_s0 + $0xe4] sm:$0xf0]  ;;  %v1589_v59 = vld [vmem:[%s2834_s0 + $0x160] sm:$0xf0]  ;;  %v1597_v63 = vld [vmem:[%s2834_s0 + $0x168] sm:$0xf0] }
  0x20   :  { %1022 = vmatpush.bf16.msra.mxu2 %v2017_v30  ;;  %v1962_v30 = vld [vmem:[%s2834_s0 + $0xcc] sm:$0xf]  ;;  %v1532_v34 = vor.u32 %v1966_v29, %v1531_v28  ;;  %v1982_v61 = vld [vmem:[%s2834_s0 + $0x164] sm:$0xf0]  ;;  %v1619_v8 = vld [vmem:[%s2834_s0 + $0x180] sm:$0xf] }
  0x21   :  { %1071 = vmatpush.bf16.msra.mxu3 %v2025_v31  ;;  %925 = vmatmul.bf16.vlgmr.msra.gmra.mxu0 %v1428_v42  ;;  %v1533_v31 = vld [vmem:[%s2834_s0 + $0xe8] sm:$0xf0]  ;;  %v1969_v42 = vld [vmem:[%s2834_s0 + $0x104] sm:$0xf]  ;;  %v1989_v9 = vld [vmem:[%s2834_s0 + $0x19c] sm:$0xf0] }
  0x22   :  { %1113 = vmatpush.bf16.msrb.mxu0 %v2040_v41  ;;  %974 = vmatmul.bf16.vlgmr.msra.gmra.mxu1 %v1432_v43  ;;  %v1536_v35 = vor.u32 %v1962_v30, %v1533_v31  ;;  %v1973_v41 = vld [vmem:[%s2834_s0 + $0x11c] sm:$0xf0]  ;;  %v1557_v43 = vld [vmem:[%s2834_s0 + $0x120] sm:$0xf0]  ;;  %v1627_v12 = vld [vmem:[%s2834_s0 + $0x188] sm:$0xf] }
  0x23   :  { %1023 = vmatmul.bf16.vlgmr.msra.gmra.mxu2 %v1436_v44  ;;  %1162 = vmatpush.bf16.msrb.mxu1 %v2048_v47  ;;  %v1563_v44 = vld [vmem:[%s2834_s0 + $0x108] sm:$0xf]  ;;  %v1565_v47 = vld [vmem:[%s2834_s0 + $0x128] sm:$0xf0]  ;;  %v1985_v10 = vld [vmem:[%s2834_s0 + $0x184] sm:$0xf] }
  0x24   :  { %1211 = vmatpush.bf16.msrb.mxu2 %v2056_v40  ;;  %1072 = vmatmul.bf16.vlgmr.msra.gmra.mxu3 %v1440_v45  ;;  %v1555_v40 = vld [vmem:[%s2834_s0 + $0x100] sm:$0xf]  ;;  %v1974_v45 = vld [vmem:[%s2834_s0 + $0x124] sm:$0xf0]  ;;  %v1621_v11 = vld [vmem:[%s2834_s0 + $0x1a0] sm:$0xf0] }
  0x25   :  { %1260 = vmatpush.bf16.msrb.mxu3 %v2064_v46  ;;  %v1970_v46 = vld [vmem:[%s2834_s0 + $0x10c] sm:$0xf]  ;;  %v1990_v13 = vld [vmem:[%s2834_s0 + $0x1a4] sm:$0xf0] }
  0x26   :  { %1114 = vmatpush.bf16.msrb.mxu0 %v2039_v49  ;;  %v1560_v49 = vor.u32 %v1969_v42, %v1557_v43  ;;  %v1986_v14 = vld [vmem:[%s2834_s0 + $0x18c] sm:$0xf]  ;;  %v1659_v24 = vld [vmem:[%s2834_s0 + $0x1c8] sm:$0xf] }
  0x27   :  { %1163 = vmatpush.bf16.msrb.mxu1 %v2047_v51  ;;  %v1568_v51 = vor.u32 %v1970_v46, %v1565_v47  ;;  %v1629_v15 = vld [vmem:[%s2834_s0 + $0x1a8] sm:$0xf0]  ;;  %v1998_v25 = vld [vmem:[%s2834_s0 + $0x1e4] sm:$0xf0] }
  0x28   :  { %1212 = vmatpush.bf16.msrb.mxu2 %v2055_v48  ;;  %v1556_v48 = vor.u32 %v1973_v41, %v1555_v40  ;;  %v1994_v26 = vld [vmem:[%s2834_s0 + $0x1cc] sm:$0xf]  ;;  %v1660_v30 = vor.u32 %v1998_v25, %v1659_v24  ;;  %v1453_v40 = vld [vmem:[%s2834_s0 + $0x38] sm:$0xf0]  ;;  %v1509_v24 = vld [vmem:[%s2834_s0 + $0xb0] sm:$0xf0] }
  0x29   :  { %1261 = vmatpush.bf16.msrb.mxu3 %v2063_v50  ;;  %v1564_v50 = vor.u32 %v1974_v45, %v1563_v44  ;;  %v1661_v27 = vld [vmem:[%s2834_s0 + $0x1e8] sm:$0xf0]  ;;  %v1515_v25 = vld [vmem:[%s2834_s0 + $0x98] sm:$0xf] }
  0x2a   :  { %1115 = vmatpush.bf16.msrb.mxu0 %v2038_v53  ;;  %v2034_v53 = vld [vmem:[%s2832_s1 + $0x108] sm:$0xff]  ;;  %v1664_v31 = vor.u32 %v1994_v26, %v1661_v27  ;;  %v1960_v26 = vld [vmem:[%s2834_s0 + $0xb4] sm:$0xf0]  ;;  %v1956_v27 = vld [vmem:[%s2834_s0 + $0x9c] sm:$0xf] }
  0x2b   :  { %1164 = vmatpush.bf16.msrb.mxu1 %v2046_v55  ;;  %v2042_v55 = vld [vmem:[%s2832_s1 + $0x148] sm:$0xff] }
  0x2c   :  { %1213 = vmatpush.bf16.msrb.mxu2 %v2054_v52  ;;  %v2050_v52 = vld [vmem:[%s2832_s1 + $0x188] sm:$0xff] }
  0x2d   :  { %1262 = vmatpush.bf16.msrb.mxu3 %v2062_v54  ;;  %v2058_v54 = vld [vmem:[%s2832_s1 + $0x1c8] sm:$0xff] }
  0x2e   :  { %1116 = vmatpush.bf16.msrb.mxu0 %v2037_v5  ;;  %v2033_v5 = vld [vmem:[%s2832_s1 + $0x100] sm:$0xff] }
  0x2f   :  { %1165 = vmatpush.bf16.msrb.mxu1 %v2045_v7  ;;  %v2041_v7 = vld [vmem:[%s2832_s1 + $0x140] sm:$0xff] }
  0x30   :  { %1214 = vmatpush.bf16.msrb.mxu2 %v2053_v4  ;;  %v2049_v4 = vld [vmem:[%s2832_s1 + $0x180] sm:$0xff] }
  0x31   :  { %930 = vmatmul.bf16.gmra.mxu0 %v1460_v0  ;;  %1263 = vmatpush.bf16.msrb.mxu3 %v2061_v6  ;;  %v1588_v0 = vor.u32 %v1981_v57, %v1587_v56  ;;  %v2057_v6 = vld [vmem:[%s2832_s1 + $0x1c0] sm:$0xff]  ;;  %v1475_v57 = vld [vmem:[%s2834_s0 + $0x50] sm:$0xf] }
  0x32   :  { %979 = vmatmul.bf16.gmra.mxu1 %v1464_v1  ;;  %1117 = vmatpush.bf16.msrb.mxu0 %v2036_v21  ;;  %v1592_v1 = vor.u32 %v1977_v58, %v1589_v59  ;;  %v1997_v21 = vld [vmem:[%s2834_s0 + $0x1dc] sm:$0xf0]  ;;  %v1951_v58 = vld [vmem:[%s2834_s0 + $0x6c] sm:$0xf0]  ;;  %v1947_v59 = vld [vmem:[%s2834_s0 + $0x54] sm:$0xf] }
  0x33   :  { %1028 = vmatmul.bf16.gmra.mxu2 %v1468_v2  ;;  %1166 = vmatpush.bf16.msrb.mxu1 %v2044_v23  ;;  %v1596_v2 = vor.u32 %v1982_v61, %v1595_v60  ;;  %v1653_v23 = vld [vmem:[%s2834_s0 + $0x1e0] sm:$0xf0]  ;;  %v1477_v60 = vld [vmem:[%s2834_s0 + $0x70] sm:$0xf0]  ;;  %v1483_v61 = vld [vmem:[%s2834_s0 + $0x58] sm:$0xf] }
  0x34   :  { %1077 = vmatmul.bf16.gmra.mxu3 %v1472_v3  ;;  %1215 = vmatpush.bf16.msrb.mxu2 %v2052_v20  ;;  %v1600_v3 = vor.u32 %v1978_v62, %v1597_v63  ;;  %v1651_v20 = vld [vmem:[%s2834_s0 + $0x1c0] sm:$0xf]  ;;  %v1952_v62 = vld [vmem:[%s2834_s0 + $0x74] sm:$0xf0]  ;;  %v1948_v63 = vld [vmem:[%s2834_s0 + $0x5c] sm:$0xf] }
  0x35   :  { %1264 = vmatpush.bf16.msrb.mxu3 %v2060_v22  ;;  %v1993_v22 = vld [vmem:[%s2834_s0 + $0x1c4] sm:$0xf]  ;;  %v1652_v28 = vor.u32 %v1997_v21, %v1651_v20  ;;  %v1507_v21 = vld [vmem:[%s2834_s0 + $0x90] sm:$0xf] }
  0x36   :  { %1118 = vmatpush.bf16.msrb.mxu0 %v2035_v37  ;;  %v1656_v29 = vor.u32 %v1993_v22, %v1653_v23  ;;  %v1451_v37 = vld [vmem:[%s2834_s0 + $0x18] sm:$0xf]  ;;  %v1959_v22 = vld [vmem:[%s2834_s0 + $0xac] sm:$0xf0]  ;;  %v1955_v23 = vld [vmem:[%s2834_s0 + $0x94] sm:$0xf] }
  0x37   :  { %1167 = vmatpush.bf16.msrb.mxu1 %v2043_v39  ;;  %v1940_v39 = vld [vmem:[%s2834_s0 + $0x1c] sm:$0xf] }
  0x38   :  { %1216 = vmatpush.bf16.msrb.mxu2 %v2051_v36  ;;  %v1445_v36 = vld [vmem:[%s2834_s0 + $0x30] sm:$0xf0]  ;;  %v1456_v46 = vor.u32 %v1940_v39, %v1453_v40 }
  0x39   :  { %1265 = vmatpush.bf16.msrb.mxu3 %v2059_v38  ;;  %v1944_v38 = vld [vmem:[%s2834_s0 + $0x34] sm:$0xf0] }
  0x3a   :  { %1119 = vmatpush.bf16.msrb.mxu0 %v2034_v53  ;;  %v1452_v45 = vor.u32 %v1944_v38, %v1451_v37  ;;  %v1516_v37 = vor.u32 %v1960_v26, %v1515_v25 }
  0x3b   :  { %1168 = vmatpush.bf16.msrb.mxu1 %v2042_v55 }
  0x3c   :  { %1217 = vmatpush.bf16.msrb.mxu2 %v2050_v52 }
  0x3d   :  { %1266 = vmatpush.bf16.msrb.mxu3 %v2058_v54 }
  0x3e   :  { %1120 = vmatpush.bf16.msrb.mxu0 %v2033_v5 }
  0x3f   :  { %1169 = vmatpush.bf16.msrb.mxu1 %v2041_v7 }
  0x40   :  { %1218 = vmatpush.bf16.msrb.mxu2 %v2049_v4  ;;  %v1480_v4 = vor.u32 %v1947_v59, %v1477_v60 }
  0x41   :  { %935 = vmatmul.bf16.gmra.mxu0 %v1492_v16  ;;  %1267 = vmatpush.bf16.msrb.mxu3 %v2057_v6  ;;  %v1620_v16 = vor.u32 %v1989_v9, %v1619_v8  ;;  %v1484_v8 = vor.u32 %v1952_v62, %v1483_v61 }
  0x42   :  { %984 = vmatmul.bf16.gmra.mxu1 %v1496_v17  ;;  %v1624_v17 = vor.u32 %v1985_v10, %v1621_v11 }
  0x43   :  { %1033 = vmatmul.bf16.gmra.mxu2 %v1500_v18  ;;  %v1628_v18 = vor.u32 %v1990_v13, %v1627_v12 }
  0x44   :  { %1082 = vmatmul.bf16.gmra.mxu3 %v1504_v19  ;;  %v1632_v19 = vor.u32 %v1986_v14, %v1629_v15 }
  0x51   :  { %940 = vmatmul.bf16.gmra.mxu0 %v1524_v32  ;;  %v2478_v32 = vld [vmem:[%s2833_s2] ss:$0 sm:$0xff] }
  0x52   :  { %989 = vmatmul.bf16.gmra.mxu1 %v1528_v33  ;;  %v1443_v33 = vld [vmem:[%s2834_s0 + $0x10] sm:$0xf] }
  0x53   :  { %1038 = vmatmul.bf16.gmra.mxu2 %v1532_v34  ;;  %v1943_v34 = vld [vmem:[%s2834_s0 + $0x2c] sm:$0xf0] }
  0x54   :  { %1087 = vmatmul.bf16.gmra.mxu3 %v1536_v35  ;;  %v1939_v35 = vld [vmem:[%s2834_s0 + $0x14] sm:$0xf]  ;;  %v1444_v41 = vor.u32 %v1943_v34, %v1443_v33  ;;  %v1512_v33 = vor.u32 %v1955_v23, %v1509_v24  ;;  %v1972_v23 = vld [vmem:[%s2834_s0 + $0x11c] sm:$0xf] }
  0x55   :  { %v1448_v42 = vor.u32 %v1939_v35, %v1445_v36  ;;  %v1581_v24 = vld [vmem:[%s2834_s0 + $0x138] sm:$0xf0] }
  0x61   :  { %945 = vmatmul.bf16.gmra.mxu0 %v1556_v48 }
  0x62   :  { %994 = vmatmul.bf16.gmra.mxu1 %v1560_v49 }
  0x63   :  { %1043 = vmatmul.bf16.gmra.mxu2 %v1564_v50 }
  0x64   :  { %1092 = vmatmul.bf16.gmra.mxu3 %v1568_v51 }
  0x71   :  { %950 = vmatmul.bf16.gmra.mxu0 %v1588_v0  ;;  %v1485_v0 = vld [vmem:[%s2834_s0 + $0x78] sm:$0xf0] }
  0x72   :  { %999 = vmatmul.bf16.gmra.mxu1 %v1592_v1  ;;  %v1488_v9 = vor.u32 %v1948_v63, %v1485_v0 }
  0x73   :  { %1048 = vmatmul.bf16.gmra.mxu2 %v1596_v2 }
  0x74   :  { %1097 = vmatmul.bf16.gmra.mxu3 %v1600_v3  ;;  %v1476_v3 = vor.u32 %v1951_v58, %v1475_v57  ;;  %v1964_v57 = vld [vmem:[%s2834_s0 + $0xdc] sm:$0xf] }
  0x75   :  { %v1549_v58 = vld [vmem:[%s2834_s0 + $0xf8] sm:$0xf0] }
  0x81   :  { %955 = vmatmul.bf16.gmra.mxu0 %v1620_v16 }
  0x82   :  { %1004 = vmatmul.bf16.gmra.mxu1 %v1624_v17 }
  0x83   :  { %1053 = vmatmul.bf16.gmra.mxu2 %v1628_v18 }
  0x84   :  { %1102 = vmatmul.bf16.gmra.mxu3 %v1632_v19 }
  0x91   :  { %960 = vmatmul.bf16.gmra.mxu0 %v1652_v28  ;;  %v1517_v28 = vld [vmem:[%s2834_s0 + $0xb8] sm:$0xf0] }
  0x92   :  { %1009 = vmatmul.bf16.gmra.mxu1 %v1656_v29  ;;  %v1520_v38 = vor.u32 %v1956_v27, %v1517_v28 }
  0x93   :  { %1058 = vmatmul.bf16.gmra.mxu2 %v1660_v30 }
  0x94   :  { %1107 = vmatmul.bf16.gmra.mxu3 %v1664_v31  ;;  %v1508_v31 = vor.u32 %v1959_v22, %v1507_v21  ;;  %v1579_v21 = vld [vmem:[%s2834_s0 + $0x118] sm:$0xf] }
  0x95   :  { %v1976_v22 = vld [vmem:[%s2834_s0 + $0x134] sm:$0xf0] }
  0x9e   :  { %v926_v43 = vpop.f32.mrf.mxu0 }
  0x9f   :  { %v975_v44 = vpop.f32.mrf.mxu1  ;;  %v927_v47 = vadd.f32 %v2478_v32, %v926_v43 }
  0xa1   :  { %v976_v48 = vadd.f32 %v975_v44, %v927_v47  ;;  %1121 = vmatmul.bf16.vlgmr.msrb.gmra.mxu0 %v1444_v41 }
  0xa2   :  { %1170 = vmatmul.bf16.vlgmr.msrb.gmra.mxu1 %v1448_v42 }
  0xa3   :  { %1219 = vmatmul.bf16.vlgmr.msrb.gmra.mxu2 %v1452_v45 }
  0xa4   :  { %1268 = vmatmul.bf16.vlgmr.msrb.gmra.mxu3 %v1456_v46 }
  0xa6   :  { %v1024_v49 = vpop.f32.mrf.mxu2  ;;  %v928_v52 = vpop.f32.mrf.mxu0 }
  0xa7   :  { %v1073_v50 = vpop.f32.mrf.mxu3  ;;  %v1025_v51 = vadd.f32 %v1024_v49, %v976_v48  ;;  %v977_v53 = vpop.f32.mrf.mxu1  ;;  %v929_v54 = vadd.f32 %v2478_v32, %v928_v52  ;;  %v1963_v52 = vld [vmem:[%s2834_s0 + $0xd4] sm:$0xf] }
  0xa9   :  { %v2506_v55 = vadd.f32 %v1073_v50, %v1025_v51  ;;  %v978_v56 = vadd.f32 %v977_v53, %v929_v54  ;;  %v1539_v50 = vld [vmem:[%s2834_s0 + $0xd0] sm:$0xf]  ;;  %v1541_v53 = vld [vmem:[%s2834_s0 + $0xf0] sm:$0xf0]  ;;  %v1547_v54 = vld [vmem:[%s2834_s0 + $0xd8] sm:$0xf] }
  0xaa   :  { %v1967_v51 = vld [vmem:[%s2834_s0 + $0xec] sm:$0xf0]  ;;  %v1544_v62 = vor.u32 %v1963_v52, %v1541_v53  ;;  %v1611_v52 = vld [vmem:[%s2834_s0 + $0x158] sm:$0xf] }
  0xab   :  { %v1540_v61 = vor.u32 %v1967_v51, %v1539_v50  ;;  %v1979_v50 = vld [vmem:[%s2834_s0 + $0x154] sm:$0xf]  ;;  %v1984_v53 = vld [vmem:[%s2834_s0 + $0x174] sm:$0xf0] }
  0xac   :  { %v1605_v51 = vld [vmem:[%s2834_s0 + $0x170] sm:$0xf0] }
  0xae   :  { %v1026_v1 = vpop.f32.mrf.mxu2  ;;  %v931_v6 = vpop.f32.mrf.mxu0 }
  0xaf   :  { %v1075_v2 = vpop.f32.mrf.mxu3  ;;  %v1027_v5 = vadd.f32 %v1026_v1, %v978_v56  ;;  %v980_v7 = vpop.f32.mrf.mxu1  ;;  %v932_v10 = vadd.f32 %v2478_v32, %v931_v6  ;;  %v1968_v56 = vld [vmem:[%s2834_s0 + $0xf4] sm:$0xf0] }
  0xb1   :  { %v2533_v11 = vadd.f32 %v1075_v2, %v1027_v5  ;;  %v981_v12 = vadd.f32 %v980_v7, %v932_v10  ;;  %1126 = vmatmul.bf16.gmra.mxu0 %v1476_v3  ;;  %v1548_v2 = vor.u32 %v1968_v56, %v1547_v54  ;;  %v1552_v3 = vor.u32 %v1964_v57, %v1549_v58  ;;  %v1980_v54 = vld [vmem:[%s2834_s0 + $0x15c] sm:$0xf] }
  0xb2   :  { %1175 = vmatmul.bf16.gmra.mxu1 %v1480_v4  ;;  %v1613_v56 = vld [vmem:[%s2834_s0 + $0x178] sm:$0xf0] }
  0xb3   :  { %1224 = vmatmul.bf16.gmra.mxu2 %v1484_v8 }
  0xb4   :  { %1273 = vmatmul.bf16.gmra.mxu3 %v1488_v9 }
  0xb6   :  { %v1029_v13 = vpop.f32.mrf.mxu2  ;;  %v933_v16 = vpop.f32.mrf.mxu0 }
  0xb7   :  { %v1078_v14 = vpop.f32.mrf.mxu3  ;;  %v1030_v15 = vadd.f32 %v1029_v13, %v981_v12  ;;  %v982_v17 = vpop.f32.mrf.mxu1  ;;  %v934_v18 = vadd.f32 %v2478_v32, %v933_v16  ;;  %v1571_v16 = vld [vmem:[%s2834_s0 + $0x110] sm:$0xf] }
  0xb9   :  { %v2536_v19 = vadd.f32 %v1078_v14, %v1030_v15  ;;  %v983_v20 = vadd.f32 %v982_v17, %v934_v18  ;;  %v1975_v17 = vld [vmem:[%s2834_s0 + $0x12c] sm:$0xf0]  ;;  %v1971_v18 = vld [vmem:[%s2834_s0 + $0x114] sm:$0xf] }
  0xba   :  { %v1572_v27 = vor.u32 %v1975_v17, %v1571_v16  ;;  %v1635_v16 = vld [vmem:[%s2834_s0 + $0x190] sm:$0xf] }
  0xbb   :  { %v1991_v17 = vld [vmem:[%s2834_s0 + $0x1ac] sm:$0xf0] }
  0xbe   :  { %v1031_v29 = vpop.f32.mrf.mxu2  ;;  %v936_v35 = vpop.f32.mrf.mxu0 }
  0xbf   :  { %v1080_v30 = vpop.f32.mrf.mxu3  ;;  %v1032_v34 = vadd.f32 %v1031_v29, %v983_v20  ;;  %v985_v36 = vpop.f32.mrf.mxu1  ;;  %v937_v39 = vadd.f32 %v2478_v32, %v936_v35  ;;  %v1573_v20 = vld [vmem:[%s2834_s0 + $0x130] sm:$0xf0] }
  0xc0   :  { %v1576_v28 = vor.u32 %v1971_v18, %v1573_v20  ;;  %v1987_v18 = vld [vmem:[%s2834_s0 + $0x194] sm:$0xf] }
  0xc1   :  { %v2563_v40 = vadd.f32 %v1080_v30, %v1032_v34  ;;  %v986_v41 = vadd.f32 %v985_v36, %v937_v39  ;;  %1131 = vmatmul.bf16.gmra.mxu0 %v1508_v31  ;;  %v1584_v34 = vor.u32 %v1972_v23, %v1581_v24  ;;  %v1637_v20 = vld [vmem:[%s2834_s0 + $0x1b0] sm:$0xf0]  ;;  %v1988_v23 = vld [vmem:[%s2834_s0 + $0x19c] sm:$0xf] }
  0xc2   :  { %1180 = vmatmul.bf16.gmra.mxu1 %v1512_v33  ;;  %v1580_v33 = vor.u32 %v1976_v22, %v1579_v21  ;;  %v1643_v21 = vld [vmem:[%s2834_s0 + $0x198] sm:$0xf]  ;;  %v1645_v24 = vld [vmem:[%s2834_s0 + $0x1b8] sm:$0xf0] }
  0xc3   :  { %1229 = vmatmul.bf16.gmra.mxu2 %v1516_v37  ;;  %v1992_v22 = vld [vmem:[%s2834_s0 + $0x1b4] sm:$0xf0] }
  0xc4   :  { %1278 = vmatmul.bf16.gmra.mxu3 %v1520_v38 }
  0xc6   :  { %v1034_v42 = vpop.f32.mrf.mxu2  ;;  %v938_v45 = vpop.f32.mrf.mxu0 }
  0xc7   :  { %v1083_v43 = vpop.f32.mrf.mxu3  ;;  %v1035_v44 = vadd.f32 %v1034_v42, %v986_v41  ;;  %v987_v46 = vpop.f32.mrf.mxu1  ;;  %v939_v47 = vadd.f32 %v2478_v32, %v938_v45 }
  0xc9   :  { %v2566_v48 = vadd.f32 %v1083_v43, %v1035_v44  ;;  %v988_v49 = vadd.f32 %v987_v46, %v939_v47  ;;  %v1603_v47 = vld [vmem:[%s2834_s0 + $0x150] sm:$0xf] }
  0xce   :  { %v1036_v59 = vpop.f32.mrf.mxu2  ;;  %v941_v0 = vpop.f32.mrf.mxu0 }
  0xcf   :  { %v1085_v60 = vpop.f32.mrf.mxu3  ;;  %v1037_v63 = vadd.f32 %v1036_v59, %v988_v49  ;;  %v990_v1 = vpop.f32.mrf.mxu1  ;;  %v942_v4 = vadd.f32 %v2478_v32, %v941_v0  ;;  %v1983_v49 = vld [vmem:[%s2834_s0 + $0x16c] sm:$0xf0]  ;;  %v1612_v0 = vor.u32 %v1984_v53, %v1611_v52  ;;  %v1995_v52 = vld [vmem:[%s2834_s0 + $0x1d4] sm:$0xf] }
  0xd0   :  { %v1604_v59 = vor.u32 %v1983_v49, %v1603_v47  ;;  %v1669_v53 = vld [vmem:[%s2834_s0 + $0x1f0] sm:$0xf0] }
  0xd1   :  { %v2593_v5 = vadd.f32 %v1085_v60, %v1037_v63  ;;  %v991_v6 = vadd.f32 %v990_v1, %v942_v4  ;;  %1136 = vmatmul.bf16.gmra.mxu0 %v1540_v61  ;;  %v1608_v60 = vor.u32 %v1979_v50, %v1605_v51  ;;  %v1616_v1 = vor.u32 %v1980_v54, %v1613_v56  ;;  %v1667_v50 = vld [vmem:[%s2834_s0 + $0x1d0] sm:$0xf]  ;;  %v1675_v54 = vld [vmem:[%s2834_s0 + $0x1d8] sm:$0xf] }
  0xd2   :  { %1185 = vmatmul.bf16.gmra.mxu1 %v1544_v62  ;;  %v1999_v51 = vld [vmem:[%s2834_s0 + $0x1ec] sm:$0xf0]  ;;  %v2000_v56 = vld [vmem:[%s2834_s0 + $0x1f4] sm:$0xf0] }
  0xd3   :  { %1234 = vmatmul.bf16.gmra.mxu2 %v1548_v2 }
  0xd4   :  { %1283 = vmatmul.bf16.gmra.mxu3 %v1552_v3 }
  0xd6   :  { %v1039_v7 = vpop.f32.mrf.mxu2  ;;  %v943_v10 = vpop.f32.mrf.mxu0 }
  0xd7   :  { %v1088_v8 = vpop.f32.mrf.mxu3  ;;  %v1040_v9 = vadd.f32 %v1039_v7, %v991_v6  ;;  %v992_v12 = vpop.f32.mrf.mxu1  ;;  %v944_v13 = vadd.f32 %v2478_v32, %v943_v10 }
  0xd9   :  { %v2596_v14 = vadd.f32 %v1088_v8, %v1040_v9  ;;  %v993_v15 = vadd.f32 %v992_v12, %v944_v13 }
  0xde   :  { %v1041_v25 = vpop.f32.mrf.mxu2  ;;  %v946_v30 = vpop.f32.mrf.mxu0 }
  0xdf   :  { %v1090_v26 = vpop.f32.mrf.mxu3  ;;  %v1042_v29 = vadd.f32 %v1041_v25, %v993_v15  ;;  %v995_v31 = vpop.f32.mrf.mxu1  ;;  %v947_v35 = vadd.f32 %v2478_v32, %v946_v30 }
  0xe1   :  { %v2623_v36 = vadd.f32 %v1090_v26, %v1042_v29  ;;  %v996_v37 = vadd.f32 %v995_v31, %v947_v35  ;;  %1141 = vmatmul.bf16.gmra.mxu0 %v1572_v27  ;;  %v1636_v27 = vor.u32 %v1991_v17, %v1635_v16 }
  0xe2   :  { %1190 = vmatmul.bf16.gmra.mxu1 %v1576_v28  ;;  %v1640_v28 = vor.u32 %v1987_v18, %v1637_v20 }
  0xe3   :  { %1239 = vmatmul.bf16.gmra.mxu2 %v1580_v33  ;;  %v1644_v33 = vor.u32 %v1992_v22, %v1643_v21 }
  0xe4   :  { %1288 = vmatmul.bf16.gmra.mxu3 %v1584_v34  ;;  %v1648_v34 = vor.u32 %v1988_v23, %v1645_v24 }
  0xe6   :  { %v1044_v38 = vpop.f32.mrf.mxu2  ;;  %v948_v42 = vpop.f32.mrf.mxu0 }
  0xe7   :  { %v1093_v39 = vpop.f32.mrf.mxu3  ;;  %v1045_v41 = vadd.f32 %v1044_v38, %v996_v37  ;;  %v997_v43 = vpop.f32.mrf.mxu1  ;;  %v949_v44 = vadd.f32 %v2478_v32, %v948_v42 }
  0xe9   :  { %v2626_v45 = vadd.f32 %v1093_v39, %v1045_v41  ;;  %v998_v46 = vadd.f32 %v997_v43, %v949_v44 }
  0xee   :  { %v1046_v57 = vpop.f32.mrf.mxu2  ;;  %v951_v62 = vpop.f32.mrf.mxu0 }
  0xef   :  { %v1095_v58 = vpop.f32.mrf.mxu3  ;;  %v1047_v61 = vadd.f32 %v1046_v57, %v998_v46  ;;  %v1000_v63 = vpop.f32.mrf.mxu1  ;;  %v952_v2 = vadd.f32 %v2478_v32, %v951_v62  ;;  %v1996_v57 = vld [vmem:[%s2834_s0 + $0x1dc] sm:$0xf]  ;;  %v1672_v62 = vor.u32 %v1995_v52, %v1669_v53 }
  0xf1   :  { %v2653_v3 = vadd.f32 %v1095_v58, %v1047_v61  ;;  %v1001_v4 = vadd.f32 %v1000_v63, %v952_v2  ;;  %1146 = vmatmul.bf16.gmra.mxu0 %v1604_v59  ;;  %v1677_v58 = vld [vmem:[%s2834_s0 + $0x1f8] sm:$0xf0]  ;;  %v1668_v61 = vor.u32 %v1999_v51, %v1667_v50  ;;  %v1676_v2 = vor.u32 %v2000_v56, %v1675_v54  ;;  %v1358_v50 = vld [vmem:[%s2835_s3 + $0x8] sm:$0xff] }
  0xf2   :  { %1195 = vmatmul.bf16.gmra.mxu1 %v1608_v60  ;;  %v1374_v54 = vmul.f32 -1.0, %v1358_v50 }
  0xf3   :  { %1244 = vmatmul.bf16.gmra.mxu2 %v1612_v0 }
  0xf4   :  { %1293 = vmatmul.bf16.gmra.mxu3 %v1616_v1 }
  0xf6   :  { %v1049_v6 = vpop.f32.mrf.mxu2  ;;  %v953_v9 = vpop.f32.mrf.mxu0 }
  0xf7   :  { %v1098_v7 = vpop.f32.mrf.mxu3  ;;  %v1050_v8 = vadd.f32 %v1049_v6, %v1001_v4  ;;  %v1002_v10 = vpop.f32.mrf.mxu1  ;;  %v954_v12 = vadd.f32 %v2478_v32, %v953_v9  ;;  %v1680_v4 = vor.u32 %v1996_v57, %v1677_v58 }
  0xf9   :  { %v2656_v13 = vadd.f32 %v1098_v7, %v1050_v8  ;;  %v1003_v15 = vadd.f32 %v1002_v10, %v954_v12 }
  0xfe   :  { %v1051_v25 = vpop.f32.mrf.mxu2  ;;  %v956_v30 = vpop.f32.mrf.mxu0 }
  0xff   :  { %v1100_v26 = vpop.f32.mrf.mxu3  ;;  %v1052_v29 = vadd.f32 %v1051_v25, %v1003_v15  ;;  %v1005_v31 = vpop.f32.mrf.mxu1  ;;  %v957_v35 = vadd.f32 %v2478_v32, %v956_v30 }
 0x101   :  { %v2683_v37 = vadd.f32 %v1100_v26, %v1052_v29  ;;  %v1006_v38 = vadd.f32 %v1005_v31, %v957_v35  ;;  %1151 = vmatmul.bf16.gmra.mxu0 %v1636_v27 }
 0x102   :  { %1200 = vmatmul.bf16.gmra.mxu1 %v1640_v28 }
 0x103   :  { %1249 = vmatmul.bf16.gmra.mxu2 %v1644_v33 }
 0x104   :  { %1298 = vmatmul.bf16.gmra.mxu3 %v1648_v34 }
 0x106   :  { %v1054_v39 = vpop.f32.mrf.mxu2  ;;  %v958_v43 = vpop.f32.mrf.mxu0 }
 0x107   :  { %v1103_v41 = vpop.f32.mrf.mxu3  ;;  %v1055_v42 = vadd.f32 %v1054_v39, %v1006_v38  ;;  %v1007_v44 = vpop.f32.mrf.mxu1  ;;  %v959_v46 = vadd.f32 %v2478_v32, %v958_v43 }
 0x109   :  { %v2686_v47 = vadd.f32 %v1103_v41, %v1055_v42  ;;  %v1008_v49 = vadd.f32 %v1007_v44, %v959_v46 }
 0x10e   :  { %v1056_v59 = vpop.f32.mrf.mxu2  ;;  %v961_v0 = vpop.f32.mrf.mxu0 }
 0x10f   :  { %v1105_v60 = vpop.f32.mrf.mxu3  ;;  %v1057_v63 = vadd.f32 %v1056_v59, %v1008_v49  ;;  %v1010_v1 = vpop.f32.mrf.mxu1  ;;  %v962_v6 = vadd.f32 %v2478_v32, %v961_v0 }
 0x111   :  { %v2713_v7 = vadd.f32 %v1105_v60, %v1057_v63  ;;  %v1011_v8 = vadd.f32 %v1010_v1, %v962_v6  ;;  %1156 = vmatmul.bf16.gmra.mxu0 %v1668_v61  ;;  %v1359_v63 = vld [vmem:[%s2835_s3 + $0x10] sm:$0xff] }
 0x112   :  { %1205 = vmatmul.bf16.gmra.mxu1 %v1672_v62 }
 0x113   :  { %1254 = vmatmul.bf16.gmra.mxu2 %v1676_v2 }
 0x114   :  { %1303 = vmatmul.bf16.gmra.mxu3 %v1680_v4  ;;  %v1375_v4 = vmul.f32 -1.0, %v1359_v63 }
 0x116   :  { %v1059_v9 = vpop.f32.mrf.mxu2  ;;  %v963_v15 = vpop.f32.mrf.mxu0 }
 0x117   :  { %v1108_v10 = vpop.f32.mrf.mxu3  ;;  %v1060_v12 = vadd.f32 %v1059_v9, %v1011_v8  ;;  %v1012_v16 = vpop.f32.mrf.mxu1  ;;  %v964_v17 = vadd.f32 %v2478_v32, %v963_v15  ;;  %v1357_v32 = vld [vmem:[%s2835_s3] sm:$0xff] }
 0x118   :  { %v1373_v39 = vmul.f32 -1.0, %v1357_v32  ;;  %v1361_v32 = vld [vmem:[%s2835_s3 + $0x20] sm:$0xff] }
 0x119   :  { %v2716_v18 = vadd.f32 %v1108_v10, %v1060_v12  ;;  %v1013_v20 = vadd.f32 %v1012_v16, %v964_v17  ;;  %v1360_v17 = vld [vmem:[%s2835_s3 + $0x18] sm:$0xff] }
 0x11e   :  { %v1061_v21 = vpop.f32.mrf.mxu2  ;;  %v1122_v24 = vpop.f32.mrf.mxu0 }
 0x11f   :  { %v1110_v22 = vpop.f32.mrf.mxu3  ;;  %v1062_v23 = vadd.f32 %v1061_v21, %v1013_v20  ;;  %v1171_v25 = vpop.f32.mrf.mxu1  ;;  %v1123_v27 = vadd.f32 %v1122_v24, %v2506_v55 }
 0x121   :  { %v2718_v26 = vadd.f32 %v1110_v22, %v1062_v23  ;;  %v1172_v28 = vadd.f32 %v1171_v25, %v1123_v27  ;;  %v1376_v23 = vmul.f32 -1.0, %v1360_v17 }
 0x126   :  { %v1220_v29 = vpop.f32.mrf.mxu2  ;;  %v1124_v33 = vpop.f32.mrf.mxu0 }
 0x127   :  { %v1269_v30 = vpop.f32.mrf.mxu3  ;;  %v1221_v31 = vadd.f32 %v1220_v29, %v1172_v28  ;;  %v1173_v34 = vpop.f32.mrf.mxu1  ;;  %v1125_v38 = vadd.f32 %v1124_v33, %v2533_v11 }
 0x129   :  { %v1270_v35 = vadd.f32 %v1269_v30, %v1221_v31  ;;  %v1174_v43 = vadd.f32 %v1173_v34, %v1125_v38  ;;  %v1377_v38 = vmul.f32 -1.0, %v1361_v32 }
 0x12b   :  { %vm1309_vm0 = vcmp.ge.f32.partialorder %v1270_v35, 0.0  ;;  %v1325_v41 = vmul.f32 0.25, %v1270_v35 }
 0x12d   :  { %v1341_v42 = vsel %vm1309_vm0, %v1270_v35, %v1325_v41 }
 0x12e   :  { %v1389_v44 = vadd.f32 %v1373_v39, %v1341_v42  ;;  %v1222_v55 = vpop.f32.mrf.mxu2  ;;  %v1127_v51 = vpop.f32.mrf.mxu0 }
 0x12f   :  { %v1271_v46 = vpop.f32.mrf.mxu3  ;;  %v1223_v49 = vadd.f32 %v1222_v55, %v1174_v43  ;;  %v1176_v52 = vpop.f32.mrf.mxu1  ;;  %v1128_v53 = vadd.f32 %v1127_v51, %v2536_v19 }
 0x130   :  { %1405 = vst [vmem:[%s2836_s4] sm:$0xff] %v1389_v44 }
 0x131   :  { %v1272_v11 = vadd.f32 %v1271_v46, %v1223_v49  ;;  %v1177_v58 = vadd.f32 %v1176_v52, %v1128_v53  ;;  %v1362_v49 = vld [vmem:[%s2835_s3 + $0x28] sm:$0xff] }
 0x133   :  { %vm1310_vm1 = vcmp.ge.f32.partialorder %v1272_v11, 0.0  ;;  %v1326_v56 = vmul.f32 0.25, %v1272_v11 }
 0x135   :  { %v1342_v57 = vsel %vm1310_vm1, %v1272_v11, %v1326_v56  ;;  %v1378_v11 = vmul.f32 -1.0, %v1362_v49 }
 0x136   :  { %v1390_v59 = vadd.f32 %v1374_v54, %v1342_v57  ;;  %v1225_v60 = vpop.f32.mrf.mxu2  ;;  %v1129_v0 = vpop.f32.mrf.mxu0 }
 0x137   :  { %v1274_v61 = vpop.f32.mrf.mxu3  ;;  %v1226_v62 = vadd.f32 %v1225_v60, %v1177_v58  ;;  %v1178_v1 = vpop.f32.mrf.mxu1  ;;  %v1130_v2 = vadd.f32 %v1129_v0, %v2563_v40 }
 0x138   :  { %1406 = vst [vmem:[%s2836_s4 + $0x8] sm:$0xff] %v1390_v59 }
 0x139   :  { %v1275_v19 = vadd.f32 %v1274_v61, %v1226_v62  ;;  %v1179_v9 = vadd.f32 %v1178_v1, %v1130_v2  ;;  %v1363_v61 = vld [vmem:[%s2835_s3 + $0x30] sm:$0xff] }
 0x13a   :  { %v1379_v1 = vmul.f32 -1.0, %v1363_v61 }
 0x13b   :  { %vm1311_vm2 = vcmp.ge.f32.partialorder %v1275_v19, 0.0  ;;  %v1327_v6 = vmul.f32 0.25, %v1275_v19 }
 0x13d   :  { %v1343_v8 = vsel %vm1311_vm2, %v1275_v19, %v1327_v6 }
 0x13e   :  { %v1391_v10 = vadd.f32 %v1375_v4, %v1343_v8  ;;  %v1227_v12 = vpop.f32.mrf.mxu2  ;;  %v1132_v20 = vpop.f32.mrf.mxu0 }
 0x13f   :  { %v1276_v15 = vpop.f32.mrf.mxu3  ;;  %v1228_v16 = vadd.f32 %v1227_v12, %v1179_v9  ;;  %v1181_v21 = vpop.f32.mrf.mxu1  ;;  %v1133_v22 = vadd.f32 %v1132_v20, %v2566_v48  ;;  %v1364_v12 = vld [vmem:[%s2835_s3 + $0x38] sm:$0xff] }
 0x140   :  { %1407 = vst [vmem:[%s2836_s4 + $0x10] sm:$0xff] %v1391_v10  ;;  %v1380_v20 = vmul.f32 -1.0, %v1364_v12 }
 0x141   :  { %v1277_v40 = vadd.f32 %v1276_v15, %v1228_v16  ;;  %v1182_v27 = vadd.f32 %v1181_v21, %v1133_v22 }
 0x143   :  { %vm1312_vm3 = vcmp.ge.f32.partialorder %v1277_v40, 0.0  ;;  %v1328_v24 = vmul.f32 0.25, %v1277_v40 }
 0x145   :  { %v1344_v25 = vsel %vm1312_vm3, %v1277_v40, %v1328_v24 }
 0x146   :  { %v1392_v28 = vadd.f32 %v1376_v23, %v1344_v25  ;;  %v1230_v29 = vpop.f32.mrf.mxu2  ;;  %v1134_v33 = vpop.f32.mrf.mxu0 }
 0x147   :  { %v1279_v30 = vpop.f32.mrf.mxu3  ;;  %v1231_v31 = vadd.f32 %v1230_v29, %v1182_v27  ;;  %v1183_v34 = vpop.f32.mrf.mxu1  ;;  %v1135_v35 = vadd.f32 %v1134_v33, %v2593_v5 }
 0x148   :  { %1408 = vst [vmem:[%s2836_s4 + $0x18] sm:$0xff] %v1392_v28  ;;  %v1365_v28 = vld [vmem:[%s2835_s3 + $0x40] sm:$0xff] }
 0x149   :  { %v1280_v48 = vadd.f32 %v1279_v30, %v1231_v31  ;;  %v1184_v42 = vadd.f32 %v1183_v34, %v1135_v35  ;;  %v1381_v32 = vmul.f32 -1.0, %v1365_v28 }
 0x14b   :  { %vm1313_vm4 = vcmp.ge.f32.partialorder %v1280_v48, 0.0  ;;  %v1329_v39 = vmul.f32 0.25, %v1280_v48 }
 0x14d   :  { %v1345_v41 = vsel %vm1313_vm4, %v1280_v48, %v1329_v39 }
 0x14e   :  { %v1393_v43 = vadd.f32 %v1377_v38, %v1345_v41  ;;  %v1232_v44 = vpop.f32.mrf.mxu2  ;;  %v1137_v50 = vpop.f32.mrf.mxu0 }
 0x14f   :  { %v1281_v55 = vpop.f32.mrf.mxu3  ;;  %v1233_v46 = vadd.f32 %v1232_v44, %v1184_v42  ;;  %v1186_v51 = vpop.f32.mrf.mxu1  ;;  %v1138_v52 = vadd.f32 %v1137_v50, %v2596_v14  ;;  %v1366_v42 = vld [vmem:[%s2835_s3 + $0x48] sm:$0xff] }
 0x150   :  { %1409 = vst [vmem:[%s2836_s4 + $0x20] sm:$0xff] %v1393_v43 }
 0x151   :  { %v1282_v5 = vadd.f32 %v1281_v55, %v1233_v46  ;;  %v1187_v56 = vadd.f32 %v1186_v51, %v1138_v52  ;;  %v1382_v46 = vmul.f32 -1.0, %v1366_v42 }
 0x153   :  { %vm1314_vm5 = vcmp.ge.f32.partialorder %v1282_v5, 0.0  ;;  %v1330_v53 = vmul.f32 0.25, %v1282_v5 }
 0x155   :  { %v1346_v54 = vsel %vm1314_vm5, %v1282_v5, %v1330_v53 }
 0x156   :  { %v1394_v57 = vadd.f32 %v1378_v11, %v1346_v54  ;;  %v1235_v58 = vpop.f32.mrf.mxu2  ;;  %v1139_v62 = vpop.f32.mrf.mxu0  ;;  %v1367_v54 = vld [vmem:[%s2835_s3 + $0x50] sm:$0xff] }
 0x157   :  { %v1284_v59 = vpop.f32.mrf.mxu3  ;;  %v1236_v60 = vadd.f32 %v1235_v58, %v1187_v56  ;;  %v1188_v63 = vpop.f32.mrf.mxu1  ;;  %v1140_v0 = vadd.f32 %v1139_v62, %v2623_v36 }
 0x158   :  { %1410 = vst [vmem:[%s2836_s4 + $0x28] sm:$0xff] %v1394_v57 }
 0x159   :  { %v1285_v14 = vadd.f32 %v1284_v59, %v1236_v60  ;;  %v1189_v4 = vadd.f32 %v1188_v63, %v1140_v0  ;;  %v1383_v59 = vmul.f32 -1.0, %v1367_v54 }
 0x15b   :  { %vm1315_vm6 = vcmp.ge.f32.partialorder %v1285_v14, 0.0  ;;  %v1331_v19 = vmul.f32 0.25, %v1285_v14 }
 0x15d   :  { %v1347_v2 = vsel %vm1315_vm6, %v1285_v14, %v1331_v19  ;;  %v1368_v19 = vld [vmem:[%s2835_s3 + $0x58] sm:$0xff] }
 0x15e   :  { %v1395_v6 = vadd.f32 %v1379_v1, %v1347_v2  ;;  %v1237_v8 = vpop.f32.mrf.mxu2  ;;  %v1142_v15 = vpop.f32.mrf.mxu0 }
 0x15f   :  { %v1286_v9 = vpop.f32.mrf.mxu3  ;;  %v1238_v10 = vadd.f32 %v1237_v8, %v1189_v4  ;;  %v1191_v16 = vpop.f32.mrf.mxu1  ;;  %v1143_v17 = vadd.f32 %v1142_v15, %v2626_v45  ;;  %v1384_v8 = vmul.f32 -1.0, %v1368_v19 }
 0x160   :  { %1411 = vst [vmem:[%s2836_s4 + $0x30] sm:$0xff] %v1395_v6 }
 0x161   :  { %v1287_v36 = vadd.f32 %v1286_v9, %v1238_v10  ;;  %v1192_v22 = vadd.f32 %v1191_v16, %v1143_v17 }
 0x163   :  { %vm1316_vm7 = vcmp.ge.f32.partialorder %v1287_v36, 0.0  ;;  %v1332_v21 = vmul.f32 0.25, %v1287_v36 }
 0x165   :  { %v1348_v40 = vsel %vm1316_vm7, %v1287_v36, %v1332_v21 }
 0x166   :  { %v1396_v23 = vadd.f32 %v1380_v20, %v1348_v40  ;;  %v1240_v24 = vpop.f32.mrf.mxu2  ;;  %v1144_v29 = vpop.f32.mrf.mxu0  ;;  %v1369_v20 = vld [vmem:[%s2835_s3 + $0x60] sm:$0xff] }
 0x167   :  { %v1289_v25 = vpop.f32.mrf.mxu3  ;;  %v1241_v27 = vadd.f32 %v1240_v24, %v1192_v22  ;;  %v1193_v30 = vpop.f32.mrf.mxu1  ;;  %v1145_v31 = vadd.f32 %v1144_v29, %v2653_v3 }
 0x168   :  { %1412 = vst [vmem:[%s2836_s4 + $0x38] sm:$0xff] %v1396_v23  ;;  %v1385_v23 = vmul.f32 -1.0, %v1369_v20 }
 0x169   :  { %v1290_v45 = vadd.f32 %v1289_v25, %v1241_v27  ;;  %v1194_v48 = vadd.f32 %v1193_v30, %v1145_v31  ;;  %v1370_v31 = vld [vmem:[%s2835_s3 + $0x68] sm:$0xff] }
 0x16b   :  { %vm1317_vm8 = vcmp.ge.f32.partialorder %v1290_v45, 0.0  ;;  %v1333_v33 = vmul.f32 0.25, %v1290_v45 }
 0x16d   :  { %v1349_v34 = vsel %vm1317_vm8, %v1290_v45, %v1333_v33 }
 0x16e   :  { %v1397_v35 = vadd.f32 %v1381_v32, %v1349_v34  ;;  %v1242_v38 = vpop.f32.mrf.mxu2  ;;  %v1147_v43 = vpop.f32.mrf.mxu0  ;;  %v1386_v34 = vmul.f32 -1.0, %v1370_v31 }
 0x16f   :  { %v1291_v39 = vpop.f32.mrf.mxu3  ;;  %v1243_v41 = vadd.f32 %v1242_v38, %v1194_v48  ;;  %v1196_v44 = vpop.f32.mrf.mxu1  ;;  %v1148_v55 = vadd.f32 %v1147_v43, %v2656_v13 }
 0x170   :  { %1413 = vst [vmem:[%s2836_s4 + $0x40] sm:$0xff] %v1397_v35 }
 0x171   :  { %v1292_v3 = vadd.f32 %v1291_v39, %v1243_v41  ;;  %v1197_v51 = vadd.f32 %v1196_v44, %v1148_v55 }
 0x173   :  { %vm1318_vm9 = vcmp.ge.f32.partialorder %v1292_v3, 0.0  ;;  %v1334_v49 = vmul.f32 0.25, %v1292_v3 }
 0x175   :  { %v1350_v50 = vsel %vm1318_vm9, %v1292_v3, %v1334_v49  ;;  %v1371_v3 = vld [vmem:[%s2835_s3 + $0x70] sm:$0xff] }
 0x176   :  { %v1398_v5 = vadd.f32 %v1382_v46, %v1350_v50  ;;  %v1245_v52 = vpop.f32.mrf.mxu2  ;;  %v1149_v56 = vpop.f32.mrf.mxu0  ;;  %v1387_v49 = vmul.f32 -1.0, %v1371_v3 }
 0x177   :  { %v1294_v11 = vpop.f32.mrf.mxu3  ;;  %v1246_v53 = vadd.f32 %v1245_v52, %v1197_v51  ;;  %v1198_v57 = vpop.f32.mrf.mxu1  ;;  %v1150_v58 = vadd.f32 %v1149_v56, %v2683_v37  ;;  %v1372_v56 = vld [vmem:[%s2835_s3 + $0x78] sm:$0xff] }
 0x178   :  { %1414 = vst [vmem:[%s2836_s4 + $0x48] sm:$0xff] %v1398_v5 }
 0x179   :  { %v1295_v13 = vadd.f32 %v1294_v11, %v1246_v53  ;;  %v1199_v62 = vadd.f32 %v1198_v57, %v1150_v58 }
 0x17b   :  { %vm1319_vm10 = vcmp.ge.f32.partialorder %v1295_v13, 0.0  ;;  %v1335_v60 = vmul.f32 0.25, %v1295_v13 }
 0x17d   :  { %v1351_v61 = vsel %vm1319_vm10, %v1295_v13, %v1335_v60 }
 0x17e   :  { %v1399_v63 = vadd.f32 %v1383_v59, %v1351_v61  ;;  %v1247_v14 = vpop.f32.mrf.mxu2  ;;  %v1152_v2 = vpop.f32.mrf.mxu0 }
 0x17f   :  { %v1296_v0 = vpop.f32.mrf.mxu3  ;;  %v1248_v1 = vadd.f32 %v1247_v14, %v1199_v62  ;;  %v1201_v4 = vpop.f32.mrf.mxu1  ;;  %v1153_v6 = vadd.f32 %v1152_v2, %v2686_v47 }
 0x180   :  { %1415 = vst [vmem:[%s2836_s4 + $0x50] sm:$0xff] %v1399_v63 }
 0x181   :  { %v1297_v37 = vadd.f32 %v1296_v0, %v1248_v1  ;;  %v1202_v12 = vadd.f32 %v1201_v4, %v1153_v6 }
 0x183   :  { %vm1320_vm11 = vcmp.ge.f32.partialorder %v1297_v37, 0.0  ;;  %v1336_v9 = vmul.f32 0.25, %v1297_v37 }
 0x185   :  { %v1352_v10 = vsel %vm1320_vm11, %v1297_v37, %v1336_v9 }
 0x186   :  { %v1400_v15 = vadd.f32 %v1384_v8, %v1352_v10  ;;  %v1250_v16 = vpop.f32.mrf.mxu2  ;;  %v1154_v21 = vpop.f32.mrf.mxu0 }
 0x187   :  { %v1299_v36 = vpop.f32.mrf.mxu3  ;;  %v1251_v17 = vadd.f32 %v1250_v16, %v1202_v12  ;;  %v1203_v40 = vpop.f32.mrf.mxu1  ;;  %v1155_v22 = vadd.f32 %v1154_v21, %v2713_v7 }
 0x188   :  { %1416 = vst [vmem:[%s2836_s4 + $0x58] sm:$0xff] %v1400_v15 }
 0x189   :  { %v1300_v47 = vadd.f32 %v1299_v36, %v1251_v17  ;;  %v1204_v27 = vadd.f32 %v1203_v40, %v1155_v22 }
 0x18b   :  { %vm1321_vm12 = vcmp.ge.f32.partialorder %v1300_v47, 0.0  ;;  %v1337_v24 = vmul.f32 0.25, %v1300_v47 }
 0x18d   :  { %v1353_v25 = vsel %vm1321_vm12, %v1300_v47, %v1337_v24 }
 0x18e   :  { %v1401_v28 = vadd.f32 %v1385_v23, %v1353_v25  ;;  %v1252_v29 = vpop.f32.mrf.mxu2  ;;  %v1157_v32 = vpop.f32.mrf.mxu0 }
 0x18f   :  { %v1301_v30 = vpop.f32.mrf.mxu3  ;;  %v1253_v45 = vadd.f32 %v1252_v29, %v1204_v27  ;;  %v1158_v7 = vadd.f32 %v1157_v32, %v2716_v18  ;;  %v1206_v48 = vpop.f32.mrf.mxu1 }
 0x190   :  { %1417 = vst [vmem:[%s2836_s4 + $0x60] sm:$0xff] %v1401_v28 }
 0x191   :  { %v1302_v33 = vadd.f32 %v1301_v30, %v1253_v45  ;;  %v1207_v39 = vadd.f32 %v1206_v48, %v1158_v7 }
 0x193   :  { %vm1322_vm13 = vcmp.ge.f32.partialorder %v1302_v33, 0.0  ;;  %v1338_v35 = vmul.f32 0.25, %v1302_v33 }
 0x195   :  { %v1354_v38 = vsel %vm1322_vm13, %v1302_v33, %v1338_v35 }
 0x196   :  { %v1402_v41 = vadd.f32 %v1386_v34, %v1354_v38  ;;  %v1255_v42 = vpop.f32.mrf.mxu2  ;;  %v1159_v55 = vpop.f32.mrf.mxu0 }
 0x197   :  { %v1304_v43 = vpop.f32.mrf.mxu3  ;;  %v1256_v44 = vadd.f32 %v1255_v42, %v1207_v39  ;;  %v1160_v46 = vadd.f32 %v1159_v55, %v2718_v26  ;;  %v1208_v51 = vpop.f32.mrf.mxu1  ;;  %v1388_v26 = vmul.f32 -1.0, %v1372_v56 }
 0x198   :  { %1418 = vst [vmem:[%s2836_s4 + $0x68] sm:$0xff] %v1402_v41 }
 0x199   :  { %v1305_v18 = vadd.f32 %v1304_v43, %v1256_v44  ;;  %v1209_v52 = vadd.f32 %v1208_v51, %v1160_v46 }
 0x19b   :  { %vm1323_vm14 = vcmp.ge.f32.partialorder %v1305_v18, 0.0  ;;  %v1339_v50 = vmul.f32 0.25, %v1305_v18 }
 0x19d   :  { %v1355_v5 = vsel %vm1323_vm14, %v1305_v18, %v1339_v50 }
 0x19e   :  { %v1403_v11 = vadd.f32 %v1387_v49, %v1355_v5  ;;  %v1257_v53 = vpop.f32.mrf.mxu2 }
 0x19f   :  { %v1258_v54 = vadd.f32 %v1257_v53, %v1209_v52  ;;  %v1306_v57 = vpop.f32.mrf.mxu3 }
 0x1a0   :  { %1419 = vst [vmem:[%s2836_s4 + $0x70] sm:$0xff] %v1403_v11 }
 0x1a1   :  { %v1307_v13 = vadd.f32 %v1306_v57, %v1258_v54 }
 0x1a3   :  { %vm1324_vm15 = vcmp.ge.f32.partialorder %v1307_v13, 0.0  ;;  %v1340_v58 = vmul.f32 0.25, %v1307_v13 }
 0x1a5   :  { %v1356_v59 = vsel %vm1324_vm15, %v1307_v13, %v1340_v58 }
 0x1a6   :  { %v1404_v60 = vadd.f32 %v1388_v26, %v1356_v59 }
 0x1a8   :  { %1420 = vst [vmem:[%s2836_s4 + $0x78] sm:$0xff] %v1404_v60 }

// kernel: _lambda_.17
= control target key start
LH: loop header
LB: loop body
LE: loop exit
PB: predicated region body
PF: predicated region fallthrough
CT: control target
= control target key end

     0   :  { %s2728_s1 = inlined_call_operand.vmem [shape: bf16[1024,128], index: 1, kind: input, shape index: {}]   ;;  %s2729_s2 = inlined_call_operand.vmem [shape: f32[1,128], index: 2, kind: input, shape index: {}]   ;;  %s2730_s0 = inlined_call_operand.vmem [shape: bf16[128,1024], index: 0, kind: input, shape index: {}]   ;;  %s2731_s3 = inlined_call_operand.vmem [shape: f32[128,128], index: 3, kind: output, shape index: {}]  }
   0x1   :  { %v1957_v0 = vld [vmem:[%s2728_s1 + $0x38] sm:$0xff]  ;;  %v1956_v4 = vld [vmem:[%s2728_s1 + $0x30] sm:$0xff]  ;;  %v1955_v8 = vld [vmem:[%s2728_s1 + $0x28] sm:$0xff] }
   0x2   :  { %v1965_v1 = vld [vmem:[%s2728_s1 + $0x78] sm:$0xff]  ;;  %914 = vmatpush.bf16.msra.mxu0 %v1957_v0  ;;  %v1964_v5 = vld [vmem:[%s2728_s1 + $0x70] sm:$0xff]  ;;  %v1963_v9 = vld [vmem:[%s2728_s1 + $0x68] sm:$0xff] }
   0x3   :  { %v1973_v2 = vld [vmem:[%s2728_s1 + $0xb8] sm:$0xff]  ;;  %963 = vmatpush.bf16.msra.mxu1 %v1965_v1  ;;  %v1972_v6 = vld [vmem:[%s2728_s1 + $0xb0] sm:$0xff]  ;;  %v1971_v10 = vld [vmem:[%s2728_s1 + $0xa8] sm:$0xff] }
   0x4   :  { %v1981_v3 = vld [vmem:[%s2728_s1 + $0xf8] sm:$0xff]  ;;  %1012 = vmatpush.bf16.msra.mxu2 %v1973_v2  ;;  %v1980_v7 = vld [vmem:[%s2728_s1 + $0xf0] sm:$0xff]  ;;  %v1979_v11 = vld [vmem:[%s2728_s1 + $0xe8] sm:$0xff] }
   0x5   :  { %1061 = vmatpush.bf16.msra.mxu3 %v1981_v3  ;;  %v1954_v12 = vld [vmem:[%s2728_s1 + $0x20] sm:$0xff]  ;;  %v1953_v16 = vld [vmem:[%s2728_s1 + $0x18] sm:$0xff]  ;;  %v1952_v20 = vld [vmem:[%s2728_s1 + $0x10] sm:$0xff] }
   0x6   :  { %915 = vmatpush.bf16.msra.mxu0 %v1956_v4  ;;  %v1962_v13 = vld [vmem:[%s2728_s1 + $0x60] sm:$0xff]  ;;  %v1961_v17 = vld [vmem:[%s2728_s1 + $0x58] sm:$0xff]  ;;  %v1960_v21 = vld [vmem:[%s2728_s1 + $0x50] sm:$0xff] }
   0x7   :  { %964 = vmatpush.bf16.msra.mxu1 %v1964_v5  ;;  %v1970_v14 = vld [vmem:[%s2728_s1 + $0xa0] sm:$0xff]  ;;  %v1969_v18 = vld [vmem:[%s2728_s1 + $0x98] sm:$0xff]  ;;  %v1968_v22 = vld [vmem:[%s2728_s1 + $0x90] sm:$0xff] }
   0x8   :  { %1013 = vmatpush.bf16.msra.mxu2 %v1972_v6  ;;  %v1978_v15 = vld [vmem:[%s2728_s1 + $0xe0] sm:$0xff]  ;;  %v1977_v19 = vld [vmem:[%s2728_s1 + $0xd8] sm:$0xff]  ;;  %v1976_v23 = vld [vmem:[%s2728_s1 + $0xd0] sm:$0xff] }
   0x9   :  { %1062 = vmatpush.bf16.msra.mxu3 %v1980_v7  ;;  %v1951_v24 = vld [vmem:[%s2728_s1 + $0x8] sm:$0xff]  ;;  %v1950_v28 = vld [vmem:[%s2728_s1] sm:$0xff]  ;;  %v2005_v40 = vld [vmem:[%s2728_s1 + $0x1b8] sm:$0xff] }
   0xa   :  { %916 = vmatpush.bf16.msra.mxu0 %v1955_v8  ;;  %v1959_v25 = vld [vmem:[%s2728_s1 + $0x48] sm:$0xff]  ;;  %v1958_v29 = vld [vmem:[%s2728_s1 + $0x40] sm:$0xff]  ;;  %v1989_v41 = vld [vmem:[%s2728_s1 + $0x138] sm:$0xff] }
   0xb   :  { %965 = vmatpush.bf16.msra.mxu1 %v1963_v9  ;;  %v1967_v26 = vld [vmem:[%s2728_s1 + $0x88] sm:$0xff]  ;;  %v1966_v30 = vld [vmem:[%s2728_s1 + $0x80] sm:$0xff]  ;;  %v2013_v46 = vld [vmem:[%s2728_s1 + $0x1f8] sm:$0xff] }
   0xc   :  { %1014 = vmatpush.bf16.msra.mxu2 %v1971_v10  ;;  %v1975_v27 = vld [vmem:[%s2728_s1 + $0xc8] sm:$0xff]  ;;  %v1974_v31 = vld [vmem:[%s2728_s1 + $0xc0] sm:$0xff]  ;;  %v1997_v47 = vld [vmem:[%s2728_s1 + $0x178] sm:$0xff] }
   0xd   :  { %1063 = vmatpush.bf16.msra.mxu3 %v1979_v11  ;;  %v1376_v32 = vld [vmem:[%s2730_s0] sm:$0xf]  ;;  %v1886_v34 = vld [vmem:[%s2730_s0 + $0x4] sm:$0xf]  ;;  %v1384_v36 = vld [vmem:[%s2730_s0 + $0x8] sm:$0xf] }
   0xe   :  { %917 = vmatpush.bf16.msra.mxu0 %v1954_v12  ;;  %v1890_v33 = vld [vmem:[%s2730_s0 + $0x1c] sm:$0xf0]  ;;  %v1378_v35 = vld [vmem:[%s2730_s0 + $0x20] sm:$0xf0]  ;;  %v1891_v37 = vld [vmem:[%s2730_s0 + $0x24] sm:$0xf0] }
   0xf   :  { %966 = vmatpush.bf16.msra.mxu1 %v1962_v13  ;;  %v1887_v38 = vld [vmem:[%s2730_s0 + $0xc] sm:$0xf]  ;;  %v1377_v42 = vor.u32 %v1890_v33, %v1376_v32  ;;  %v1381_v43 = vor.u32 %v1886_v34, %v1378_v35  ;;  %v1385_v44 = vor.u32 %v1891_v37, %v1384_v36  ;;  %v2004_v48 = vld [vmem:[%s2728_s1 + $0x1b0] sm:$0xff]  ;;  %v1408_v56 = vld [vmem:[%s2730_s0 + $0x40] sm:$0xf] }
  0x10   :  { %1015 = vmatpush.bf16.msra.mxu2 %v1970_v14  ;;  %v1386_v39 = vld [vmem:[%s2730_s0 + $0x28] sm:$0xf0]  ;;  %v1988_v49 = vld [vmem:[%s2728_s1 + $0x130] sm:$0xff]  ;;  %v1898_v57 = vld [vmem:[%s2730_s0 + $0x5c] sm:$0xf0] }
  0x11   :  { %1064 = vmatpush.bf16.msra.mxu3 %v1978_v15  ;;  %v1389_v45 = vor.u32 %v1887_v38, %v1386_v39  ;;  %v2012_v50 = vld [vmem:[%s2728_s1 + $0x1f0] sm:$0xff]  ;;  %v2003_v52 = vld [vmem:[%s2728_s1 + $0x1a8] sm:$0xff]  ;;  %v1894_v58 = vld [vmem:[%s2730_s0 + $0x44] sm:$0xf]  ;;  %v1409_v0 = vor.u32 %v1898_v57, %v1408_v56 }
  0x12   :  { %918 = vmatpush.bf16.msra.mxu0 %v1953_v16  ;;  %v1996_v51 = vld [vmem:[%s2728_s1 + $0x170] sm:$0xff]  ;;  %v1987_v53 = vld [vmem:[%s2728_s1 + $0x128] sm:$0xff]  ;;  %v1410_v59 = vld [vmem:[%s2730_s0 + $0x60] sm:$0xf0] }
  0x13   :  { %967 = vmatpush.bf16.msra.mxu1 %v1961_v17  ;;  %v2011_v54 = vld [vmem:[%s2728_s1 + $0x1e8] sm:$0xff]  ;;  %v1413_v1 = vor.u32 %v1894_v58, %v1410_v59  ;;  %v2002_v4 = vld [vmem:[%s2728_s1 + $0x1a0] sm:$0xff]  ;;  %v2000_v36 = vld [vmem:[%s2728_s1 + $0x190] sm:$0xff] }
  0x14   :  { %1016 = vmatpush.bf16.msra.mxu2 %v1969_v18  ;;  %v1995_v55 = vld [vmem:[%s2728_s1 + $0x168] sm:$0xff]  ;;  %v1986_v5 = vld [vmem:[%s2728_s1 + $0x120] sm:$0xff]  ;;  %v1984_v37 = vld [vmem:[%s2728_s1 + $0x110] sm:$0xff] }
  0x15   :  { %1065 = vmatpush.bf16.msra.mxu3 %v1977_v19  ;;  %v1416_v60 = vld [vmem:[%s2730_s0 + $0x48] sm:$0xf]  ;;  %v1895_v62 = vld [vmem:[%s2730_s0 + $0x4c] sm:$0xf]  ;;  %v2010_v6 = vld [vmem:[%s2728_s1 + $0x1e0] sm:$0xff] }
  0x16   :  { %919 = vmatpush.bf16.msra.mxu0 %v1952_v20  ;;  %v1899_v61 = vld [vmem:[%s2730_s0 + $0x64] sm:$0xf0]  ;;  %v1418_v63 = vld [vmem:[%s2730_s0 + $0x68] sm:$0xf0]  ;;  %v1994_v7 = vld [vmem:[%s2728_s1 + $0x160] sm:$0xff] }
  0x17   :  { %968 = vmatpush.bf16.msra.mxu1 %v1960_v21  ;;  %v1417_v2 = vor.u32 %v1899_v61, %v1416_v60  ;;  %v1421_v3 = vor.u32 %v1895_v62, %v1418_v63  ;;  %v1440_v8 = vld [vmem:[%s2730_s0 + $0x80] sm:$0xf]  ;;  %v1902_v10 = vld [vmem:[%s2730_s0 + $0x84] sm:$0xf]  ;;  %v1448_v12 = vld [vmem:[%s2730_s0 + $0x88] sm:$0xf] }
  0x18   :  { %1017 = vmatpush.bf16.msra.mxu2 %v1968_v22  ;;  %v1906_v9 = vld [vmem:[%s2730_s0 + $0x9c] sm:$0xf0]  ;;  %v1442_v11 = vld [vmem:[%s2730_s0 + $0xa0] sm:$0xf0]  ;;  %v1907_v13 = vld [vmem:[%s2730_s0 + $0xa4] sm:$0xf0] }
  0x19   :  { %1066 = vmatpush.bf16.msra.mxu3 %v1976_v23  ;;  %v1903_v14 = vld [vmem:[%s2730_s0 + $0x8c] sm:$0xf]  ;;  %v1441_v16 = vor.u32 %v1906_v9, %v1440_v8  ;;  %v1445_v17 = vor.u32 %v1902_v10, %v1442_v11  ;;  %v1449_v18 = vor.u32 %v1907_v13, %v1448_v12  ;;  %v2001_v20 = vld [vmem:[%s2728_s1 + $0x198] sm:$0xff]  ;;  %v2008_v38 = vld [vmem:[%s2728_s1 + $0x1d0] sm:$0xff] }
  0x1a   :  { %920 = vmatpush.bf16.msra.mxu0 %v1951_v24  ;;  %v1450_v15 = vld [vmem:[%s2730_s0 + $0xa8] sm:$0xf0]  ;;  %v1985_v21 = vld [vmem:[%s2728_s1 + $0x118] sm:$0xff]  ;;  %v1472_v24 = vld [vmem:[%s2730_s0 + $0xc0] sm:$0xf] }
  0x1b   :  { %969 = vmatpush.bf16.msra.mxu1 %v1959_v25  ;;  %v1453_v19 = vor.u32 %v1903_v14, %v1450_v15  ;;  %v2009_v22 = vld [vmem:[%s2728_s1 + $0x1d8] sm:$0xff]  ;;  %v1914_v25 = vld [vmem:[%s2730_s0 + $0xdc] sm:$0xf0]  ;;  %v1992_v39 = vld [vmem:[%s2728_s1 + $0x150] sm:$0xff] }
  0x1c   :  { %1018 = vmatpush.bf16.msra.mxu2 %v1967_v26  ;;  %v1993_v23 = vld [vmem:[%s2728_s1 + $0x158] sm:$0xff]  ;;  %v1910_v26 = vld [vmem:[%s2730_s0 + $0xc4] sm:$0xf]  ;;  %v1473_v32 = vor.u32 %v1914_v25, %v1472_v24  ;;  %v1536_v56 = vld [vmem:[%s2730_s0 + $0x140] sm:$0xf] }
  0x1d   :  { %1067 = vmatpush.bf16.msra.mxu3 %v1975_v27  ;;  %v1474_v27 = vld [vmem:[%s2730_s0 + $0xe0] sm:$0xf0]  ;;  %v1930_v57 = vld [vmem:[%s2730_s0 + $0x15c] sm:$0xf0]  ;;  %v1544_v60 = vld [vmem:[%s2730_s0 + $0x148] sm:$0xf] }
  0x1e   :  { %921 = vmatpush.bf16.msra.mxu0 %v1950_v28  ;;  %v1480_v28 = vld [vmem:[%s2730_s0 + $0xc8] sm:$0xf]  ;;  %v1477_v33 = vor.u32 %v1910_v26, %v1474_v27  ;;  %v1926_v58 = vld [vmem:[%s2730_s0 + $0x144] sm:$0xf]  ;;  %v1927_v62 = vld [vmem:[%s2730_s0 + $0x14c] sm:$0xf] }
  0x1f   :  { %970 = vmatpush.bf16.msra.mxu1 %v1958_v29  ;;  %v1915_v29 = vld [vmem:[%s2730_s0 + $0xe4] sm:$0xf0]  ;;  %v1538_v59 = vld [vmem:[%s2730_s0 + $0x160] sm:$0xf0]  ;;  %v1546_v63 = vld [vmem:[%s2730_s0 + $0x168] sm:$0xf0] }
  0x20   :  { %1019 = vmatpush.bf16.msra.mxu2 %v1966_v30  ;;  %v1911_v30 = vld [vmem:[%s2730_s0 + $0xcc] sm:$0xf]  ;;  %v1481_v34 = vor.u32 %v1915_v29, %v1480_v28  ;;  %v1931_v61 = vld [vmem:[%s2730_s0 + $0x164] sm:$0xf0]  ;;  %v1568_v8 = vld [vmem:[%s2730_s0 + $0x180] sm:$0xf] }
  0x21   :  { %1068 = vmatpush.bf16.msra.mxu3 %v1974_v31  ;;  %922 = vmatmul.bf16.vlgmr.msra.gmra.mxu0 %v1377_v42  ;;  %v1482_v31 = vld [vmem:[%s2730_s0 + $0xe8] sm:$0xf0]  ;;  %v1918_v42 = vld [vmem:[%s2730_s0 + $0x104] sm:$0xf]  ;;  %v1938_v9 = vld [vmem:[%s2730_s0 + $0x19c] sm:$0xf0] }
  0x22   :  { %1110 = vmatpush.bf16.msrb.mxu0 %v1989_v41  ;;  %971 = vmatmul.bf16.vlgmr.msra.gmra.mxu1 %v1381_v43  ;;  %v1485_v35 = vor.u32 %v1911_v30, %v1482_v31  ;;  %v1922_v41 = vld [vmem:[%s2730_s0 + $0x11c] sm:$0xf0]  ;;  %v1506_v43 = vld [vmem:[%s2730_s0 + $0x120] sm:$0xf0]  ;;  %v1576_v12 = vld [vmem:[%s2730_s0 + $0x188] sm:$0xf] }
  0x23   :  { %1020 = vmatmul.bf16.vlgmr.msra.gmra.mxu2 %v1385_v44  ;;  %1159 = vmatpush.bf16.msrb.mxu1 %v1997_v47  ;;  %v1512_v44 = vld [vmem:[%s2730_s0 + $0x108] sm:$0xf]  ;;  %v1514_v47 = vld [vmem:[%s2730_s0 + $0x128] sm:$0xf0]  ;;  %v1934_v10 = vld [vmem:[%s2730_s0 + $0x184] sm:$0xf] }
  0x24   :  { %1208 = vmatpush.bf16.msrb.mxu2 %v2005_v40  ;;  %1069 = vmatmul.bf16.vlgmr.msra.gmra.mxu3 %v1389_v45  ;;  %v1504_v40 = vld [vmem:[%s2730_s0 + $0x100] sm:$0xf]  ;;  %v1923_v45 = vld [vmem:[%s2730_s0 + $0x124] sm:$0xf0]  ;;  %v1570_v11 = vld [vmem:[%s2730_s0 + $0x1a0] sm:$0xf0] }
  0x25   :  { %1257 = vmatpush.bf16.msrb.mxu3 %v2013_v46  ;;  %v1919_v46 = vld [vmem:[%s2730_s0 + $0x10c] sm:$0xf]  ;;  %v1939_v13 = vld [vmem:[%s2730_s0 + $0x1a4] sm:$0xf0] }
  0x26   :  { %1111 = vmatpush.bf16.msrb.mxu0 %v1988_v49  ;;  %v1509_v49 = vor.u32 %v1918_v42, %v1506_v43  ;;  %v1935_v14 = vld [vmem:[%s2730_s0 + $0x18c] sm:$0xf]  ;;  %v1608_v24 = vld [vmem:[%s2730_s0 + $0x1c8] sm:$0xf] }
  0x27   :  { %1160 = vmatpush.bf16.msrb.mxu1 %v1996_v51  ;;  %v1517_v51 = vor.u32 %v1919_v46, %v1514_v47  ;;  %v1578_v15 = vld [vmem:[%s2730_s0 + $0x1a8] sm:$0xf0]  ;;  %v1947_v25 = vld [vmem:[%s2730_s0 + $0x1e4] sm:$0xf0] }
  0x28   :  { %1209 = vmatpush.bf16.msrb.mxu2 %v2004_v48  ;;  %v1505_v48 = vor.u32 %v1922_v41, %v1504_v40  ;;  %v1943_v26 = vld [vmem:[%s2730_s0 + $0x1cc] sm:$0xf]  ;;  %v1609_v30 = vor.u32 %v1947_v25, %v1608_v24  ;;  %v1402_v40 = vld [vmem:[%s2730_s0 + $0x38] sm:$0xf0]  ;;  %v1458_v24 = vld [vmem:[%s2730_s0 + $0xb0] sm:$0xf0] }
  0x29   :  { %1258 = vmatpush.bf16.msrb.mxu3 %v2012_v50  ;;  %v1513_v50 = vor.u32 %v1923_v45, %v1512_v44  ;;  %v1610_v27 = vld [vmem:[%s2730_s0 + $0x1e8] sm:$0xf0]  ;;  %v1464_v25 = vld [vmem:[%s2730_s0 + $0x98] sm:$0xf] }
  0x2a   :  { %1112 = vmatpush.bf16.msrb.mxu0 %v1987_v53  ;;  %v1983_v53 = vld [vmem:[%s2728_s1 + $0x108] sm:$0xff]  ;;  %v1613_v31 = vor.u32 %v1943_v26, %v1610_v27  ;;  %v1909_v26 = vld [vmem:[%s2730_s0 + $0xb4] sm:$0xf0]  ;;  %v1905_v27 = vld [vmem:[%s2730_s0 + $0x9c] sm:$0xf] }
  0x2b   :  { %1161 = vmatpush.bf16.msrb.mxu1 %v1995_v55  ;;  %v1991_v55 = vld [vmem:[%s2728_s1 + $0x148] sm:$0xff] }
  0x2c   :  { %1210 = vmatpush.bf16.msrb.mxu2 %v2003_v52  ;;  %v1999_v52 = vld [vmem:[%s2728_s1 + $0x188] sm:$0xff] }
  0x2d   :  { %1259 = vmatpush.bf16.msrb.mxu3 %v2011_v54  ;;  %v2007_v54 = vld [vmem:[%s2728_s1 + $0x1c8] sm:$0xff] }
  0x2e   :  { %1113 = vmatpush.bf16.msrb.mxu0 %v1986_v5  ;;  %v1982_v5 = vld [vmem:[%s2728_s1 + $0x100] sm:$0xff] }
  0x2f   :  { %1162 = vmatpush.bf16.msrb.mxu1 %v1994_v7  ;;  %v1990_v7 = vld [vmem:[%s2728_s1 + $0x140] sm:$0xff] }
  0x30   :  { %1211 = vmatpush.bf16.msrb.mxu2 %v2002_v4  ;;  %v1998_v4 = vld [vmem:[%s2728_s1 + $0x180] sm:$0xff] }
  0x31   :  { %927 = vmatmul.bf16.gmra.mxu0 %v1409_v0  ;;  %1260 = vmatpush.bf16.msrb.mxu3 %v2010_v6  ;;  %v1537_v0 = vor.u32 %v1930_v57, %v1536_v56  ;;  %v2006_v6 = vld [vmem:[%s2728_s1 + $0x1c0] sm:$0xff]  ;;  %v1424_v57 = vld [vmem:[%s2730_s0 + $0x50] sm:$0xf] }
  0x32   :  { %976 = vmatmul.bf16.gmra.mxu1 %v1413_v1  ;;  %1114 = vmatpush.bf16.msrb.mxu0 %v1985_v21  ;;  %v1541_v1 = vor.u32 %v1926_v58, %v1538_v59  ;;  %v1946_v21 = vld [vmem:[%s2730_s0 + $0x1dc] sm:$0xf0]  ;;  %v1900_v58 = vld [vmem:[%s2730_s0 + $0x6c] sm:$0xf0]  ;;  %v1896_v59 = vld [vmem:[%s2730_s0 + $0x54] sm:$0xf] }
  0x33   :  { %1025 = vmatmul.bf16.gmra.mxu2 %v1417_v2  ;;  %1163 = vmatpush.bf16.msrb.mxu1 %v1993_v23  ;;  %v1545_v2 = vor.u32 %v1931_v61, %v1544_v60  ;;  %v1602_v23 = vld [vmem:[%s2730_s0 + $0x1e0] sm:$0xf0]  ;;  %v1426_v60 = vld [vmem:[%s2730_s0 + $0x70] sm:$0xf0]  ;;  %v1432_v61 = vld [vmem:[%s2730_s0 + $0x58] sm:$0xf] }
  0x34   :  { %1074 = vmatmul.bf16.gmra.mxu3 %v1421_v3  ;;  %1212 = vmatpush.bf16.msrb.mxu2 %v2001_v20  ;;  %v1549_v3 = vor.u32 %v1927_v62, %v1546_v63  ;;  %v1600_v20 = vld [vmem:[%s2730_s0 + $0x1c0] sm:$0xf]  ;;  %v1901_v62 = vld [vmem:[%s2730_s0 + $0x74] sm:$0xf0]  ;;  %v1897_v63 = vld [vmem:[%s2730_s0 + $0x5c] sm:$0xf] }
  0x35   :  { %1261 = vmatpush.bf16.msrb.mxu3 %v2009_v22  ;;  %v1942_v22 = vld [vmem:[%s2730_s0 + $0x1c4] sm:$0xf]  ;;  %v1601_v28 = vor.u32 %v1946_v21, %v1600_v20  ;;  %v1456_v21 = vld [vmem:[%s2730_s0 + $0x90] sm:$0xf] }
  0x36   :  { %1115 = vmatpush.bf16.msrb.mxu0 %v1984_v37  ;;  %v1605_v29 = vor.u32 %v1942_v22, %v1602_v23  ;;  %v1400_v37 = vld [vmem:[%s2730_s0 + $0x18] sm:$0xf]  ;;  %v1908_v22 = vld [vmem:[%s2730_s0 + $0xac] sm:$0xf0]  ;;  %v1904_v23 = vld [vmem:[%s2730_s0 + $0x94] sm:$0xf] }
  0x37   :  { %1164 = vmatpush.bf16.msrb.mxu1 %v1992_v39  ;;  %v1889_v39 = vld [vmem:[%s2730_s0 + $0x1c] sm:$0xf] }
  0x38   :  { %1213 = vmatpush.bf16.msrb.mxu2 %v2000_v36  ;;  %v1394_v36 = vld [vmem:[%s2730_s0 + $0x30] sm:$0xf0]  ;;  %v1405_v46 = vor.u32 %v1889_v39, %v1402_v40 }
  0x39   :  { %1262 = vmatpush.bf16.msrb.mxu3 %v2008_v38  ;;  %v1893_v38 = vld [vmem:[%s2730_s0 + $0x34] sm:$0xf0] }
  0x3a   :  { %1116 = vmatpush.bf16.msrb.mxu0 %v1983_v53  ;;  %v1401_v45 = vor.u32 %v1893_v38, %v1400_v37  ;;  %v1465_v37 = vor.u32 %v1909_v26, %v1464_v25 }
  0x3b   :  { %1165 = vmatpush.bf16.msrb.mxu1 %v1991_v55 }
  0x3c   :  { %1214 = vmatpush.bf16.msrb.mxu2 %v1999_v52 }
  0x3d   :  { %1263 = vmatpush.bf16.msrb.mxu3 %v2007_v54 }
  0x3e   :  { %1117 = vmatpush.bf16.msrb.mxu0 %v1982_v5 }
  0x3f   :  { %1166 = vmatpush.bf16.msrb.mxu1 %v1990_v7 }
  0x40   :  { %1215 = vmatpush.bf16.msrb.mxu2 %v1998_v4  ;;  %v1429_v4 = vor.u32 %v1896_v59, %v1426_v60 }
  0x41   :  { %932 = vmatmul.bf16.gmra.mxu0 %v1441_v16  ;;  %1264 = vmatpush.bf16.msrb.mxu3 %v2006_v6  ;;  %v1569_v16 = vor.u32 %v1938_v9, %v1568_v8  ;;  %v1433_v8 = vor.u32 %v1901_v62, %v1432_v61 }
  0x42   :  { %981 = vmatmul.bf16.gmra.mxu1 %v1445_v17  ;;  %v1573_v17 = vor.u32 %v1934_v10, %v1570_v11 }
  0x43   :  { %1030 = vmatmul.bf16.gmra.mxu2 %v1449_v18  ;;  %v1577_v18 = vor.u32 %v1939_v13, %v1576_v12 }
  0x44   :  { %1079 = vmatmul.bf16.gmra.mxu3 %v1453_v19  ;;  %v1581_v19 = vor.u32 %v1935_v14, %v1578_v15 }
  0x51   :  { %937 = vmatmul.bf16.gmra.mxu0 %v1473_v32  ;;  %v2422_v32 = vld [vmem:[%s2729_s2] ss:$0 sm:$0xff] }
  0x52   :  { %986 = vmatmul.bf16.gmra.mxu1 %v1477_v33  ;;  %v1392_v33 = vld [vmem:[%s2730_s0 + $0x10] sm:$0xf] }
  0x53   :  { %1035 = vmatmul.bf16.gmra.mxu2 %v1481_v34  ;;  %v1892_v34 = vld [vmem:[%s2730_s0 + $0x2c] sm:$0xf0] }
  0x54   :  { %1084 = vmatmul.bf16.gmra.mxu3 %v1485_v35  ;;  %v1888_v35 = vld [vmem:[%s2730_s0 + $0x14] sm:$0xf]  ;;  %v1393_v41 = vor.u32 %v1892_v34, %v1392_v33  ;;  %v1461_v33 = vor.u32 %v1904_v23, %v1458_v24  ;;  %v1921_v23 = vld [vmem:[%s2730_s0 + $0x11c] sm:$0xf] }
  0x55   :  { %v1397_v42 = vor.u32 %v1888_v35, %v1394_v36  ;;  %v1530_v24 = vld [vmem:[%s2730_s0 + $0x138] sm:$0xf0] }
  0x61   :  { %942 = vmatmul.bf16.gmra.mxu0 %v1505_v48 }
  0x62   :  { %991 = vmatmul.bf16.gmra.mxu1 %v1509_v49 }
  0x63   :  { %1040 = vmatmul.bf16.gmra.mxu2 %v1513_v50 }
  0x64   :  { %1089 = vmatmul.bf16.gmra.mxu3 %v1517_v51 }
  0x71   :  { %947 = vmatmul.bf16.gmra.mxu0 %v1537_v0  ;;  %v1434_v0 = vld [vmem:[%s2730_s0 + $0x78] sm:$0xf0] }
  0x72   :  { %996 = vmatmul.bf16.gmra.mxu1 %v1541_v1  ;;  %v1437_v9 = vor.u32 %v1897_v63, %v1434_v0 }
  0x73   :  { %1045 = vmatmul.bf16.gmra.mxu2 %v1545_v2 }
  0x74   :  { %1094 = vmatmul.bf16.gmra.mxu3 %v1549_v3  ;;  %v1425_v3 = vor.u32 %v1900_v58, %v1424_v57  ;;  %v1913_v57 = vld [vmem:[%s2730_s0 + $0xdc] sm:$0xf] }
  0x75   :  { %v1498_v58 = vld [vmem:[%s2730_s0 + $0xf8] sm:$0xf0] }
  0x81   :  { %952 = vmatmul.bf16.gmra.mxu0 %v1569_v16 }
  0x82   :  { %1001 = vmatmul.bf16.gmra.mxu1 %v1573_v17 }
  0x83   :  { %1050 = vmatmul.bf16.gmra.mxu2 %v1577_v18 }
  0x84   :  { %1099 = vmatmul.bf16.gmra.mxu3 %v1581_v19 }
  0x91   :  { %957 = vmatmul.bf16.gmra.mxu0 %v1601_v28  ;;  %v1466_v28 = vld [vmem:[%s2730_s0 + $0xb8] sm:$0xf0] }
  0x92   :  { %1006 = vmatmul.bf16.gmra.mxu1 %v1605_v29  ;;  %v1469_v38 = vor.u32 %v1905_v27, %v1466_v28 }
  0x93   :  { %1055 = vmatmul.bf16.gmra.mxu2 %v1609_v30 }
  0x94   :  { %1104 = vmatmul.bf16.gmra.mxu3 %v1613_v31  ;;  %v1457_v31 = vor.u32 %v1908_v22, %v1456_v21  ;;  %v1528_v21 = vld [vmem:[%s2730_s0 + $0x118] sm:$0xf] }
  0x95   :  { %v1925_v22 = vld [vmem:[%s2730_s0 + $0x134] sm:$0xf0] }
  0x9e   :  { %v923_v43 = vpop.f32.mrf.mxu0 }
  0x9f   :  { %v972_v44 = vpop.f32.mrf.mxu1  ;;  %v924_v47 = vadd.f32 %v2422_v32, %v923_v43 }
  0xa1   :  { %v973_v48 = vadd.f32 %v972_v44, %v924_v47  ;;  %1118 = vmatmul.bf16.vlgmr.msrb.gmra.mxu0 %v1393_v41 }
  0xa2   :  { %1167 = vmatmul.bf16.vlgmr.msrb.gmra.mxu1 %v1397_v42 }
  0xa3   :  { %1216 = vmatmul.bf16.vlgmr.msrb.gmra.mxu2 %v1401_v45 }
  0xa4   :  { %1265 = vmatmul.bf16.vlgmr.msrb.gmra.mxu3 %v1405_v46 }
  0xa6   :  { %v1021_v49 = vpop.f32.mrf.mxu2  ;;  %v925_v52 = vpop.f32.mrf.mxu0 }
  0xa7   :  { %v1070_v50 = vpop.f32.mrf.mxu3  ;;  %v1022_v51 = vadd.f32 %v1021_v49, %v973_v48  ;;  %v974_v53 = vpop.f32.mrf.mxu1  ;;  %v926_v54 = vadd.f32 %v2422_v32, %v925_v52  ;;  %v1912_v52 = vld [vmem:[%s2730_s0 + $0xd4] sm:$0xf] }
  0xa9   :  { %v2450_v55 = vadd.f32 %v1070_v50, %v1022_v51  ;;  %v975_v56 = vadd.f32 %v974_v53, %v926_v54  ;;  %v1488_v50 = vld [vmem:[%s2730_s0 + $0xd0] sm:$0xf]  ;;  %v1490_v53 = vld [vmem:[%s2730_s0 + $0xf0] sm:$0xf0]  ;;  %v1496_v54 = vld [vmem:[%s2730_s0 + $0xd8] sm:$0xf] }
  0xaa   :  { %v1916_v51 = vld [vmem:[%s2730_s0 + $0xec] sm:$0xf0]  ;;  %v1493_v62 = vor.u32 %v1912_v52, %v1490_v53  ;;  %v1560_v52 = vld [vmem:[%s2730_s0 + $0x158] sm:$0xf] }
  0xab   :  { %v1489_v61 = vor.u32 %v1916_v51, %v1488_v50  ;;  %v1928_v50 = vld [vmem:[%s2730_s0 + $0x154] sm:$0xf]  ;;  %v1933_v53 = vld [vmem:[%s2730_s0 + $0x174] sm:$0xf0] }
  0xac   :  { %v1554_v51 = vld [vmem:[%s2730_s0 + $0x170] sm:$0xf0] }
  0xae   :  { %v1023_v1 = vpop.f32.mrf.mxu2  ;;  %v928_v6 = vpop.f32.mrf.mxu0 }
  0xaf   :  { %v1072_v2 = vpop.f32.mrf.mxu3  ;;  %v1024_v5 = vadd.f32 %v1023_v1, %v975_v56  ;;  %v977_v7 = vpop.f32.mrf.mxu1  ;;  %v929_v10 = vadd.f32 %v2422_v32, %v928_v6  ;;  %v1917_v56 = vld [vmem:[%s2730_s0 + $0xf4] sm:$0xf0] }
  0xb1   :  { %v2477_v11 = vadd.f32 %v1072_v2, %v1024_v5  ;;  %v978_v12 = vadd.f32 %v977_v7, %v929_v10  ;;  %1123 = vmatmul.bf16.gmra.mxu0 %v1425_v3  ;;  %v1497_v2 = vor.u32 %v1917_v56, %v1496_v54  ;;  %v1501_v3 = vor.u32 %v1913_v57, %v1498_v58  ;;  %v1929_v54 = vld [vmem:[%s2730_s0 + $0x15c] sm:$0xf] }
  0xb2   :  { %1172 = vmatmul.bf16.gmra.mxu1 %v1429_v4  ;;  %v1562_v56 = vld [vmem:[%s2730_s0 + $0x178] sm:$0xf0] }
  0xb3   :  { %1221 = vmatmul.bf16.gmra.mxu2 %v1433_v8 }
  0xb4   :  { %1270 = vmatmul.bf16.gmra.mxu3 %v1437_v9 }
  0xb6   :  { %v1026_v13 = vpop.f32.mrf.mxu2  ;;  %v930_v16 = vpop.f32.mrf.mxu0 }
  0xb7   :  { %v1075_v14 = vpop.f32.mrf.mxu3  ;;  %v1027_v15 = vadd.f32 %v1026_v13, %v978_v12  ;;  %v979_v17 = vpop.f32.mrf.mxu1  ;;  %v931_v18 = vadd.f32 %v2422_v32, %v930_v16  ;;  %v1520_v16 = vld [vmem:[%s2730_s0 + $0x110] sm:$0xf] }
  0xb9   :  { %v2480_v19 = vadd.f32 %v1075_v14, %v1027_v15  ;;  %v980_v20 = vadd.f32 %v979_v17, %v931_v18  ;;  %v1924_v17 = vld [vmem:[%s2730_s0 + $0x12c] sm:$0xf0]  ;;  %v1920_v18 = vld [vmem:[%s2730_s0 + $0x114] sm:$0xf] }
  0xba   :  { %v1521_v27 = vor.u32 %v1924_v17, %v1520_v16  ;;  %v1584_v16 = vld [vmem:[%s2730_s0 + $0x190] sm:$0xf] }
  0xbb   :  { %v1940_v17 = vld [vmem:[%s2730_s0 + $0x1ac] sm:$0xf0] }
  0xbe   :  { %v1028_v29 = vpop.f32.mrf.mxu2  ;;  %v933_v35 = vpop.f32.mrf.mxu0 }
  0xbf   :  { %v1077_v30 = vpop.f32.mrf.mxu3  ;;  %v1029_v34 = vadd.f32 %v1028_v29, %v980_v20  ;;  %v982_v36 = vpop.f32.mrf.mxu1  ;;  %v934_v39 = vadd.f32 %v2422_v32, %v933_v35  ;;  %v1522_v20 = vld [vmem:[%s2730_s0 + $0x130] sm:$0xf0] }
  0xc0   :  { %v1525_v28 = vor.u32 %v1920_v18, %v1522_v20  ;;  %v1936_v18 = vld [vmem:[%s2730_s0 + $0x194] sm:$0xf] }
  0xc1   :  { %v2507_v40 = vadd.f32 %v1077_v30, %v1029_v34  ;;  %v983_v41 = vadd.f32 %v982_v36, %v934_v39  ;;  %1128 = vmatmul.bf16.gmra.mxu0 %v1457_v31  ;;  %v1533_v34 = vor.u32 %v1921_v23, %v1530_v24  ;;  %v1586_v20 = vld [vmem:[%s2730_s0 + $0x1b0] sm:$0xf0]  ;;  %v1937_v23 = vld [vmem:[%s2730_s0 + $0x19c] sm:$0xf] }
  0xc2   :  { %1177 = vmatmul.bf16.gmra.mxu1 %v1461_v33  ;;  %v1529_v33 = vor.u32 %v1925_v22, %v1528_v21  ;;  %v1592_v21 = vld [vmem:[%s2730_s0 + $0x198] sm:$0xf]  ;;  %v1594_v24 = vld [vmem:[%s2730_s0 + $0x1b8] sm:$0xf0] }
  0xc3   :  { %1226 = vmatmul.bf16.gmra.mxu2 %v1465_v37  ;;  %v1941_v22 = vld [vmem:[%s2730_s0 + $0x1b4] sm:$0xf0] }
  0xc4   :  { %1275 = vmatmul.bf16.gmra.mxu3 %v1469_v38 }
  0xc6   :  { %v1031_v42 = vpop.f32.mrf.mxu2  ;;  %v935_v45 = vpop.f32.mrf.mxu0 }
  0xc7   :  { %v1080_v43 = vpop.f32.mrf.mxu3  ;;  %v1032_v44 = vadd.f32 %v1031_v42, %v983_v41  ;;  %v984_v46 = vpop.f32.mrf.mxu1  ;;  %v936_v47 = vadd.f32 %v2422_v32, %v935_v45 }
  0xc9   :  { %v2510_v48 = vadd.f32 %v1080_v43, %v1032_v44  ;;  %v985_v49 = vadd.f32 %v984_v46, %v936_v47  ;;  %v1552_v47 = vld [vmem:[%s2730_s0 + $0x150] sm:$0xf] }
  0xce   :  { %v1033_v59 = vpop.f32.mrf.mxu2  ;;  %v938_v0 = vpop.f32.mrf.mxu0 }
  0xcf   :  { %v1082_v60 = vpop.f32.mrf.mxu3  ;;  %v1034_v63 = vadd.f32 %v1033_v59, %v985_v49  ;;  %v987_v1 = vpop.f32.mrf.mxu1  ;;  %v939_v4 = vadd.f32 %v2422_v32, %v938_v0  ;;  %v1932_v49 = vld [vmem:[%s2730_s0 + $0x16c] sm:$0xf0]  ;;  %v1561_v0 = vor.u32 %v1933_v53, %v1560_v52  ;;  %v1944_v52 = vld [vmem:[%s2730_s0 + $0x1d4] sm:$0xf] }
  0xd0   :  { %v1553_v59 = vor.u32 %v1932_v49, %v1552_v47  ;;  %v1618_v53 = vld [vmem:[%s2730_s0 + $0x1f0] sm:$0xf0] }
  0xd1   :  { %v2537_v5 = vadd.f32 %v1082_v60, %v1034_v63  ;;  %v988_v6 = vadd.f32 %v987_v1, %v939_v4  ;;  %1133 = vmatmul.bf16.gmra.mxu0 %v1489_v61  ;;  %v1557_v60 = vor.u32 %v1928_v50, %v1554_v51  ;;  %v1565_v1 = vor.u32 %v1929_v54, %v1562_v56  ;;  %v1616_v50 = vld [vmem:[%s2730_s0 + $0x1d0] sm:$0xf]  ;;  %v1624_v54 = vld [vmem:[%s2730_s0 + $0x1d8] sm:$0xf] }
  0xd2   :  { %1182 = vmatmul.bf16.gmra.mxu1 %v1493_v62  ;;  %v1948_v51 = vld [vmem:[%s2730_s0 + $0x1ec] sm:$0xf0]  ;;  %v1949_v56 = vld [vmem:[%s2730_s0 + $0x1f4] sm:$0xf0] }
  0xd3   :  { %1231 = vmatmul.bf16.gmra.mxu2 %v1497_v2 }
  0xd4   :  { %1280 = vmatmul.bf16.gmra.mxu3 %v1501_v3 }
  0xd6   :  { %v1036_v7 = vpop.f32.mrf.mxu2  ;;  %v940_v10 = vpop.f32.mrf.mxu0 }
  0xd7   :  { %v1085_v8 = vpop.f32.mrf.mxu3  ;;  %v1037_v9 = vadd.f32 %v1036_v7, %v988_v6  ;;  %v989_v12 = vpop.f32.mrf.mxu1  ;;  %v941_v13 = vadd.f32 %v2422_v32, %v940_v10 }
  0xd9   :  { %v2540_v14 = vadd.f32 %v1085_v8, %v1037_v9  ;;  %v990_v15 = vadd.f32 %v989_v12, %v941_v13 }
  0xde   :  { %v1038_v25 = vpop.f32.mrf.mxu2  ;;  %v943_v30 = vpop.f32.mrf.mxu0 }
  0xdf   :  { %v1087_v26 = vpop.f32.mrf.mxu3  ;;  %v1039_v29 = vadd.f32 %v1038_v25, %v990_v15  ;;  %v992_v31 = vpop.f32.mrf.mxu1  ;;  %v944_v35 = vadd.f32 %v2422_v32, %v943_v30 }
  0xe1   :  { %v2567_v36 = vadd.f32 %v1087_v26, %v1039_v29  ;;  %v993_v37 = vadd.f32 %v992_v31, %v944_v35  ;;  %1138 = vmatmul.bf16.gmra.mxu0 %v1521_v27  ;;  %v1585_v27 = vor.u32 %v1940_v17, %v1584_v16 }
  0xe2   :  { %1187 = vmatmul.bf16.gmra.mxu1 %v1525_v28  ;;  %v1589_v28 = vor.u32 %v1936_v18, %v1586_v20 }
  0xe3   :  { %1236 = vmatmul.bf16.gmra.mxu2 %v1529_v33  ;;  %v1593_v33 = vor.u32 %v1941_v22, %v1592_v21 }
  0xe4   :  { %1285 = vmatmul.bf16.gmra.mxu3 %v1533_v34  ;;  %v1597_v34 = vor.u32 %v1937_v23, %v1594_v24 }
  0xe6   :  { %v1041_v38 = vpop.f32.mrf.mxu2  ;;  %v945_v42 = vpop.f32.mrf.mxu0 }
  0xe7   :  { %v1090_v39 = vpop.f32.mrf.mxu3  ;;  %v1042_v41 = vadd.f32 %v1041_v38, %v993_v37  ;;  %v994_v43 = vpop.f32.mrf.mxu1  ;;  %v946_v44 = vadd.f32 %v2422_v32, %v945_v42 }
  0xe9   :  { %v2570_v45 = vadd.f32 %v1090_v39, %v1042_v41  ;;  %v995_v46 = vadd.f32 %v994_v43, %v946_v44 }
  0xee   :  { %v1043_v57 = vpop.f32.mrf.mxu2  ;;  %v948_v62 = vpop.f32.mrf.mxu0 }
  0xef   :  { %v1092_v58 = vpop.f32.mrf.mxu3  ;;  %v1044_v61 = vadd.f32 %v1043_v57, %v995_v46  ;;  %v997_v63 = vpop.f32.mrf.mxu1  ;;  %v949_v2 = vadd.f32 %v2422_v32, %v948_v62  ;;  %v1945_v57 = vld [vmem:[%s2730_s0 + $0x1dc] sm:$0xf]  ;;  %v1621_v62 = vor.u32 %v1944_v52, %v1618_v53 }
  0xf1   :  { %v2597_v3 = vadd.f32 %v1092_v58, %v1044_v61  ;;  %v998_v4 = vadd.f32 %v997_v63, %v949_v2  ;;  %1143 = vmatmul.bf16.gmra.mxu0 %v1553_v59  ;;  %v1626_v58 = vld [vmem:[%s2730_s0 + $0x1f8] sm:$0xf0]  ;;  %v1617_v61 = vor.u32 %v1948_v51, %v1616_v50  ;;  %v1625_v2 = vor.u32 %v1949_v56, %v1624_v54 }
  0xf2   :  { %1192 = vmatmul.bf16.gmra.mxu1 %v1557_v60 }
  0xf3   :  { %1241 = vmatmul.bf16.gmra.mxu2 %v1561_v0 }
  0xf4   :  { %1290 = vmatmul.bf16.gmra.mxu3 %v1565_v1 }
  0xf6   :  { %v1046_v6 = vpop.f32.mrf.mxu2  ;;  %v950_v9 = vpop.f32.mrf.mxu0 }
  0xf7   :  { %v1095_v7 = vpop.f32.mrf.mxu3  ;;  %v1047_v8 = vadd.f32 %v1046_v6, %v998_v4  ;;  %v999_v10 = vpop.f32.mrf.mxu1  ;;  %v951_v12 = vadd.f32 %v2422_v32, %v950_v9  ;;  %v1629_v4 = vor.u32 %v1945_v57, %v1626_v58 }
  0xf9   :  { %v2600_v13 = vadd.f32 %v1095_v7, %v1047_v8  ;;  %v1000_v15 = vadd.f32 %v999_v10, %v951_v12 }
  0xfe   :  { %v1048_v25 = vpop.f32.mrf.mxu2  ;;  %v953_v30 = vpop.f32.mrf.mxu0 }
  0xff   :  { %v1097_v26 = vpop.f32.mrf.mxu3  ;;  %v1049_v29 = vadd.f32 %v1048_v25, %v1000_v15  ;;  %v1002_v31 = vpop.f32.mrf.mxu1  ;;  %v954_v35 = vadd.f32 %v2422_v32, %v953_v30 }
 0x101   :  { %v2627_v37 = vadd.f32 %v1097_v26, %v1049_v29  ;;  %v1003_v38 = vadd.f32 %v1002_v31, %v954_v35  ;;  %1148 = vmatmul.bf16.gmra.mxu0 %v1585_v27 }
 0x102   :  { %1197 = vmatmul.bf16.gmra.mxu1 %v1589_v28 }
 0x103   :  { %1246 = vmatmul.bf16.gmra.mxu2 %v1593_v33 }
 0x104   :  { %1295 = vmatmul.bf16.gmra.mxu3 %v1597_v34 }
 0x106   :  { %v1051_v39 = vpop.f32.mrf.mxu2  ;;  %v955_v43 = vpop.f32.mrf.mxu0 }
 0x107   :  { %v1100_v41 = vpop.f32.mrf.mxu3  ;;  %v1052_v42 = vadd.f32 %v1051_v39, %v1003_v38  ;;  %v1004_v44 = vpop.f32.mrf.mxu1  ;;  %v956_v46 = vadd.f32 %v2422_v32, %v955_v43 }
 0x109   :  { %v2630_v47 = vadd.f32 %v1100_v41, %v1052_v42  ;;  %v1005_v49 = vadd.f32 %v1004_v44, %v956_v46 }
 0x10e   :  { %v1053_v59 = vpop.f32.mrf.mxu2  ;;  %v958_v0 = vpop.f32.mrf.mxu0 }
 0x10f   :  { %v1102_v60 = vpop.f32.mrf.mxu3  ;;  %v1054_v63 = vadd.f32 %v1053_v59, %v1005_v49  ;;  %v1007_v1 = vpop.f32.mrf.mxu1  ;;  %v959_v6 = vadd.f32 %v2422_v32, %v958_v0 }
 0x111   :  { %v2657_v7 = vadd.f32 %v1102_v60, %v1054_v63  ;;  %v1008_v8 = vadd.f32 %v1007_v1, %v959_v6  ;;  %1153 = vmatmul.bf16.gmra.mxu0 %v1617_v61 }
 0x112   :  { %1202 = vmatmul.bf16.gmra.mxu1 %v1621_v62 }
 0x113   :  { %1251 = vmatmul.bf16.gmra.mxu2 %v1625_v2 }
 0x114   :  { %1300 = vmatmul.bf16.gmra.mxu3 %v1629_v4 }
 0x116   :  { %v1056_v9 = vpop.f32.mrf.mxu2  ;;  %v960_v15 = vpop.f32.mrf.mxu0 }
 0x117   :  { %v1105_v10 = vpop.f32.mrf.mxu3  ;;  %v1057_v12 = vadd.f32 %v1056_v9, %v1008_v8  ;;  %v1009_v16 = vpop.f32.mrf.mxu1  ;;  %v961_v17 = vadd.f32 %v2422_v32, %v960_v15 }
 0x119   :  { %v2660_v18 = vadd.f32 %v1105_v10, %v1057_v12  ;;  %v1010_v20 = vadd.f32 %v1009_v16, %v961_v17 }
 0x11e   :  { %v1058_v21 = vpop.f32.mrf.mxu2  ;;  %v1119_v24 = vpop.f32.mrf.mxu0 }
 0x11f   :  { %v1107_v22 = vpop.f32.mrf.mxu3  ;;  %v1059_v23 = vadd.f32 %v1058_v21, %v1010_v20  ;;  %v1168_v25 = vpop.f32.mrf.mxu1  ;;  %v1120_v27 = vadd.f32 %v1119_v24, %v2450_v55 }
 0x121   :  { %v2662_v26 = vadd.f32 %v1107_v22, %v1059_v23  ;;  %v1169_v28 = vadd.f32 %v1168_v25, %v1120_v27 }
 0x126   :  { %v1217_v29 = vpop.f32.mrf.mxu2  ;;  %v1121_v33 = vpop.f32.mrf.mxu0 }
 0x127   :  { %v1266_v30 = vpop.f32.mrf.mxu3  ;;  %v1218_v31 = vadd.f32 %v1217_v29, %v1169_v28  ;;  %v1170_v34 = vpop.f32.mrf.mxu1  ;;  %v1122_v32 = vadd.f32 %v1121_v33, %v2477_v11 }
 0x129   :  { %v1267_v35 = vadd.f32 %v1266_v30, %v1218_v31  ;;  %v1171_v41 = vadd.f32 %v1170_v34, %v1122_v32 }
 0x12b   :  { %vm1306_vm0 = vcmp.ge.f32.partialorder %v1267_v35, 0.0  ;;  %v1322_v38 = vmul.f32 0.25, %v1267_v35 }
 0x12d   :  { %v1338_v39 = vsel %vm1306_vm0, %v1267_v35, %v1322_v38 }
 0x12e   :  { %1354 = vst [vmem:[%s2731_s3] sm:$0xff] %v1338_v39  ;;  %v1219_v42 = vpop.f32.mrf.mxu2  ;;  %v1124_v44 = vpop.f32.mrf.mxu0 }
 0x12f   :  { %v1268_v43 = vpop.f32.mrf.mxu3  ;;  %v1220_v55 = vadd.f32 %v1219_v42, %v1171_v41  ;;  %v1173_v46 = vpop.f32.mrf.mxu1  ;;  %v1125_v50 = vadd.f32 %v1124_v44, %v2480_v19 }
 0x131   :  { %v1269_v49 = vadd.f32 %v1268_v43, %v1220_v55  ;;  %v1174_v11 = vadd.f32 %v1173_v46, %v1125_v50 }
 0x133   :  { %vm1307_vm1 = vcmp.ge.f32.partialorder %v1269_v49, 0.0  ;;  %v1323_v51 = vmul.f32 0.25, %v1269_v49 }
 0x135   :  { %v1339_v52 = vsel %vm1307_vm1, %v1269_v49, %v1323_v51 }
 0x136   :  { %1355 = vst [vmem:[%s2731_s3 + $0x8] sm:$0xff] %v1339_v52  ;;  %v1222_v53 = vpop.f32.mrf.mxu2  ;;  %v1126_v57 = vpop.f32.mrf.mxu0 }
 0x137   :  { %v1271_v54 = vpop.f32.mrf.mxu3  ;;  %v1223_v56 = vadd.f32 %v1222_v53, %v1174_v11  ;;  %v1175_v58 = vpop.f32.mrf.mxu1  ;;  %v1127_v60 = vadd.f32 %v1126_v57, %v2507_v40 }
 0x139   :  { %v1272_v59 = vadd.f32 %v1271_v54, %v1223_v56  ;;  %v1176_v19 = vadd.f32 %v1175_v58, %v1127_v60 }
 0x13b   :  { %vm1308_vm2 = vcmp.ge.f32.partialorder %v1272_v59, 0.0  ;;  %v1324_v61 = vmul.f32 0.25, %v1272_v59 }
 0x13d   :  { %v1340_v62 = vsel %vm1308_vm2, %v1272_v59, %v1324_v61 }
 0x13e   :  { %1356 = vst [vmem:[%s2731_s3 + $0x10] sm:$0xff] %v1340_v62  ;;  %v1224_v63 = vpop.f32.mrf.mxu2  ;;  %v1129_v2 = vpop.f32.mrf.mxu0 }
 0x13f   :  { %v1273_v0 = vpop.f32.mrf.mxu3  ;;  %v1225_v1 = vadd.f32 %v1224_v63, %v1176_v19  ;;  %v1178_v4 = vpop.f32.mrf.mxu1  ;;  %v1130_v8 = vadd.f32 %v1129_v2, %v2510_v48 }
 0x141   :  { %v1274_v6 = vadd.f32 %v1273_v0, %v1225_v1  ;;  %v1179_v40 = vadd.f32 %v1178_v4, %v1130_v8 }
 0x143   :  { %vm1309_vm3 = vcmp.ge.f32.partialorder %v1274_v6, 0.0  ;;  %v1325_v9 = vmul.f32 0.25, %v1274_v6 }
 0x145   :  { %v1341_v10 = vsel %vm1309_vm3, %v1274_v6, %v1325_v9 }
 0x146   :  { %1357 = vst [vmem:[%s2731_s3 + $0x18] sm:$0xff] %v1341_v10  ;;  %v1227_v12 = vpop.f32.mrf.mxu2  ;;  %v1131_v17 = vpop.f32.mrf.mxu0 }
 0x147   :  { %v1276_v15 = vpop.f32.mrf.mxu3  ;;  %v1228_v16 = vadd.f32 %v1227_v12, %v1179_v40  ;;  %v1180_v20 = vpop.f32.mrf.mxu1  ;;  %v1132_v22 = vadd.f32 %v1131_v17, %v2537_v5 }
 0x149   :  { %v1277_v21 = vadd.f32 %v1276_v15, %v1228_v16  ;;  %v1181_v48 = vadd.f32 %v1180_v20, %v1132_v22 }
 0x14b   :  { %vm1310_vm4 = vcmp.ge.f32.partialorder %v1277_v21, 0.0  ;;  %v1326_v23 = vmul.f32 0.25, %v1277_v21 }
 0x14d   :  { %v1342_v24 = vsel %vm1310_vm4, %v1277_v21, %v1326_v23 }
 0x14e   :  { %1358 = vst [vmem:[%s2731_s3 + $0x20] sm:$0xff] %v1342_v24  ;;  %v1229_v25 = vpop.f32.mrf.mxu2  ;;  %v1134_v29 = vpop.f32.mrf.mxu0 }
 0x14f   :  { %v1278_v27 = vpop.f32.mrf.mxu3  ;;  %v1230_v28 = vadd.f32 %v1229_v25, %v1181_v48  ;;  %v1183_v30 = vpop.f32.mrf.mxu1  ;;  %v1135_v33 = vadd.f32 %v1134_v29, %v2540_v14 }
 0x151   :  { %v1279_v31 = vadd.f32 %v1278_v27, %v1230_v28  ;;  %v1184_v5 = vadd.f32 %v1183_v30, %v1135_v33 }
 0x153   :  { %vm1311_vm5 = vcmp.ge.f32.partialorder %v1279_v31, 0.0  ;;  %v1327_v34 = vmul.f32 0.25, %v1279_v31 }
 0x155   :  { %v1343_v35 = vsel %vm1311_vm5, %v1279_v31, %v1327_v34 }
 0x156   :  { %1359 = vst [vmem:[%s2731_s3 + $0x28] sm:$0xff] %v1343_v35  ;;  %v1232_v32 = vpop.f32.mrf.mxu2  ;;  %v1136_v41 = vpop.f32.mrf.mxu0 }
 0x157   :  { %v1281_v38 = vpop.f32.mrf.mxu3  ;;  %v1233_v39 = vadd.f32 %v1232_v32, %v1184_v5  ;;  %v1185_v42 = vpop.f32.mrf.mxu1  ;;  %v1137_v55 = vadd.f32 %v1136_v41, %v2567_v36 }
 0x159   :  { %v1282_v43 = vadd.f32 %v1281_v38, %v1233_v39  ;;  %v1186_v14 = vadd.f32 %v1185_v42, %v1137_v55 }
 0x15b   :  { %vm1312_vm6 = vcmp.ge.f32.partialorder %v1282_v43, 0.0  ;;  %v1328_v44 = vmul.f32 0.25, %v1282_v43 }
 0x15d   :  { %v1344_v46 = vsel %vm1312_vm6, %v1282_v43, %v1328_v44 }
 0x15e   :  { %1360 = vst [vmem:[%s2731_s3 + $0x30] sm:$0xff] %v1344_v46  ;;  %v1234_v49 = vpop.f32.mrf.mxu2  ;;  %v1139_v52 = vpop.f32.mrf.mxu0 }
 0x15f   :  { %v1283_v50 = vpop.f32.mrf.mxu3  ;;  %v1235_v51 = vadd.f32 %v1234_v49, %v1186_v14  ;;  %v1188_v11 = vpop.f32.mrf.mxu1  ;;  %v1140_v54 = vadd.f32 %v1139_v52, %v2570_v45 }
 0x161   :  { %v1284_v53 = vadd.f32 %v1283_v50, %v1235_v51  ;;  %v1189_v36 = vadd.f32 %v1188_v11, %v1140_v54 }
 0x163   :  { %vm1313_vm7 = vcmp.ge.f32.partialorder %v1284_v53, 0.0  ;;  %v1329_v56 = vmul.f32 0.25, %v1284_v53 }
 0x165   :  { %v1345_v57 = vsel %vm1313_vm7, %v1284_v53, %v1329_v56 }
 0x166   :  { %1361 = vst [vmem:[%s2731_s3 + $0x38] sm:$0xff] %v1345_v57  ;;  %v1237_v58 = vpop.f32.mrf.mxu2  ;;  %v1141_v61 = vpop.f32.mrf.mxu0 }
 0x167   :  { %v1286_v59 = vpop.f32.mrf.mxu3  ;;  %v1238_v60 = vadd.f32 %v1237_v58, %v1189_v36  ;;  %v1190_v62 = vpop.f32.mrf.mxu1  ;;  %v1142_v63 = vadd.f32 %v1141_v61, %v2597_v3 }
 0x169   :  { %v1287_v19 = vadd.f32 %v1286_v59, %v1238_v60  ;;  %v1191_v45 = vadd.f32 %v1190_v62, %v1142_v63 }
 0x16b   :  { %vm1314_vm8 = vcmp.ge.f32.partialorder %v1287_v19, 0.0  ;;  %v1330_v0 = vmul.f32 0.25, %v1287_v19 }
 0x16d   :  { %v1346_v1 = vsel %vm1314_vm8, %v1287_v19, %v1330_v0 }
 0x16e   :  { %1362 = vst [vmem:[%s2731_s3 + $0x40] sm:$0xff] %v1346_v1  ;;  %v1239_v2 = vpop.f32.mrf.mxu2  ;;  %v1144_v8 = vpop.f32.mrf.mxu0 }
 0x16f   :  { %v1288_v4 = vpop.f32.mrf.mxu3  ;;  %v1240_v6 = vadd.f32 %v1239_v2, %v1191_v45  ;;  %v1193_v9 = vpop.f32.mrf.mxu1  ;;  %v1145_v40 = vadd.f32 %v1144_v8, %v2600_v13 }
 0x171   :  { %v1289_v10 = vadd.f32 %v1288_v4, %v1240_v6  ;;  %v1194_v3 = vadd.f32 %v1193_v9, %v1145_v40 }
 0x173   :  { %vm1315_vm9 = vcmp.ge.f32.partialorder %v1289_v10, 0.0  ;;  %v1331_v12 = vmul.f32 0.25, %v1289_v10 }
 0x175   :  { %v1347_v15 = vsel %vm1315_vm9, %v1289_v10, %v1331_v12 }
 0x176   :  { %1363 = vst [vmem:[%s2731_s3 + $0x48] sm:$0xff] %v1347_v15  ;;  %v1242_v16 = vpop.f32.mrf.mxu2  ;;  %v1146_v21 = vpop.f32.mrf.mxu0 }
 0x177   :  { %v1291_v17 = vpop.f32.mrf.mxu3  ;;  %v1243_v20 = vadd.f32 %v1242_v16, %v1194_v3  ;;  %v1195_v22 = vpop.f32.mrf.mxu1  ;;  %v1147_v24 = vadd.f32 %v1146_v21, %v2627_v37 }
 0x179   :  { %v1292_v23 = vadd.f32 %v1291_v17, %v1243_v20  ;;  %v1196_v13 = vadd.f32 %v1195_v22, %v1147_v24 }
 0x17b   :  { %vm1316_vm10 = vcmp.ge.f32.partialorder %v1292_v23, 0.0  ;;  %v1332_v48 = vmul.f32 0.25, %v1292_v23 }
 0x17d   :  { %v1348_v25 = vsel %vm1316_vm10, %v1292_v23, %v1332_v48 }
 0x17e   :  { %1364 = vst [vmem:[%s2731_s3 + $0x50] sm:$0xff] %v1348_v25  ;;  %v1244_v27 = vpop.f32.mrf.mxu2  ;;  %v1149_v30 = vpop.f32.mrf.mxu0 }
 0x17f   :  { %v1293_v28 = vpop.f32.mrf.mxu3  ;;  %v1245_v29 = vadd.f32 %v1244_v27, %v1196_v13  ;;  %v1198_v31 = vpop.f32.mrf.mxu1  ;;  %v1150_v34 = vadd.f32 %v1149_v30, %v2630_v47 }
 0x181   :  { %v1294_v33 = vadd.f32 %v1293_v28, %v1245_v29  ;;  %v1199_v37 = vadd.f32 %v1198_v31, %v1150_v34 }
 0x183   :  { %vm1317_vm11 = vcmp.ge.f32.partialorder %v1294_v33, 0.0  ;;  %v1333_v35 = vmul.f32 0.25, %v1294_v33 }
 0x185   :  { %v1349_v5 = vsel %vm1317_vm11, %v1294_v33, %v1333_v35 }
 0x186   :  { %1365 = vst [vmem:[%s2731_s3 + $0x58] sm:$0xff] %v1349_v5  ;;  %v1247_v32 = vpop.f32.mrf.mxu2  ;;  %v1151_v41 = vpop.f32.mrf.mxu0 }
 0x187   :  { %v1296_v38 = vpop.f32.mrf.mxu3  ;;  %v1248_v39 = vadd.f32 %v1247_v32, %v1199_v37  ;;  %v1200_v42 = vpop.f32.mrf.mxu1  ;;  %v1152_v55 = vadd.f32 %v1151_v41, %v2657_v7 }
 0x189   :  { %v1297_v43 = vadd.f32 %v1296_v38, %v1248_v39  ;;  %v1201_v47 = vadd.f32 %v1200_v42, %v1152_v55 }
 0x18b   :  { %vm1318_vm12 = vcmp.ge.f32.partialorder %v1297_v43, 0.0  ;;  %v1334_v44 = vmul.f32 0.25, %v1297_v43 }
 0x18d   :  { %v1350_v46 = vsel %vm1318_vm12, %v1297_v43, %v1334_v44 }
 0x18e   :  { %1366 = vst [vmem:[%s2731_s3 + $0x60] sm:$0xff] %v1350_v46  ;;  %v1249_v14 = vpop.f32.mrf.mxu2  ;;  %v1154_v51 = vpop.f32.mrf.mxu0 }
 0x18f   :  { %v1298_v49 = vpop.f32.mrf.mxu3  ;;  %v1250_v50 = vadd.f32 %v1249_v14, %v1201_v47  ;;  %v1155_v11 = vadd.f32 %v1154_v51, %v2660_v18  ;;  %v1203_v53 = vpop.f32.mrf.mxu1 }
 0x191   :  { %v1299_v52 = vadd.f32 %v1298_v49, %v1250_v50  ;;  %v1204_v7 = vadd.f32 %v1203_v53, %v1155_v11 }
 0x193   :  { %vm1319_vm13 = vcmp.ge.f32.partialorder %v1299_v52, 0.0  ;;  %v1335_v54 = vmul.f32 0.25, %v1299_v52 }
 0x195   :  { %v1351_v56 = vsel %vm1319_vm13, %v1299_v52, %v1335_v54 }
 0x196   :  { %1367 = vst [vmem:[%s2731_s3 + $0x68] sm:$0xff] %v1351_v56  ;;  %v1252_v57 = vpop.f32.mrf.mxu2  ;;  %v1156_v59 = vpop.f32.mrf.mxu0 }
 0x197   :  { %v1301_v36 = vpop.f32.mrf.mxu3  ;;  %v1253_v58 = vadd.f32 %v1252_v57, %v1204_v7  ;;  %v1157_v61 = vadd.f32 %v1156_v59, %v2662_v26  ;;  %v1205_v19 = vpop.f32.mrf.mxu1 }
 0x199   :  { %v1302_v60 = vadd.f32 %v1301_v36, %v1253_v58  ;;  %v1206_v63 = vadd.f32 %v1205_v19, %v1157_v61 }
 0x19b   :  { %vm1320_vm14 = vcmp.ge.f32.partialorder %v1302_v60, 0.0  ;;  %v1336_v62 = vmul.f32 0.25, %v1302_v60 }
 0x19d   :  { %v1352_v18 = vsel %vm1320_vm14, %v1302_v60, %v1336_v62 }
 0x19e   :  { %1368 = vst [vmem:[%s2731_s3 + $0x70] sm:$0xff] %v1352_v18  ;;  %v1254_v0 = vpop.f32.mrf.mxu2 }
 0x19f   :  { %v1255_v1 = vadd.f32 %v1254_v0, %v1206_v63  ;;  %v1303_v45 = vpop.f32.mrf.mxu3 }
 0x1a1   :  { %v1304_v2 = vadd.f32 %v1303_v45, %v1255_v1 }
 0x1a3   :  { %vm1321_vm15 = vcmp.ge.f32.partialorder %v1304_v2, 0.0  ;;  %v1337_v4 = vmul.f32 0.25, %v1304_v2 }
 0x1a5   :  { %v1353_v6 = vsel %vm1321_vm15, %v1304_v2, %v1337_v4 }
 0x1a6   :  { %1369 = vst [vmem:[%s2731_s3 + $0x78] sm:$0xff] %v1353_v6 }

// kernel: _lambda_.19
= control target key start
LH: loop header
LB: loop body
LE: loop exit
PB: predicated region body
PF: predicated region fallthrough
CT: control target
= control target key end

     0   :  { %s2816_s1 = inlined_call_operand.vmem [shape: bf16[1024,128], index: 1, kind: input, shape index: {}]   ;;  %s2817_s2 = inlined_call_operand.vmem [shape: f32[1,128], index: 2, kind: input, shape index: {}]   ;;  %s2818_s0 = inlined_call_operand.vmem [shape: bf16[128,1024], index: 0, kind: input, shape index: {}]   ;;  %s2819_s3 = inlined_call_operand.vmem [shape: f32[128,128], index: 3, kind: input, shape index: {}]   ;;  %s2820_s4 = inlined_call_operand.vmem [shape: f32[128,128], index: 4, kind: output, shape index: {}]  }
   0x1   :  { %v1992_v0 = vld [vmem:[%s2816_s1 + $0x38] sm:$0xff]  ;;  %v1991_v4 = vld [vmem:[%s2816_s1 + $0x30] sm:$0xff]  ;;  %v1990_v8 = vld [vmem:[%s2816_s1 + $0x28] sm:$0xff] }
   0x2   :  { %v2000_v1 = vld [vmem:[%s2816_s1 + $0x78] sm:$0xff]  ;;  %917 = vmatpush.bf16.msra.mxu0 %v1992_v0  ;;  %v1999_v5 = vld [vmem:[%s2816_s1 + $0x70] sm:$0xff]  ;;  %v1998_v9 = vld [vmem:[%s2816_s1 + $0x68] sm:$0xff] }
   0x3   :  { %v2008_v2 = vld [vmem:[%s2816_s1 + $0xb8] sm:$0xff]  ;;  %966 = vmatpush.bf16.msra.mxu1 %v2000_v1  ;;  %v2007_v6 = vld [vmem:[%s2816_s1 + $0xb0] sm:$0xff]  ;;  %v2006_v10 = vld [vmem:[%s2816_s1 + $0xa8] sm:$0xff] }
   0x4   :  { %v2016_v3 = vld [vmem:[%s2816_s1 + $0xf8] sm:$0xff]  ;;  %1015 = vmatpush.bf16.msra.mxu2 %v2008_v2  ;;  %v2015_v7 = vld [vmem:[%s2816_s1 + $0xf0] sm:$0xff]  ;;  %v2014_v11 = vld [vmem:[%s2816_s1 + $0xe8] sm:$0xff] }
   0x5   :  { %1064 = vmatpush.bf16.msra.mxu3 %v2016_v3  ;;  %v1989_v12 = vld [vmem:[%s2816_s1 + $0x20] sm:$0xff]  ;;  %v1988_v16 = vld [vmem:[%s2816_s1 + $0x18] sm:$0xff]  ;;  %v1987_v20 = vld [vmem:[%s2816_s1 + $0x10] sm:$0xff] }
   0x6   :  { %918 = vmatpush.bf16.msra.mxu0 %v1991_v4  ;;  %v1997_v13 = vld [vmem:[%s2816_s1 + $0x60] sm:$0xff]  ;;  %v1996_v17 = vld [vmem:[%s2816_s1 + $0x58] sm:$0xff]  ;;  %v1995_v21 = vld [vmem:[%s2816_s1 + $0x50] sm:$0xff] }
   0x7   :  { %967 = vmatpush.bf16.msra.mxu1 %v1999_v5  ;;  %v2005_v14 = vld [vmem:[%s2816_s1 + $0xa0] sm:$0xff]  ;;  %v2004_v18 = vld [vmem:[%s2816_s1 + $0x98] sm:$0xff]  ;;  %v2003_v22 = vld [vmem:[%s2816_s1 + $0x90] sm:$0xff] }
   0x8   :  { %1016 = vmatpush.bf16.msra.mxu2 %v2007_v6  ;;  %v2013_v15 = vld [vmem:[%s2816_s1 + $0xe0] sm:$0xff]  ;;  %v2012_v19 = vld [vmem:[%s2816_s1 + $0xd8] sm:$0xff]  ;;  %v2011_v23 = vld [vmem:[%s2816_s1 + $0xd0] sm:$0xff] }
   0x9   :  { %1065 = vmatpush.bf16.msra.mxu3 %v2015_v7  ;;  %v1986_v24 = vld [vmem:[%s2816_s1 + $0x8] sm:$0xff]  ;;  %v1985_v28 = vld [vmem:[%s2816_s1] sm:$0xff]  ;;  %v2040_v40 = vld [vmem:[%s2816_s1 + $0x1b8] sm:$0xff] }
   0xa   :  { %919 = vmatpush.bf16.msra.mxu0 %v1990_v8  ;;  %v1994_v25 = vld [vmem:[%s2816_s1 + $0x48] sm:$0xff]  ;;  %v1993_v29 = vld [vmem:[%s2816_s1 + $0x40] sm:$0xff]  ;;  %v2024_v41 = vld [vmem:[%s2816_s1 + $0x138] sm:$0xff] }
   0xb   :  { %968 = vmatpush.bf16.msra.mxu1 %v1998_v9  ;;  %v2002_v26 = vld [vmem:[%s2816_s1 + $0x88] sm:$0xff]  ;;  %v2001_v30 = vld [vmem:[%s2816_s1 + $0x80] sm:$0xff]  ;;  %v2048_v46 = vld [vmem:[%s2816_s1 + $0x1f8] sm:$0xff] }
   0xc   :  { %1017 = vmatpush.bf16.msra.mxu2 %v2006_v10  ;;  %v2010_v27 = vld [vmem:[%s2816_s1 + $0xc8] sm:$0xff]  ;;  %v2009_v31 = vld [vmem:[%s2816_s1 + $0xc0] sm:$0xff]  ;;  %v2032_v47 = vld [vmem:[%s2816_s1 + $0x178] sm:$0xff] }
   0xd   :  { %1066 = vmatpush.bf16.msra.mxu3 %v2014_v11  ;;  %v1411_v32 = vld [vmem:[%s2818_s0] sm:$0xf]  ;;  %v1921_v34 = vld [vmem:[%s2818_s0 + $0x4] sm:$0xf]  ;;  %v1419_v36 = vld [vmem:[%s2818_s0 + $0x8] sm:$0xf] }
   0xe   :  { %920 = vmatpush.bf16.msra.mxu0 %v1989_v12  ;;  %v1925_v33 = vld [vmem:[%s2818_s0 + $0x1c] sm:$0xf0]  ;;  %v1413_v35 = vld [vmem:[%s2818_s0 + $0x20] sm:$0xf0]  ;;  %v1926_v37 = vld [vmem:[%s2818_s0 + $0x24] sm:$0xf0] }
   0xf   :  { %969 = vmatpush.bf16.msra.mxu1 %v1997_v13  ;;  %v1922_v38 = vld [vmem:[%s2818_s0 + $0xc] sm:$0xf]  ;;  %v1412_v42 = vor.u32 %v1925_v33, %v1411_v32  ;;  %v1416_v43 = vor.u32 %v1921_v34, %v1413_v35  ;;  %v1420_v44 = vor.u32 %v1926_v37, %v1419_v36  ;;  %v2039_v48 = vld [vmem:[%s2816_s1 + $0x1b0] sm:$0xff]  ;;  %v1443_v56 = vld [vmem:[%s2818_s0 + $0x40] sm:$0xf] }
  0x10   :  { %1018 = vmatpush.bf16.msra.mxu2 %v2005_v14  ;;  %v1421_v39 = vld [vmem:[%s2818_s0 + $0x28] sm:$0xf0]  ;;  %v2023_v49 = vld [vmem:[%s2816_s1 + $0x130] sm:$0xff]  ;;  %v1933_v57 = vld [vmem:[%s2818_s0 + $0x5c] sm:$0xf0] }
  0x11   :  { %1067 = vmatpush.bf16.msra.mxu3 %v2013_v15  ;;  %v1424_v45 = vor.u32 %v1922_v38, %v1421_v39  ;;  %v2047_v50 = vld [vmem:[%s2816_s1 + $0x1f0] sm:$0xff]  ;;  %v2038_v52 = vld [vmem:[%s2816_s1 + $0x1a8] sm:$0xff]  ;;  %v1929_v58 = vld [vmem:[%s2818_s0 + $0x44] sm:$0xf]  ;;  %v1444_v0 = vor.u32 %v1933_v57, %v1443_v56 }
  0x12   :  { %921 = vmatpush.bf16.msra.mxu0 %v1988_v16  ;;  %v2031_v51 = vld [vmem:[%s2816_s1 + $0x170] sm:$0xff]  ;;  %v2022_v53 = vld [vmem:[%s2816_s1 + $0x128] sm:$0xff]  ;;  %v1445_v59 = vld [vmem:[%s2818_s0 + $0x60] sm:$0xf0] }
  0x13   :  { %970 = vmatpush.bf16.msra.mxu1 %v1996_v17  ;;  %v2046_v54 = vld [vmem:[%s2816_s1 + $0x1e8] sm:$0xff]  ;;  %v1448_v1 = vor.u32 %v1929_v58, %v1445_v59  ;;  %v2037_v4 = vld [vmem:[%s2816_s1 + $0x1a0] sm:$0xff]  ;;  %v2035_v36 = vld [vmem:[%s2816_s1 + $0x190] sm:$0xff] }
  0x14   :  { %1019 = vmatpush.bf16.msra.mxu2 %v2004_v18  ;;  %v2030_v55 = vld [vmem:[%s2816_s1 + $0x168] sm:$0xff]  ;;  %v2021_v5 = vld [vmem:[%s2816_s1 + $0x120] sm:$0xff]  ;;  %v2019_v37 = vld [vmem:[%s2816_s1 + $0x110] sm:$0xff] }
  0x15   :  { %1068 = vmatpush.bf16.msra.mxu3 %v2012_v19  ;;  %v1451_v60 = vld [vmem:[%s2818_s0 + $0x48] sm:$0xf]  ;;  %v1930_v62 = vld [vmem:[%s2818_s0 + $0x4c] sm:$0xf]  ;;  %v2045_v6 = vld [vmem:[%s2816_s1 + $0x1e0] sm:$0xff] }
  0x16   :  { %922 = vmatpush.bf16.msra.mxu0 %v1987_v20  ;;  %v1934_v61 = vld [vmem:[%s2818_s0 + $0x64] sm:$0xf0]  ;;  %v1453_v63 = vld [vmem:[%s2818_s0 + $0x68] sm:$0xf0]  ;;  %v2029_v7 = vld [vmem:[%s2816_s1 + $0x160] sm:$0xff] }
  0x17   :  { %971 = vmatpush.bf16.msra.mxu1 %v1995_v21  ;;  %v1452_v2 = vor.u32 %v1934_v61, %v1451_v60  ;;  %v1456_v3 = vor.u32 %v1930_v62, %v1453_v63  ;;  %v1475_v8 = vld [vmem:[%s2818_s0 + $0x80] sm:$0xf]  ;;  %v1937_v10 = vld [vmem:[%s2818_s0 + $0x84] sm:$0xf]  ;;  %v1483_v12 = vld [vmem:[%s2818_s0 + $0x88] sm:$0xf] }
  0x18   :  { %1020 = vmatpush.bf16.msra.mxu2 %v2003_v22  ;;  %v1941_v9 = vld [vmem:[%s2818_s0 + $0x9c] sm:$0xf0]  ;;  %v1477_v11 = vld [vmem:[%s2818_s0 + $0xa0] sm:$0xf0]  ;;  %v1942_v13 = vld [vmem:[%s2818_s0 + $0xa4] sm:$0xf0] }
  0x19   :  { %1069 = vmatpush.bf16.msra.mxu3 %v2011_v23  ;;  %v1938_v14 = vld [vmem:[%s2818_s0 + $0x8c] sm:$0xf]  ;;  %v1476_v16 = vor.u32 %v1941_v9, %v1475_v8  ;;  %v1480_v17 = vor.u32 %v1937_v10, %v1477_v11  ;;  %v1484_v18 = vor.u32 %v1942_v13, %v1483_v12  ;;  %v2036_v20 = vld [vmem:[%s2816_s1 + $0x198] sm:$0xff]  ;;  %v2043_v38 = vld [vmem:[%s2816_s1 + $0x1d0] sm:$0xff] }
  0x1a   :  { %923 = vmatpush.bf16.msra.mxu0 %v1986_v24  ;;  %v1485_v15 = vld [vmem:[%s2818_s0 + $0xa8] sm:$0xf0]  ;;  %v2020_v21 = vld [vmem:[%s2816_s1 + $0x118] sm:$0xff]  ;;  %v1507_v24 = vld [vmem:[%s2818_s0 + $0xc0] sm:$0xf] }
  0x1b   :  { %972 = vmatpush.bf16.msra.mxu1 %v1994_v25  ;;  %v1488_v19 = vor.u32 %v1938_v14, %v1485_v15  ;;  %v2044_v22 = vld [vmem:[%s2816_s1 + $0x1d8] sm:$0xff]  ;;  %v1949_v25 = vld [vmem:[%s2818_s0 + $0xdc] sm:$0xf0]  ;;  %v2027_v39 = vld [vmem:[%s2816_s1 + $0x150] sm:$0xff] }
  0x1c   :  { %1021 = vmatpush.bf16.msra.mxu2 %v2002_v26  ;;  %v2028_v23 = vld [vmem:[%s2816_s1 + $0x158] sm:$0xff]  ;;  %v1945_v26 = vld [vmem:[%s2818_s0 + $0xc4] sm:$0xf]  ;;  %v1508_v32 = vor.u32 %v1949_v25, %v1507_v24  ;;  %v1571_v56 = vld [vmem:[%s2818_s0 + $0x140] sm:$0xf] }
  0x1d   :  { %1070 = vmatpush.bf16.msra.mxu3 %v2010_v27  ;;  %v1509_v27 = vld [vmem:[%s2818_s0 + $0xe0] sm:$0xf0]  ;;  %v1965_v57 = vld [vmem:[%s2818_s0 + $0x15c] sm:$0xf0]  ;;  %v1579_v60 = vld [vmem:[%s2818_s0 + $0x148] sm:$0xf] }
  0x1e   :  { %924 = vmatpush.bf16.msra.mxu0 %v1985_v28  ;;  %v1515_v28 = vld [vmem:[%s2818_s0 + $0xc8] sm:$0xf]  ;;  %v1512_v33 = vor.u32 %v1945_v26, %v1509_v27  ;;  %v1961_v58 = vld [vmem:[%s2818_s0 + $0x144] sm:$0xf]  ;;  %v1962_v62 = vld [vmem:[%s2818_s0 + $0x14c] sm:$0xf] }
  0x1f   :  { %973 = vmatpush.bf16.msra.mxu1 %v1993_v29  ;;  %v1950_v29 = vld [vmem:[%s2818_s0 + $0xe4] sm:$0xf0]  ;;  %v1573_v59 = vld [vmem:[%s2818_s0 + $0x160] sm:$0xf0]  ;;  %v1581_v63 = vld [vmem:[%s2818_s0 + $0x168] sm:$0xf0] }
  0x20   :  { %1022 = vmatpush.bf16.msra.mxu2 %v2001_v30  ;;  %v1946_v30 = vld [vmem:[%s2818_s0 + $0xcc] sm:$0xf]  ;;  %v1516_v34 = vor.u32 %v1950_v29, %v1515_v28  ;;  %v1966_v61 = vld [vmem:[%s2818_s0 + $0x164] sm:$0xf0]  ;;  %v1603_v8 = vld [vmem:[%s2818_s0 + $0x180] sm:$0xf] }
  0x21   :  { %1071 = vmatpush.bf16.msra.mxu3 %v2009_v31  ;;  %925 = vmatmul.bf16.vlgmr.msra.gmra.mxu0 %v1412_v42  ;;  %v1517_v31 = vld [vmem:[%s2818_s0 + $0xe8] sm:$0xf0]  ;;  %v1953_v42 = vld [vmem:[%s2818_s0 + $0x104] sm:$0xf]  ;;  %v1973_v9 = vld [vmem:[%s2818_s0 + $0x19c] sm:$0xf0] }
  0x22   :  { %1113 = vmatpush.bf16.msrb.mxu0 %v2024_v41  ;;  %974 = vmatmul.bf16.vlgmr.msra.gmra.mxu1 %v1416_v43  ;;  %v1520_v35 = vor.u32 %v1946_v30, %v1517_v31  ;;  %v1957_v41 = vld [vmem:[%s2818_s0 + $0x11c] sm:$0xf0]  ;;  %v1541_v43 = vld [vmem:[%s2818_s0 + $0x120] sm:$0xf0]  ;;  %v1611_v12 = vld [vmem:[%s2818_s0 + $0x188] sm:$0xf] }
  0x23   :  { %1023 = vmatmul.bf16.vlgmr.msra.gmra.mxu2 %v1420_v44  ;;  %1162 = vmatpush.bf16.msrb.mxu1 %v2032_v47  ;;  %v1547_v44 = vld [vmem:[%s2818_s0 + $0x108] sm:$0xf]  ;;  %v1549_v47 = vld [vmem:[%s2818_s0 + $0x128] sm:$0xf0]  ;;  %v1969_v10 = vld [vmem:[%s2818_s0 + $0x184] sm:$0xf] }
  0x24   :  { %1211 = vmatpush.bf16.msrb.mxu2 %v2040_v40  ;;  %1072 = vmatmul.bf16.vlgmr.msra.gmra.mxu3 %v1424_v45  ;;  %v1539_v40 = vld [vmem:[%s2818_s0 + $0x100] sm:$0xf]  ;;  %v1958_v45 = vld [vmem:[%s2818_s0 + $0x124] sm:$0xf0]  ;;  %v1605_v11 = vld [vmem:[%s2818_s0 + $0x1a0] sm:$0xf0] }
  0x25   :  { %1260 = vmatpush.bf16.msrb.mxu3 %v2048_v46  ;;  %v1954_v46 = vld [vmem:[%s2818_s0 + $0x10c] sm:$0xf]  ;;  %v1974_v13 = vld [vmem:[%s2818_s0 + $0x1a4] sm:$0xf0] }
  0x26   :  { %1114 = vmatpush.bf16.msrb.mxu0 %v2023_v49  ;;  %v1544_v49 = vor.u32 %v1953_v42, %v1541_v43  ;;  %v1970_v14 = vld [vmem:[%s2818_s0 + $0x18c] sm:$0xf]  ;;  %v1643_v24 = vld [vmem:[%s2818_s0 + $0x1c8] sm:$0xf] }
  0x27   :  { %1163 = vmatpush.bf16.msrb.mxu1 %v2031_v51  ;;  %v1552_v51 = vor.u32 %v1954_v46, %v1549_v47  ;;  %v1613_v15 = vld [vmem:[%s2818_s0 + $0x1a8] sm:$0xf0]  ;;  %v1982_v25 = vld [vmem:[%s2818_s0 + $0x1e4] sm:$0xf0] }
  0x28   :  { %1212 = vmatpush.bf16.msrb.mxu2 %v2039_v48  ;;  %v1540_v48 = vor.u32 %v1957_v41, %v1539_v40  ;;  %v1978_v26 = vld [vmem:[%s2818_s0 + $0x1cc] sm:$0xf]  ;;  %v1644_v30 = vor.u32 %v1982_v25, %v1643_v24  ;;  %v1437_v40 = vld [vmem:[%s2818_s0 + $0x38] sm:$0xf0]  ;;  %v1493_v24 = vld [vmem:[%s2818_s0 + $0xb0] sm:$0xf0] }
  0x29   :  { %1261 = vmatpush.bf16.msrb.mxu3 %v2047_v50  ;;  %v1548_v50 = vor.u32 %v1958_v45, %v1547_v44  ;;  %v1645_v27 = vld [vmem:[%s2818_s0 + $0x1e8] sm:$0xf0]  ;;  %v1499_v25 = vld [vmem:[%s2818_s0 + $0x98] sm:$0xf] }
  0x2a   :  { %1115 = vmatpush.bf16.msrb.mxu0 %v2022_v53  ;;  %v2018_v53 = vld [vmem:[%s2816_s1 + $0x108] sm:$0xff]  ;;  %v1648_v31 = vor.u32 %v1978_v26, %v1645_v27  ;;  %v1944_v26 = vld [vmem:[%s2818_s0 + $0xb4] sm:$0xf0]  ;;  %v1940_v27 = vld [vmem:[%s2818_s0 + $0x9c] sm:$0xf] }
  0x2b   :  { %1164 = vmatpush.bf16.msrb.mxu1 %v2030_v55  ;;  %v2026_v55 = vld [vmem:[%s2816_s1 + $0x148] sm:$0xff] }
  0x2c   :  { %1213 = vmatpush.bf16.msrb.mxu2 %v2038_v52  ;;  %v2034_v52 = vld [vmem:[%s2816_s1 + $0x188] sm:$0xff] }
  0x2d   :  { %1262 = vmatpush.bf16.msrb.mxu3 %v2046_v54  ;;  %v2042_v54 = vld [vmem:[%s2816_s1 + $0x1c8] sm:$0xff] }
  0x2e   :  { %1116 = vmatpush.bf16.msrb.mxu0 %v2021_v5  ;;  %v2017_v5 = vld [vmem:[%s2816_s1 + $0x100] sm:$0xff] }
  0x2f   :  { %1165 = vmatpush.bf16.msrb.mxu1 %v2029_v7  ;;  %v2025_v7 = vld [vmem:[%s2816_s1 + $0x140] sm:$0xff] }
  0x30   :  { %1214 = vmatpush.bf16.msrb.mxu2 %v2037_v4  ;;  %v2033_v4 = vld [vmem:[%s2816_s1 + $0x180] sm:$0xff] }
  0x31   :  { %930 = vmatmul.bf16.gmra.mxu0 %v1444_v0  ;;  %1263 = vmatpush.bf16.msrb.mxu3 %v2045_v6  ;;  %v1572_v0 = vor.u32 %v1965_v57, %v1571_v56  ;;  %v2041_v6 = vld [vmem:[%s2816_s1 + $0x1c0] sm:$0xff]  ;;  %v1459_v57 = vld [vmem:[%s2818_s0 + $0x50] sm:$0xf] }
  0x32   :  { %979 = vmatmul.bf16.gmra.mxu1 %v1448_v1  ;;  %1117 = vmatpush.bf16.msrb.mxu0 %v2020_v21  ;;  %v1576_v1 = vor.u32 %v1961_v58, %v1573_v59  ;;  %v1981_v21 = vld [vmem:[%s2818_s0 + $0x1dc] sm:$0xf0]  ;;  %v1935_v58 = vld [vmem:[%s2818_s0 + $0x6c] sm:$0xf0]  ;;  %v1931_v59 = vld [vmem:[%s2818_s0 + $0x54] sm:$0xf] }
  0x33   :  { %1028 = vmatmul.bf16.gmra.mxu2 %v1452_v2  ;;  %1166 = vmatpush.bf16.msrb.mxu1 %v2028_v23  ;;  %v1580_v2 = vor.u32 %v1966_v61, %v1579_v60  ;;  %v1637_v23 = vld [vmem:[%s2818_s0 + $0x1e0] sm:$0xf0]  ;;  %v1461_v60 = vld [vmem:[%s2818_s0 + $0x70] sm:$0xf0]  ;;  %v1467_v61 = vld [vmem:[%s2818_s0 + $0x58] sm:$0xf] }
  0x34   :  { %1077 = vmatmul.bf16.gmra.mxu3 %v1456_v3  ;;  %1215 = vmatpush.bf16.msrb.mxu2 %v2036_v20  ;;  %v1584_v3 = vor.u32 %v1962_v62, %v1581_v63  ;;  %v1635_v20 = vld [vmem:[%s2818_s0 + $0x1c0] sm:$0xf]  ;;  %v1936_v62 = vld [vmem:[%s2818_s0 + $0x74] sm:$0xf0]  ;;  %v1932_v63 = vld [vmem:[%s2818_s0 + $0x5c] sm:$0xf] }
  0x35   :  { %1264 = vmatpush.bf16.msrb.mxu3 %v2044_v22  ;;  %v1977_v22 = vld [vmem:[%s2818_s0 + $0x1c4] sm:$0xf]  ;;  %v1636_v28 = vor.u32 %v1981_v21, %v1635_v20  ;;  %v1491_v21 = vld [vmem:[%s2818_s0 + $0x90] sm:$0xf] }
  0x36   :  { %1118 = vmatpush.bf16.msrb.mxu0 %v2019_v37  ;;  %v1640_v29 = vor.u32 %v1977_v22, %v1637_v23  ;;  %v1435_v37 = vld [vmem:[%s2818_s0 + $0x18] sm:$0xf]  ;;  %v1943_v22 = vld [vmem:[%s2818_s0 + $0xac] sm:$0xf0]  ;;  %v1939_v23 = vld [vmem:[%s2818_s0 + $0x94] sm:$0xf] }
  0x37   :  { %1167 = vmatpush.bf16.msrb.mxu1 %v2027_v39  ;;  %v1924_v39 = vld [vmem:[%s2818_s0 + $0x1c] sm:$0xf] }
  0x38   :  { %1216 = vmatpush.bf16.msrb.mxu2 %v2035_v36  ;;  %v1429_v36 = vld [vmem:[%s2818_s0 + $0x30] sm:$0xf0]  ;;  %v1440_v46 = vor.u32 %v1924_v39, %v1437_v40 }
  0x39   :  { %1265 = vmatpush.bf16.msrb.mxu3 %v2043_v38  ;;  %v1928_v38 = vld [vmem:[%s2818_s0 + $0x34] sm:$0xf0] }
  0x3a   :  { %1119 = vmatpush.bf16.msrb.mxu0 %v2018_v53  ;;  %v1436_v45 = vor.u32 %v1928_v38, %v1435_v37  ;;  %v1500_v37 = vor.u32 %v1944_v26, %v1499_v25 }
  0x3b   :  { %1168 = vmatpush.bf16.msrb.mxu1 %v2026_v55 }
  0x3c   :  { %1217 = vmatpush.bf16.msrb.mxu2 %v2034_v52 }
  0x3d   :  { %1266 = vmatpush.bf16.msrb.mxu3 %v2042_v54 }
  0x3e   :  { %1120 = vmatpush.bf16.msrb.mxu0 %v2017_v5 }
  0x3f   :  { %1169 = vmatpush.bf16.msrb.mxu1 %v2025_v7 }
  0x40   :  { %1218 = vmatpush.bf16.msrb.mxu2 %v2033_v4  ;;  %v1464_v4 = vor.u32 %v1931_v59, %v1461_v60 }
  0x41   :  { %935 = vmatmul.bf16.gmra.mxu0 %v1476_v16  ;;  %1267 = vmatpush.bf16.msrb.mxu3 %v2041_v6  ;;  %v1604_v16 = vor.u32 %v1973_v9, %v1603_v8  ;;  %v1468_v8 = vor.u32 %v1936_v62, %v1467_v61 }
  0x42   :  { %984 = vmatmul.bf16.gmra.mxu1 %v1480_v17  ;;  %v1608_v17 = vor.u32 %v1969_v10, %v1605_v11 }
  0x43   :  { %1033 = vmatmul.bf16.gmra.mxu2 %v1484_v18  ;;  %v1612_v18 = vor.u32 %v1974_v13, %v1611_v12 }
  0x44   :  { %1082 = vmatmul.bf16.gmra.mxu3 %v1488_v19  ;;  %v1616_v19 = vor.u32 %v1970_v14, %v1613_v15 }
  0x51   :  { %940 = vmatmul.bf16.gmra.mxu0 %v1508_v32  ;;  %v2462_v32 = vld [vmem:[%s2817_s2] ss:$0 sm:$0xff] }
  0x52   :  { %989 = vmatmul.bf16.gmra.mxu1 %v1512_v33  ;;  %v1427_v33 = vld [vmem:[%s2818_s0 + $0x10] sm:$0xf] }
  0x53   :  { %1038 = vmatmul.bf16.gmra.mxu2 %v1516_v34  ;;  %v1927_v34 = vld [vmem:[%s2818_s0 + $0x2c] sm:$0xf0] }
  0x54   :  { %1087 = vmatmul.bf16.gmra.mxu3 %v1520_v35  ;;  %v1923_v35 = vld [vmem:[%s2818_s0 + $0x14] sm:$0xf]  ;;  %v1428_v41 = vor.u32 %v1927_v34, %v1427_v33  ;;  %v1496_v33 = vor.u32 %v1939_v23, %v1493_v24  ;;  %v1956_v23 = vld [vmem:[%s2818_s0 + $0x11c] sm:$0xf] }
  0x55   :  { %v1432_v42 = vor.u32 %v1923_v35, %v1429_v36  ;;  %v1565_v24 = vld [vmem:[%s2818_s0 + $0x138] sm:$0xf0] }
  0x61   :  { %945 = vmatmul.bf16.gmra.mxu0 %v1540_v48 }
  0x62   :  { %994 = vmatmul.bf16.gmra.mxu1 %v1544_v49 }
  0x63   :  { %1043 = vmatmul.bf16.gmra.mxu2 %v1548_v50 }
  0x64   :  { %1092 = vmatmul.bf16.gmra.mxu3 %v1552_v51 }
  0x71   :  { %950 = vmatmul.bf16.gmra.mxu0 %v1572_v0  ;;  %v1469_v0 = vld [vmem:[%s2818_s0 + $0x78] sm:$0xf0] }
  0x72   :  { %999 = vmatmul.bf16.gmra.mxu1 %v1576_v1  ;;  %v1472_v9 = vor.u32 %v1932_v63, %v1469_v0 }
  0x73   :  { %1048 = vmatmul.bf16.gmra.mxu2 %v1580_v2 }
  0x74   :  { %1097 = vmatmul.bf16.gmra.mxu3 %v1584_v3  ;;  %v1460_v3 = vor.u32 %v1935_v58, %v1459_v57  ;;  %v1948_v57 = vld [vmem:[%s2818_s0 + $0xdc] sm:$0xf] }
  0x75   :  { %v1533_v58 = vld [vmem:[%s2818_s0 + $0xf8] sm:$0xf0] }
  0x81   :  { %955 = vmatmul.bf16.gmra.mxu0 %v1604_v16 }
  0x82   :  { %1004 = vmatmul.bf16.gmra.mxu1 %v1608_v17 }
  0x83   :  { %1053 = vmatmul.bf16.gmra.mxu2 %v1612_v18 }
  0x84   :  { %1102 = vmatmul.bf16.gmra.mxu3 %v1616_v19 }
  0x91   :  { %960 = vmatmul.bf16.gmra.mxu0 %v1636_v28  ;;  %v1501_v28 = vld [vmem:[%s2818_s0 + $0xb8] sm:$0xf0] }
  0x92   :  { %1009 = vmatmul.bf16.gmra.mxu1 %v1640_v29  ;;  %v1504_v38 = vor.u32 %v1940_v27, %v1501_v28 }
  0x93   :  { %1058 = vmatmul.bf16.gmra.mxu2 %v1644_v30 }
  0x94   :  { %1107 = vmatmul.bf16.gmra.mxu3 %v1648_v31  ;;  %v1492_v31 = vor.u32 %v1943_v22, %v1491_v21  ;;  %v1563_v21 = vld [vmem:[%s2818_s0 + $0x118] sm:$0xf] }
  0x95   :  { %v1960_v22 = vld [vmem:[%s2818_s0 + $0x134] sm:$0xf0] }
  0x9e   :  { %v926_v43 = vpop.f32.mrf.mxu0 }
  0x9f   :  { %v975_v44 = vpop.f32.mrf.mxu1  ;;  %v927_v47 = vadd.f32 %v2462_v32, %v926_v43 }
  0xa1   :  { %v976_v48 = vadd.f32 %v975_v44, %v927_v47  ;;  %1121 = vmatmul.bf16.vlgmr.msrb.gmra.mxu0 %v1428_v41 }
  0xa2   :  { %1170 = vmatmul.bf16.vlgmr.msrb.gmra.mxu1 %v1432_v42 }
  0xa3   :  { %1219 = vmatmul.bf16.vlgmr.msrb.gmra.mxu2 %v1436_v45 }
  0xa4   :  { %1268 = vmatmul.bf16.vlgmr.msrb.gmra.mxu3 %v1440_v46 }
  0xa6   :  { %v1024_v49 = vpop.f32.mrf.mxu2  ;;  %v928_v52 = vpop.f32.mrf.mxu0 }
  0xa7   :  { %v1073_v50 = vpop.f32.mrf.mxu3  ;;  %v1025_v51 = vadd.f32 %v1024_v49, %v976_v48  ;;  %v977_v53 = vpop.f32.mrf.mxu1  ;;  %v929_v54 = vadd.f32 %v2462_v32, %v928_v52  ;;  %v1947_v52 = vld [vmem:[%s2818_s0 + $0xd4] sm:$0xf] }
  0xa9   :  { %v2490_v55 = vadd.f32 %v1073_v50, %v1025_v51  ;;  %v978_v56 = vadd.f32 %v977_v53, %v929_v54  ;;  %v1523_v50 = vld [vmem:[%s2818_s0 + $0xd0] sm:$0xf]  ;;  %v1525_v53 = vld [vmem:[%s2818_s0 + $0xf0] sm:$0xf0]  ;;  %v1531_v54 = vld [vmem:[%s2818_s0 + $0xd8] sm:$0xf] }
  0xaa   :  { %v1951_v51 = vld [vmem:[%s2818_s0 + $0xec] sm:$0xf0]  ;;  %v1528_v62 = vor.u32 %v1947_v52, %v1525_v53  ;;  %v1595_v52 = vld [vmem:[%s2818_s0 + $0x158] sm:$0xf] }
  0xab   :  { %v1524_v61 = vor.u32 %v1951_v51, %v1523_v50  ;;  %v1963_v50 = vld [vmem:[%s2818_s0 + $0x154] sm:$0xf]  ;;  %v1968_v53 = vld [vmem:[%s2818_s0 + $0x174] sm:$0xf0] }
  0xac   :  { %v1589_v51 = vld [vmem:[%s2818_s0 + $0x170] sm:$0xf0] }
  0xae   :  { %v1026_v1 = vpop.f32.mrf.mxu2  ;;  %v931_v6 = vpop.f32.mrf.mxu0 }
  0xaf   :  { %v1075_v2 = vpop.f32.mrf.mxu3  ;;  %v1027_v5 = vadd.f32 %v1026_v1, %v978_v56  ;;  %v980_v7 = vpop.f32.mrf.mxu1  ;;  %v932_v10 = vadd.f32 %v2462_v32, %v931_v6  ;;  %v1952_v56 = vld [vmem:[%s2818_s0 + $0xf4] sm:$0xf0] }
  0xb1   :  { %v2517_v11 = vadd.f32 %v1075_v2, %v1027_v5  ;;  %v981_v12 = vadd.f32 %v980_v7, %v932_v10  ;;  %1126 = vmatmul.bf16.gmra.mxu0 %v1460_v3  ;;  %v1532_v2 = vor.u32 %v1952_v56, %v1531_v54  ;;  %v1536_v3 = vor.u32 %v1948_v57, %v1533_v58  ;;  %v1964_v54 = vld [vmem:[%s2818_s0 + $0x15c] sm:$0xf] }
  0xb2   :  { %1175 = vmatmul.bf16.gmra.mxu1 %v1464_v4  ;;  %v1597_v56 = vld [vmem:[%s2818_s0 + $0x178] sm:$0xf0] }
  0xb3   :  { %1224 = vmatmul.bf16.gmra.mxu2 %v1468_v8 }
  0xb4   :  { %1273 = vmatmul.bf16.gmra.mxu3 %v1472_v9 }
  0xb6   :  { %v1029_v13 = vpop.f32.mrf.mxu2  ;;  %v933_v16 = vpop.f32.mrf.mxu0 }
  0xb7   :  { %v1078_v14 = vpop.f32.mrf.mxu3  ;;  %v1030_v15 = vadd.f32 %v1029_v13, %v981_v12  ;;  %v982_v17 = vpop.f32.mrf.mxu1  ;;  %v934_v18 = vadd.f32 %v2462_v32, %v933_v16  ;;  %v1555_v16 = vld [vmem:[%s2818_s0 + $0x110] sm:$0xf] }
  0xb9   :  { %v2520_v19 = vadd.f32 %v1078_v14, %v1030_v15  ;;  %v983_v20 = vadd.f32 %v982_v17, %v934_v18  ;;  %v1959_v17 = vld [vmem:[%s2818_s0 + $0x12c] sm:$0xf0]  ;;  %v1955_v18 = vld [vmem:[%s2818_s0 + $0x114] sm:$0xf] }
  0xba   :  { %v1556_v27 = vor.u32 %v1959_v17, %v1555_v16  ;;  %v1619_v16 = vld [vmem:[%s2818_s0 + $0x190] sm:$0xf] }
  0xbb   :  { %v1975_v17 = vld [vmem:[%s2818_s0 + $0x1ac] sm:$0xf0] }
  0xbe   :  { %v1031_v29 = vpop.f32.mrf.mxu2  ;;  %v936_v35 = vpop.f32.mrf.mxu0 }
  0xbf   :  { %v1080_v30 = vpop.f32.mrf.mxu3  ;;  %v1032_v34 = vadd.f32 %v1031_v29, %v983_v20  ;;  %v985_v36 = vpop.f32.mrf.mxu1  ;;  %v937_v39 = vadd.f32 %v2462_v32, %v936_v35  ;;  %v1557_v20 = vld [vmem:[%s2818_s0 + $0x130] sm:$0xf0] }
  0xc0   :  { %v1560_v28 = vor.u32 %v1955_v18, %v1557_v20  ;;  %v1971_v18 = vld [vmem:[%s2818_s0 + $0x194] sm:$0xf] }
  0xc1   :  { %v2547_v40 = vadd.f32 %v1080_v30, %v1032_v34  ;;  %v986_v41 = vadd.f32 %v985_v36, %v937_v39  ;;  %1131 = vmatmul.bf16.gmra.mxu0 %v1492_v31  ;;  %v1568_v34 = vor.u32 %v1956_v23, %v1565_v24  ;;  %v1621_v20 = vld [vmem:[%s2818_s0 + $0x1b0] sm:$0xf0]  ;;  %v1972_v23 = vld [vmem:[%s2818_s0 + $0x19c] sm:$0xf] }
  0xc2   :  { %1180 = vmatmul.bf16.gmra.mxu1 %v1496_v33  ;;  %v1564_v33 = vor.u32 %v1960_v22, %v1563_v21  ;;  %v1627_v21 = vld [vmem:[%s2818_s0 + $0x198] sm:$0xf]  ;;  %v1629_v24 = vld [vmem:[%s2818_s0 + $0x1b8] sm:$0xf0] }
  0xc3   :  { %1229 = vmatmul.bf16.gmra.mxu2 %v1500_v37  ;;  %v1976_v22 = vld [vmem:[%s2818_s0 + $0x1b4] sm:$0xf0] }
  0xc4   :  { %1278 = vmatmul.bf16.gmra.mxu3 %v1504_v38 }
  0xc6   :  { %v1034_v42 = vpop.f32.mrf.mxu2  ;;  %v938_v45 = vpop.f32.mrf.mxu0 }
  0xc7   :  { %v1083_v43 = vpop.f32.mrf.mxu3  ;;  %v1035_v44 = vadd.f32 %v1034_v42, %v986_v41  ;;  %v987_v46 = vpop.f32.mrf.mxu1  ;;  %v939_v47 = vadd.f32 %v2462_v32, %v938_v45 }
  0xc9   :  { %v2550_v48 = vadd.f32 %v1083_v43, %v1035_v44  ;;  %v988_v49 = vadd.f32 %v987_v46, %v939_v47  ;;  %v1587_v47 = vld [vmem:[%s2818_s0 + $0x150] sm:$0xf] }
  0xce   :  { %v1036_v59 = vpop.f32.mrf.mxu2  ;;  %v941_v0 = vpop.f32.mrf.mxu0 }
  0xcf   :  { %v1085_v60 = vpop.f32.mrf.mxu3  ;;  %v1037_v63 = vadd.f32 %v1036_v59, %v988_v49  ;;  %v990_v1 = vpop.f32.mrf.mxu1  ;;  %v942_v4 = vadd.f32 %v2462_v32, %v941_v0  ;;  %v1967_v49 = vld [vmem:[%s2818_s0 + $0x16c] sm:$0xf0]  ;;  %v1596_v0 = vor.u32 %v1968_v53, %v1595_v52  ;;  %v1979_v52 = vld [vmem:[%s2818_s0 + $0x1d4] sm:$0xf] }
  0xd0   :  { %v1588_v59 = vor.u32 %v1967_v49, %v1587_v47  ;;  %v1653_v53 = vld [vmem:[%s2818_s0 + $0x1f0] sm:$0xf0] }
  0xd1   :  { %v2577_v5 = vadd.f32 %v1085_v60, %v1037_v63  ;;  %v991_v6 = vadd.f32 %v990_v1, %v942_v4  ;;  %1136 = vmatmul.bf16.gmra.mxu0 %v1524_v61  ;;  %v1592_v60 = vor.u32 %v1963_v50, %v1589_v51  ;;  %v1600_v1 = vor.u32 %v1964_v54, %v1597_v56  ;;  %v1651_v50 = vld [vmem:[%s2818_s0 + $0x1d0] sm:$0xf]  ;;  %v1659_v54 = vld [vmem:[%s2818_s0 + $0x1d8] sm:$0xf] }
  0xd2   :  { %1185 = vmatmul.bf16.gmra.mxu1 %v1528_v62  ;;  %v1983_v51 = vld [vmem:[%s2818_s0 + $0x1ec] sm:$0xf0]  ;;  %v1984_v56 = vld [vmem:[%s2818_s0 + $0x1f4] sm:$0xf0] }
  0xd3   :  { %1234 = vmatmul.bf16.gmra.mxu2 %v1532_v2 }
  0xd4   :  { %1283 = vmatmul.bf16.gmra.mxu3 %v1536_v3 }
  0xd6   :  { %v1039_v7 = vpop.f32.mrf.mxu2  ;;  %v943_v10 = vpop.f32.mrf.mxu0 }
  0xd7   :  { %v1088_v8 = vpop.f32.mrf.mxu3  ;;  %v1040_v9 = vadd.f32 %v1039_v7, %v991_v6  ;;  %v992_v12 = vpop.f32.mrf.mxu1  ;;  %v944_v13 = vadd.f32 %v2462_v32, %v943_v10 }
  0xd9   :  { %v2580_v14 = vadd.f32 %v1088_v8, %v1040_v9  ;;  %v993_v15 = vadd.f32 %v992_v12, %v944_v13 }
  0xde   :  { %v1041_v25 = vpop.f32.mrf.mxu2  ;;  %v946_v30 = vpop.f32.mrf.mxu0 }
  0xdf   :  { %v1090_v26 = vpop.f32.mrf.mxu3  ;;  %v1042_v29 = vadd.f32 %v1041_v25, %v993_v15  ;;  %v995_v31 = vpop.f32.mrf.mxu1  ;;  %v947_v35 = vadd.f32 %v2462_v32, %v946_v30 }
  0xe1   :  { %v2607_v36 = vadd.f32 %v1090_v26, %v1042_v29  ;;  %v996_v37 = vadd.f32 %v995_v31, %v947_v35  ;;  %1141 = vmatmul.bf16.gmra.mxu0 %v1556_v27  ;;  %v1620_v27 = vor.u32 %v1975_v17, %v1619_v16 }
  0xe2   :  { %1190 = vmatmul.bf16.gmra.mxu1 %v1560_v28  ;;  %v1624_v28 = vor.u32 %v1971_v18, %v1621_v20 }
  0xe3   :  { %1239 = vmatmul.bf16.gmra.mxu2 %v1564_v33  ;;  %v1628_v33 = vor.u32 %v1976_v22, %v1627_v21 }
  0xe4   :  { %1288 = vmatmul.bf16.gmra.mxu3 %v1568_v34  ;;  %v1632_v34 = vor.u32 %v1972_v23, %v1629_v24 }
  0xe6   :  { %v1044_v38 = vpop.f32.mrf.mxu2  ;;  %v948_v42 = vpop.f32.mrf.mxu0 }
  0xe7   :  { %v1093_v39 = vpop.f32.mrf.mxu3  ;;  %v1045_v41 = vadd.f32 %v1044_v38, %v996_v37  ;;  %v997_v43 = vpop.f32.mrf.mxu1  ;;  %v949_v44 = vadd.f32 %v2462_v32, %v948_v42 }
  0xe9   :  { %v2610_v45 = vadd.f32 %v1093_v39, %v1045_v41  ;;  %v998_v46 = vadd.f32 %v997_v43, %v949_v44 }
  0xee   :  { %v1046_v57 = vpop.f32.mrf.mxu2  ;;  %v951_v62 = vpop.f32.mrf.mxu0 }
  0xef   :  { %v1095_v58 = vpop.f32.mrf.mxu3  ;;  %v1047_v61 = vadd.f32 %v1046_v57, %v998_v46  ;;  %v1000_v63 = vpop.f32.mrf.mxu1  ;;  %v952_v2 = vadd.f32 %v2462_v32, %v951_v62  ;;  %v1980_v57 = vld [vmem:[%s2818_s0 + $0x1dc] sm:$0xf]  ;;  %v1656_v62 = vor.u32 %v1979_v52, %v1653_v53  ;;  %v1358_v53 = vld [vmem:[%s2819_s3 + $0x8] sm:$0xff] }
  0xf1   :  { %v2637_v3 = vadd.f32 %v1095_v58, %v1047_v61  ;;  %v1001_v4 = vadd.f32 %v1000_v63, %v952_v2  ;;  %1146 = vmatmul.bf16.gmra.mxu0 %v1588_v59  ;;  %v1661_v58 = vld [vmem:[%s2818_s0 + $0x1f8] sm:$0xf0]  ;;  %v1652_v61 = vor.u32 %v1983_v51, %v1651_v50  ;;  %v1660_v2 = vor.u32 %v1984_v56, %v1659_v54 }
  0xf2   :  { %1195 = vmatmul.bf16.gmra.mxu1 %v1592_v60 }
  0xf3   :  { %1244 = vmatmul.bf16.gmra.mxu2 %v1596_v0 }
  0xf4   :  { %1293 = vmatmul.bf16.gmra.mxu3 %v1600_v1 }
  0xf6   :  { %v1049_v6 = vpop.f32.mrf.mxu2  ;;  %v953_v9 = vpop.f32.mrf.mxu0 }
  0xf7   :  { %v1098_v7 = vpop.f32.mrf.mxu3  ;;  %v1050_v8 = vadd.f32 %v1049_v6, %v1001_v4  ;;  %v1002_v10 = vpop.f32.mrf.mxu1  ;;  %v954_v12 = vadd.f32 %v2462_v32, %v953_v9  ;;  %v1664_v4 = vor.u32 %v1980_v57, %v1661_v58 }
  0xf9   :  { %v2640_v13 = vadd.f32 %v1098_v7, %v1050_v8  ;;  %v1003_v15 = vadd.f32 %v1002_v10, %v954_v12 }
  0xfe   :  { %v1051_v25 = vpop.f32.mrf.mxu2  ;;  %v956_v30 = vpop.f32.mrf.mxu0 }
  0xff   :  { %v1100_v26 = vpop.f32.mrf.mxu3  ;;  %v1052_v29 = vadd.f32 %v1051_v25, %v1003_v15  ;;  %v1005_v31 = vpop.f32.mrf.mxu1  ;;  %v957_v35 = vadd.f32 %v2462_v32, %v956_v30 }
 0x101   :  { %v2667_v37 = vadd.f32 %v1100_v26, %v1052_v29  ;;  %v1006_v38 = vadd.f32 %v1005_v31, %v957_v35  ;;  %1151 = vmatmul.bf16.gmra.mxu0 %v1620_v27 }
 0x102   :  { %1200 = vmatmul.bf16.gmra.mxu1 %v1624_v28 }
 0x103   :  { %1249 = vmatmul.bf16.gmra.mxu2 %v1628_v33 }
 0x104   :  { %1298 = vmatmul.bf16.gmra.mxu3 %v1632_v34 }
 0x106   :  { %v1054_v39 = vpop.f32.mrf.mxu2  ;;  %v958_v43 = vpop.f32.mrf.mxu0 }
 0x107   :  { %v1103_v41 = vpop.f32.mrf.mxu3  ;;  %v1055_v42 = vadd.f32 %v1054_v39, %v1006_v38  ;;  %v1007_v44 = vpop.f32.mrf.mxu1  ;;  %v959_v46 = vadd.f32 %v2462_v32, %v958_v43  ;;  %v1357_v39 = vld [vmem:[%s2819_s3] sm:$0xff] }
 0x109   :  { %v2670_v47 = vadd.f32 %v1103_v41, %v1055_v42  ;;  %v1008_v49 = vadd.f32 %v1007_v44, %v959_v46 }
 0x10e   :  { %v1056_v59 = vpop.f32.mrf.mxu2  ;;  %v961_v0 = vpop.f32.mrf.mxu0 }
 0x10f   :  { %v1105_v60 = vpop.f32.mrf.mxu3  ;;  %v1057_v63 = vadd.f32 %v1056_v59, %v1008_v49  ;;  %v1010_v1 = vpop.f32.mrf.mxu1  ;;  %v962_v6 = vadd.f32 %v2462_v32, %v961_v0 }
 0x111   :  { %v2697_v7 = vadd.f32 %v1105_v60, %v1057_v63  ;;  %v1011_v8 = vadd.f32 %v1010_v1, %v962_v6  ;;  %1156 = vmatmul.bf16.gmra.mxu0 %v1652_v61  ;;  %v1359_v1 = vld [vmem:[%s2819_s3 + $0x10] sm:$0xff] }
 0x112   :  { %1205 = vmatmul.bf16.gmra.mxu1 %v1656_v62 }
 0x113   :  { %1254 = vmatmul.bf16.gmra.mxu2 %v1660_v2 }
 0x114   :  { %1303 = vmatmul.bf16.gmra.mxu3 %v1664_v4 }
 0x116   :  { %v1059_v9 = vpop.f32.mrf.mxu2  ;;  %v963_v15 = vpop.f32.mrf.mxu0 }
 0x117   :  { %v1108_v10 = vpop.f32.mrf.mxu3  ;;  %v1060_v12 = vadd.f32 %v1059_v9, %v1011_v8  ;;  %v1012_v16 = vpop.f32.mrf.mxu1  ;;  %v964_v17 = vadd.f32 %v2462_v32, %v963_v15 }
 0x119   :  { %v2700_v18 = vadd.f32 %v1108_v10, %v1060_v12  ;;  %v1013_v20 = vadd.f32 %v1012_v16, %v964_v17 }
 0x11e   :  { %v1061_v21 = vpop.f32.mrf.mxu2  ;;  %v1122_v24 = vpop.f32.mrf.mxu0 }
 0x11f   :  { %v1110_v22 = vpop.f32.mrf.mxu3  ;;  %v1062_v23 = vadd.f32 %v1061_v21, %v1013_v20  ;;  %v1171_v25 = vpop.f32.mrf.mxu1  ;;  %v1123_v27 = vadd.f32 %v1122_v24, %v2490_v55  ;;  %v1360_v20 = vld [vmem:[%s2819_s3 + $0x18] sm:$0xff] }
 0x121   :  { %v2702_v26 = vadd.f32 %v1110_v22, %v1062_v23  ;;  %v1172_v28 = vadd.f32 %v1171_v25, %v1123_v27 }
 0x126   :  { %v1220_v29 = vpop.f32.mrf.mxu2  ;;  %v1124_v33 = vpop.f32.mrf.mxu0 }
 0x127   :  { %v1269_v30 = vpop.f32.mrf.mxu3  ;;  %v1221_v31 = vadd.f32 %v1220_v29, %v1172_v28  ;;  %v1173_v34 = vpop.f32.mrf.mxu1  ;;  %v1125_v32 = vadd.f32 %v1124_v33, %v2517_v11  ;;  %v1361_v33 = vld [vmem:[%s2819_s3 + $0x20] sm:$0xff] }
 0x129   :  { %v1270_v35 = vadd.f32 %v1269_v30, %v1221_v31  ;;  %v1174_v42 = vadd.f32 %v1173_v34, %v1125_v32 }
 0x12b   :  { %vm1309_vm0 = vcmp.ge.f32.partialorder %v1270_v35, 0.0  ;;  %v1325_v38 = vmul.f32 0.25, %v1270_v35 }
 0x12d   :  { %v1341_v41 = vsel %vm1309_vm0, %v1270_v35, %v1325_v38 }
 0x12e   :  { %v1373_v43 = vadd.f32 %v1357_v39, %v1341_v41  ;;  %v1222_v44 = vpop.f32.mrf.mxu2  ;;  %v1127_v49 = vpop.f32.mrf.mxu0 }
 0x12f   :  { %v1271_v55 = vpop.f32.mrf.mxu3  ;;  %v1223_v46 = vadd.f32 %v1222_v44, %v1174_v42  ;;  %v1176_v50 = vpop.f32.mrf.mxu1  ;;  %v1128_v11 = vadd.f32 %v1127_v49, %v2520_v19 }
 0x130   :  { %1389 = vst [vmem:[%s2820_s4] sm:$0xff] %v1373_v43 }
 0x131   :  { %v1272_v51 = vadd.f32 %v1271_v55, %v1223_v46  ;;  %v1177_v56 = vadd.f32 %v1176_v50, %v1128_v11  ;;  %v1362_v46 = vld [vmem:[%s2819_s3 + $0x28] sm:$0xff] }
 0x133   :  { %vm1310_vm1 = vcmp.ge.f32.partialorder %v1272_v51, 0.0  ;;  %v1326_v52 = vmul.f32 0.25, %v1272_v51 }
 0x135   :  { %v1342_v54 = vsel %vm1310_vm1, %v1272_v51, %v1326_v52 }
 0x136   :  { %v1374_v57 = vadd.f32 %v1358_v53, %v1342_v54  ;;  %v1225_v58 = vpop.f32.mrf.mxu2  ;;  %v1129_v61 = vpop.f32.mrf.mxu0 }
 0x137   :  { %v1274_v59 = vpop.f32.mrf.mxu3  ;;  %v1226_v60 = vadd.f32 %v1225_v58, %v1177_v56  ;;  %v1178_v62 = vpop.f32.mrf.mxu1  ;;  %v1130_v19 = vadd.f32 %v1129_v61, %v2547_v40 }
 0x138   :  { %1390 = vst [vmem:[%s2820_s4 + $0x8] sm:$0xff] %v1374_v57 }
 0x139   :  { %v1275_v63 = vadd.f32 %v1274_v59, %v1226_v60  ;;  %v1179_v4 = vadd.f32 %v1178_v62, %v1130_v19  ;;  %v1363_v59 = vld [vmem:[%s2819_s3 + $0x30] sm:$0xff] }
 0x13b   :  { %vm1311_vm2 = vcmp.ge.f32.partialorder %v1275_v63, 0.0  ;;  %v1327_v0 = vmul.f32 0.25, %v1275_v63 }
 0x13d   :  { %v1343_v2 = vsel %vm1311_vm2, %v1275_v63, %v1327_v0 }
 0x13e   :  { %v1375_v6 = vadd.f32 %v1359_v1, %v1343_v2  ;;  %v1227_v8 = vpop.f32.mrf.mxu2  ;;  %v1132_v12 = vpop.f32.mrf.mxu0 }
 0x13f   :  { %v1276_v9 = vpop.f32.mrf.mxu3  ;;  %v1228_v10 = vadd.f32 %v1227_v8, %v1179_v4  ;;  %v1181_v15 = vpop.f32.mrf.mxu1  ;;  %v1133_v40 = vadd.f32 %v1132_v12, %v2550_v48  ;;  %v1364_v8 = vld [vmem:[%s2819_s3 + $0x38] sm:$0xff] }
 0x140   :  { %1391 = vst [vmem:[%s2820_s4 + $0x10] sm:$0xff] %v1375_v6 }
 0x141   :  { %v1277_v16 = vadd.f32 %v1276_v9, %v1228_v10  ;;  %v1182_v22 = vadd.f32 %v1181_v15, %v1133_v40 }
 0x143   :  { %vm1312_vm3 = vcmp.ge.f32.partialorder %v1277_v16, 0.0  ;;  %v1328_v17 = vmul.f32 0.25, %v1277_v16 }
 0x145   :  { %v1344_v21 = vsel %vm1312_vm3, %v1277_v16, %v1328_v17 }
 0x146   :  { %v1376_v23 = vadd.f32 %v1360_v20, %v1344_v21  ;;  %v1230_v24 = vpop.f32.mrf.mxu2  ;;  %v1134_v28 = vpop.f32.mrf.mxu0 }
 0x147   :  { %v1279_v25 = vpop.f32.mrf.mxu3  ;;  %v1231_v27 = vadd.f32 %v1230_v24, %v1182_v22  ;;  %v1183_v29 = vpop.f32.mrf.mxu1  ;;  %v1135_v48 = vadd.f32 %v1134_v28, %v2577_v5 }
 0x148   :  { %1392 = vst [vmem:[%s2820_s4 + $0x18] sm:$0xff] %v1376_v23  ;;  %v1365_v23 = vld [vmem:[%s2819_s3 + $0x40] sm:$0xff] }
 0x149   :  { %v1280_v30 = vadd.f32 %v1279_v25, %v1231_v27  ;;  %v1184_v35 = vadd.f32 %v1183_v29, %v1135_v48 }
 0x14b   :  { %vm1313_vm4 = vcmp.ge.f32.partialorder %v1280_v30, 0.0  ;;  %v1329_v31 = vmul.f32 0.25, %v1280_v30 }
 0x14d   :  { %v1345_v34 = vsel %vm1313_vm4, %v1280_v30, %v1329_v31 }
 0x14e   :  { %v1377_v32 = vadd.f32 %v1361_v33, %v1345_v34  ;;  %v1232_v38 = vpop.f32.mrf.mxu2  ;;  %v1137_v42 = vpop.f32.mrf.mxu0 }
 0x14f   :  { %v1281_v39 = vpop.f32.mrf.mxu3  ;;  %v1233_v41 = vadd.f32 %v1232_v38, %v1184_v35  ;;  %v1186_v43 = vpop.f32.mrf.mxu1  ;;  %v1138_v5 = vadd.f32 %v1137_v42, %v2580_v14  ;;  %v1366_v35 = vld [vmem:[%s2819_s3 + $0x48] sm:$0xff] }
 0x150   :  { %1393 = vst [vmem:[%s2820_s4 + $0x20] sm:$0xff] %v1377_v32 }
 0x151   :  { %v1282_v44 = vadd.f32 %v1281_v39, %v1233_v41  ;;  %v1187_v50 = vadd.f32 %v1186_v43, %v1138_v5 }
 0x153   :  { %vm1314_vm5 = vcmp.ge.f32.partialorder %v1282_v44, 0.0  ;;  %v1330_v55 = vmul.f32 0.25, %v1282_v44 }
 0x155   :  { %v1346_v49 = vsel %vm1314_vm5, %v1282_v44, %v1330_v55 }
 0x156   :  { %v1378_v51 = vadd.f32 %v1362_v46, %v1346_v49  ;;  %v1235_v11 = vpop.f32.mrf.mxu2  ;;  %v1139_v54 = vpop.f32.mrf.mxu0  ;;  %v1367_v49 = vld [vmem:[%s2819_s3 + $0x50] sm:$0xff] }
 0x157   :  { %v1284_v52 = vpop.f32.mrf.mxu3  ;;  %v1236_v53 = vadd.f32 %v1235_v11, %v1187_v50  ;;  %v1188_v56 = vpop.f32.mrf.mxu1  ;;  %v1140_v14 = vadd.f32 %v1139_v54, %v2607_v36 }
 0x158   :  { %1394 = vst [vmem:[%s2820_s4 + $0x28] sm:$0xff] %v1378_v51 }
 0x159   :  { %v1285_v57 = vadd.f32 %v1284_v52, %v1236_v53  ;;  %v1189_v61 = vadd.f32 %v1188_v56, %v1140_v14 }
 0x15b   :  { %vm1315_vm6 = vcmp.ge.f32.partialorder %v1285_v57, 0.0  ;;  %v1331_v58 = vmul.f32 0.25, %v1285_v57 }
 0x15d   :  { %v1347_v60 = vsel %vm1315_vm6, %v1285_v57, %v1331_v58 }
 0x15e   :  { %v1379_v62 = vadd.f32 %v1363_v59, %v1347_v60  ;;  %v1237_v63 = vpop.f32.mrf.mxu2  ;;  %v1142_v1 = vpop.f32.mrf.mxu0  ;;  %v1368_v59 = vld [vmem:[%s2819_s3 + $0x58] sm:$0xff] }
 0x15f   :  { %v1286_v19 = vpop.f32.mrf.mxu3  ;;  %v1238_v0 = vadd.f32 %v1237_v63, %v1189_v61  ;;  %v1191_v2 = vpop.f32.mrf.mxu1  ;;  %v1143_v36 = vadd.f32 %v1142_v1, %v2610_v45 }
 0x160   :  { %1395 = vst [vmem:[%s2820_s4 + $0x30] sm:$0xff] %v1379_v62 }
 0x161   :  { %v1287_v4 = vadd.f32 %v1286_v19, %v1238_v0  ;;  %v1192_v10 = vadd.f32 %v1191_v2, %v1143_v36 }
 0x163   :  { %vm1316_vm7 = vcmp.ge.f32.partialorder %v1287_v4, 0.0  ;;  %v1332_v6 = vmul.f32 0.25, %v1287_v4 }
 0x165   :  { %v1348_v9 = vsel %vm1316_vm7, %v1287_v4, %v1332_v6  ;;  %v1369_v6 = vld [vmem:[%s2819_s3 + $0x60] sm:$0xff] }
 0x166   :  { %v1380_v12 = vadd.f32 %v1364_v8, %v1348_v9  ;;  %v1240_v15 = vpop.f32.mrf.mxu2  ;;  %v1144_v17 = vpop.f32.mrf.mxu0 }
 0x167   :  { %v1289_v16 = vpop.f32.mrf.mxu3  ;;  %v1241_v40 = vadd.f32 %v1240_v15, %v1192_v10  ;;  %v1193_v20 = vpop.f32.mrf.mxu1  ;;  %v1145_v45 = vadd.f32 %v1144_v17, %v2637_v3 }
 0x168   :  { %1396 = vst [vmem:[%s2820_s4 + $0x38] sm:$0xff] %v1380_v12 }
 0x169   :  { %v1290_v21 = vadd.f32 %v1289_v16, %v1241_v40  ;;  %v1194_v25 = vadd.f32 %v1193_v20, %v1145_v45  ;;  %v1370_v45 = vld [vmem:[%s2819_s3 + $0x68] sm:$0xff] }
 0x16b   :  { %vm1317_vm8 = vcmp.ge.f32.partialorder %v1290_v21, 0.0  ;;  %v1333_v22 = vmul.f32 0.25, %v1290_v21 }
 0x16d   :  { %v1349_v24 = vsel %vm1317_vm8, %v1290_v21, %v1333_v22 }
 0x16e   :  { %v1381_v27 = vadd.f32 %v1365_v23, %v1349_v24  ;;  %v1242_v28 = vpop.f32.mrf.mxu2  ;;  %v1147_v48 = vpop.f32.mrf.mxu0 }
 0x16f   :  { %v1291_v29 = vpop.f32.mrf.mxu3  ;;  %v1243_v30 = vadd.f32 %v1242_v28, %v1194_v25  ;;  %v1196_v31 = vpop.f32.mrf.mxu1  ;;  %v1148_v3 = vadd.f32 %v1147_v48, %v2640_v13 }
 0x170   :  { %1397 = vst [vmem:[%s2820_s4 + $0x40] sm:$0xff] %v1381_v27 }
 0x171   :  { %v1292_v33 = vadd.f32 %v1291_v29, %v1243_v30  ;;  %v1197_v38 = vadd.f32 %v1196_v31, %v1148_v3  ;;  %v1371_v31 = vld [vmem:[%s2819_s3 + $0x70] sm:$0xff] }
 0x173   :  { %vm1318_vm9 = vcmp.ge.f32.partialorder %v1292_v33, 0.0  ;;  %v1334_v34 = vmul.f32 0.25, %v1292_v33 }
 0x175   :  { %v1350_v32 = vsel %vm1318_vm9, %v1292_v33, %v1334_v34 }
 0x176   :  { %v1382_v39 = vadd.f32 %v1366_v35, %v1350_v32  ;;  %v1245_v41 = vpop.f32.mrf.mxu2  ;;  %v1149_v44 = vpop.f32.mrf.mxu0 }
 0x177   :  { %v1294_v42 = vpop.f32.mrf.mxu3  ;;  %v1246_v43 = vadd.f32 %v1245_v41, %v1197_v38  ;;  %v1198_v5 = vpop.f32.mrf.mxu1  ;;  %v1150_v13 = vadd.f32 %v1149_v44, %v2667_v37 }
 0x178   :  { %1398 = vst [vmem:[%s2820_s4 + $0x48] sm:$0xff] %v1382_v39 }
 0x179   :  { %v1295_v55 = vadd.f32 %v1294_v42, %v1246_v43  ;;  %v1199_v51 = vadd.f32 %v1198_v5, %v1150_v13  ;;  %v1372_v42 = vld [vmem:[%s2819_s3 + $0x78] sm:$0xff] }
 0x17b   :  { %vm1319_vm10 = vcmp.ge.f32.partialorder %v1295_v55, 0.0  ;;  %v1335_v46 = vmul.f32 0.25, %v1295_v55 }
 0x17d   :  { %v1351_v50 = vsel %vm1319_vm10, %v1295_v55, %v1335_v46 }
 0x17e   :  { %v1383_v11 = vadd.f32 %v1367_v49, %v1351_v50  ;;  %v1247_v52 = vpop.f32.mrf.mxu2  ;;  %v1152_v56 = vpop.f32.mrf.mxu0 }
 0x17f   :  { %v1296_v53 = vpop.f32.mrf.mxu3  ;;  %v1248_v54 = vadd.f32 %v1247_v52, %v1199_v51  ;;  %v1201_v57 = vpop.f32.mrf.mxu1  ;;  %v1153_v37 = vadd.f32 %v1152_v56, %v2670_v47 }
 0x180   :  { %1399 = vst [vmem:[%s2820_s4 + $0x50] sm:$0xff] %v1383_v11 }
 0x181   :  { %v1297_v14 = vadd.f32 %v1296_v53, %v1248_v54  ;;  %v1202_v61 = vadd.f32 %v1201_v57, %v1153_v37 }
 0x183   :  { %vm1320_vm11 = vcmp.ge.f32.partialorder %v1297_v14, 0.0  ;;  %v1336_v58 = vmul.f32 0.25, %v1297_v14 }
 0x185   :  { %v1352_v60 = vsel %vm1320_vm11, %v1297_v14, %v1336_v58 }
 0x186   :  { %v1384_v62 = vadd.f32 %v1368_v59, %v1352_v60  ;;  %v1250_v63 = vpop.f32.mrf.mxu2  ;;  %v1154_v1 = vpop.f32.mrf.mxu0 }
 0x187   :  { %v1299_v19 = vpop.f32.mrf.mxu3  ;;  %v1251_v0 = vadd.f32 %v1250_v63, %v1202_v61  ;;  %v1203_v2 = vpop.f32.mrf.mxu1  ;;  %v1155_v47 = vadd.f32 %v1154_v1, %v2697_v7 }
 0x188   :  { %1400 = vst [vmem:[%s2820_s4 + $0x58] sm:$0xff] %v1384_v62 }
 0x189   :  { %v1300_v4 = vadd.f32 %v1299_v19, %v1251_v0  ;;  %v1204_v9 = vadd.f32 %v1203_v2, %v1155_v47 }
 0x18b   :  { %vm1321_vm12 = vcmp.ge.f32.partialorder %v1300_v4, 0.0  ;;  %v1337_v36 = vmul.f32 0.25, %v1300_v4 }
 0x18d   :  { %v1353_v8 = vsel %vm1321_vm12, %v1300_v4, %v1337_v36 }
 0x18e   :  { %v1385_v10 = vadd.f32 %v1369_v6, %v1353_v8  ;;  %v1252_v12 = vpop.f32.mrf.mxu2  ;;  %v1157_v40 = vpop.f32.mrf.mxu0 }
 0x18f   :  { %v1301_v15 = vpop.f32.mrf.mxu3  ;;  %v1253_v16 = vadd.f32 %v1252_v12, %v1204_v9  ;;  %v1158_v7 = vadd.f32 %v1157_v40, %v2700_v18  ;;  %v1206_v20 = vpop.f32.mrf.mxu1 }
 0x190   :  { %1401 = vst [vmem:[%s2820_s4 + $0x60] sm:$0xff] %v1385_v10 }
 0x191   :  { %v1302_v17 = vadd.f32 %v1301_v15, %v1253_v16  ;;  %v1207_v23 = vadd.f32 %v1206_v20, %v1158_v7 }
 0x193   :  { %vm1322_vm13 = vcmp.ge.f32.partialorder %v1302_v17, 0.0  ;;  %v1338_v21 = vmul.f32 0.25, %v1302_v17 }
 0x195   :  { %v1354_v22 = vsel %vm1322_vm13, %v1302_v17, %v1338_v21 }
 0x196   :  { %v1386_v24 = vadd.f32 %v1370_v45, %v1354_v22  ;;  %v1255_v25 = vpop.f32.mrf.mxu2  ;;  %v1159_v29 = vpop.f32.mrf.mxu0 }
 0x197   :  { %v1304_v27 = vpop.f32.mrf.mxu3  ;;  %v1256_v28 = vadd.f32 %v1255_v25, %v1207_v23  ;;  %v1160_v18 = vadd.f32 %v1159_v29, %v2702_v26  ;;  %v1208_v33 = vpop.f32.mrf.mxu1 }
 0x198   :  { %1402 = vst [vmem:[%s2820_s4 + $0x68] sm:$0xff] %v1386_v24 }
 0x199   :  { %v1305_v30 = vadd.f32 %v1304_v27, %v1256_v28  ;;  %v1209_v34 = vadd.f32 %v1208_v33, %v1160_v18 }
 0x19b   :  { %vm1323_vm14 = vcmp.ge.f32.partialorder %v1305_v30, 0.0  ;;  %v1339_v48 = vmul.f32 0.25, %v1305_v30 }
 0x19d   :  { %v1355_v3 = vsel %vm1323_vm14, %v1305_v30, %v1339_v48 }
 0x19e   :  { %v1387_v35 = vadd.f32 %v1371_v31, %v1355_v3  ;;  %v1257_v32 = vpop.f32.mrf.mxu2 }
 0x19f   :  { %v1258_v38 = vadd.f32 %v1257_v32, %v1209_v34  ;;  %v1306_v39 = vpop.f32.mrf.mxu3 }
 0x1a0   :  { %1403 = vst [vmem:[%s2820_s4 + $0x70] sm:$0xff] %v1387_v35 }
 0x1a1   :  { %v1307_v41 = vadd.f32 %v1306_v39, %v1258_v38 }
 0x1a3   :  { %vm1324_vm15 = vcmp.ge.f32.partialorder %v1307_v41, 0.0  ;;  %v1340_v26 = vmul.f32 0.25, %v1307_v41 }
 0x1a5   :  { %v1356_v43 = vsel %vm1324_vm15, %v1307_v41, %v1340_v26 }
 0x1a6   :  { %v1388_v44 = vadd.f32 %v1372_v42, %v1356_v43 }
 0x1a8   :  { %1404 = vst [vmem:[%s2820_s4 + $0x78] sm:$0xff] %v1388_v44 }

// kernel: _lambda_.23
= control target key start
LH: loop header
LB: loop body
LE: loop exit
PB: predicated region body
PF: predicated region fallthrough
CT: control target
= control target key end

     0   :  { %s1176_s12 = smov 0   ;;  %s1178_s13 = smov 0   ;;  %s1417_s0 = inlined_call_operand.vmem [shape: bf16[2048,16], index: 0, kind: input, shape index: {}]   ;;  %s1418_s1 = inlined_call_operand.vmem [shape: bf16[16,128], index: 1, kind: input, shape index: {}]   ;;  %s1419_s2 = inlined_call_operand.vmem [shape: f32[1,128], index: 2, kind: input, shape index: {}]   ;;  %s1420_s3 = inlined_call_operand.vmem [shape: f32[2048,128], index: 3, kind: output, shape index: {}]  }
   0x1   :  { %s1180_s14 = smov 0  }
   0x2 LB: > { %s25_s15 = sadd.s32 1, %s1150_s13  ;;  %p900_p0 = scmp.ge.s32.totalorder %s1154_s14, 1  ;;  %s1154_s14 = sphi %s1180_s14, %s13_s14   ;;  %s1150_s13 = sphi %s1178_s13, %s1422_s13   ;;  %s1146_s12 = sphi %s1176_s12, %s1421_s12  }
   0x3   : > { %p27_p1 = scmp.ge.s32.totalorder %s25_s15, 4  ;;  %p169_p2 = scmp.lt.s32.totalorder %s1154_s14, 5 }
   0x5   : > { %s1424_s15 = smov (%p27_p1, %s25_s15), 0  ;;  %p170_p3 = pnand %p900_p0, %p169_p2 }
   0x6   : > { %s901_s18 = sshll.u32 (!%p170_p3), %s1146_s12, 6 }
   0x7   : > { %173 = sbr.rel (%p170_p3) target bundleno = 274 (0x112), region = 32  ;;  %p204_p4 = scmp.lt.s32.totalorder (!%p170_p3), %s901_s18, 255 }
   0xc   : > { %v1103_v0 = vld [vmem:[%s1418_s1] sm:$0xff]  ;;  %s1426_s18 = smov (!%p204_p4, %s901_s18), 255  ;;  %vm462_vm0 = vcmask 130048  }
   0xd   : > { %566 = vmatpush.bf16.msra.mxu0 %v1103_v0  ;;  %1104 = vmatpush.bf16.msra.mxu1 %v1103_v0  ;;  %s902_s19 = sshll.u32 %s1426_s18, 2  ;;  %s904_s23 = sshll.u32 %s1426_s18, 3  ;;  %v1273_v33 = vld [vmem:[%s1419_s2] ss:$0 sm:$0xff] }
   0xe   : > { %1105 = vmatpush.bf16.msra.mxu2 %v1103_v0  ;;  %1106 = vmatpush.bf16.msra.mxu3 %v1103_v0  ;;  %s1203_s22 = scalar_lea.vmem %s1417_s0, %s902_s19  ;;  %s1278_s28 = scalar_lea.vmem %s1420_s3, %s904_s23 }
   0xf   : > { %v1071_v1 = vld [vmem:[%s1203_s22] sm:$0xff]  ;;  %v1072_v5 = vld [vmem:[%s1203_s22 + $0x8] sm:$0xff]  ;;  %v1073_v9 = vld [vmem:[%s1203_s22 + $0x10] sm:$0xff] }
  0x10   : > { %v1079_v2 = vld [vmem:[%s1203_s22 + $0x40] sm:$0xff]  ;;  %1037 = vmatmul.msk.bf16.vlgmr.msra.gmra.mxu0 %vm462_vm0, %v1071_v1  ;;  %v1080_v6 = vld [vmem:[%s1203_s22 + $0x48] sm:$0xff]  ;;  %v1081_v10 = vld [vmem:[%s1203_s22 + $0x50] sm:$0xff] }
  0x11   : > { %v1087_v3 = vld [vmem:[%s1203_s22 + $0x80] sm:$0xff]  ;;  %1045 = vmatmul.msk.bf16.vlgmr.msra.gmra.mxu1 %vm462_vm0, %v1079_v2  ;;  %v1088_v7 = vld [vmem:[%s1203_s22 + $0x88] sm:$0xff]  ;;  %v1089_v11 = vld [vmem:[%s1203_s22 + $0x90] sm:$0xff] }
  0x12   : > { %v1095_v4 = vld [vmem:[%s1203_s22 + $0xc0] sm:$0xff]  ;;  %1053 = vmatmul.msk.bf16.vlgmr.msra.gmra.mxu2 %vm462_vm0, %v1087_v3  ;;  %v1096_v8 = vld [vmem:[%s1203_s22 + $0xc8] sm:$0xff]  ;;  %v1097_v12 = vld [vmem:[%s1203_s22 + $0xd0] sm:$0xff] }
  0x13   : > { %1061 = vmatmul.msk.bf16.vlgmr.msra.gmra.mxu3 %vm462_vm0, %v1095_v4  ;;  %v1074_v13 = vld [vmem:[%s1203_s22 + $0x18] sm:$0xff]  ;;  %v1075_v17 = vld [vmem:[%s1203_s22 + $0x20] sm:$0xff]  ;;  %v1076_v21 = vld [vmem:[%s1203_s22 + $0x28] sm:$0xff] }
  0x14   : > { %v1082_v14 = vld [vmem:[%s1203_s22 + $0x58] sm:$0xff]  ;;  %v1083_v18 = vld [vmem:[%s1203_s22 + $0x60] sm:$0xff]  ;;  %v1084_v22 = vld [vmem:[%s1203_s22 + $0x68] sm:$0xff] }
  0x15   : > { %v1090_v15 = vld [vmem:[%s1203_s22 + $0x98] sm:$0xff]  ;;  %v1091_v19 = vld [vmem:[%s1203_s22 + $0xa0] sm:$0xff]  ;;  %v1092_v23 = vld [vmem:[%s1203_s22 + $0xa8] sm:$0xff] }
  0x16   : > { %v1098_v16 = vld [vmem:[%s1203_s22 + $0xd8] sm:$0xff]  ;;  %v1099_v20 = vld [vmem:[%s1203_s22 + $0xe0] sm:$0xff]  ;;  %v1100_v24 = vld [vmem:[%s1203_s22 + $0xe8] sm:$0xff] }
  0x17   : > { %v1077_v25 = vld [vmem:[%s1203_s22 + $0x30] sm:$0xff]  ;;  %v1078_v29 = vld [vmem:[%s1203_s22 + $0x38] sm:$0xff] }
  0x18   : > { %v1085_v26 = vld [vmem:[%s1203_s22 + $0x70] sm:$0xff]  ;;  %v1086_v30 = vld [vmem:[%s1203_s22 + $0x78] sm:$0xff] }
  0x19   : > { %v1093_v27 = vld [vmem:[%s1203_s22 + $0xb0] sm:$0xff]  ;;  %v1094_v31 = vld [vmem:[%s1203_s22 + $0xb8] sm:$0xff] }
  0x1a   : > { %v1101_v28 = vld [vmem:[%s1203_s22 + $0xf0] sm:$0xff]  ;;  %v1102_v32 = vld [vmem:[%s1203_s22 + $0xf8] sm:$0xff] }
  0x20   : > { %1038 = vmatmul.msk.bf16.gmra.mxu0 %vm462_vm0, %v1072_v5 }
  0x21   : > { %1046 = vmatmul.msk.bf16.gmra.mxu1 %vm462_vm0, %v1080_v6 }
  0x22   : > { %1054 = vmatmul.msk.bf16.gmra.mxu2 %vm462_vm0, %v1088_v7 }
  0x23   : > { %1062 = vmatmul.msk.bf16.gmra.mxu3 %vm462_vm0, %v1096_v8 }
  0x30   : > { %1039 = vmatmul.msk.bf16.gmra.mxu0 %vm462_vm0, %v1073_v9 }
  0x31   : > { %1047 = vmatmul.msk.bf16.gmra.mxu1 %vm462_vm0, %v1081_v10 }
  0x32   : > { %1055 = vmatmul.msk.bf16.gmra.mxu2 %vm462_vm0, %v1089_v11 }
  0x33   : > { %1063 = vmatmul.msk.bf16.gmra.mxu3 %vm462_vm0, %v1097_v12 }
  0x40   : > { %1040 = vmatmul.msk.bf16.gmra.mxu0 %vm462_vm0, %v1074_v13 }
  0x41   : > { %1048 = vmatmul.msk.bf16.gmra.mxu1 %vm462_vm0, %v1082_v14 }
  0x42   : > { %1056 = vmatmul.msk.bf16.gmra.mxu2 %vm462_vm0, %v1090_v15 }
  0x43   : > { %1064 = vmatmul.msk.bf16.gmra.mxu3 %vm462_vm0, %v1098_v16 }
  0x50   : > { %1041 = vmatmul.msk.bf16.gmra.mxu0 %vm462_vm0, %v1075_v17 }
  0x51   : > { %1049 = vmatmul.msk.bf16.gmra.mxu1 %vm462_vm0, %v1083_v18 }
  0x52   : > { %1057 = vmatmul.msk.bf16.gmra.mxu2 %vm462_vm0, %v1091_v19 }
  0x53   : > { %1065 = vmatmul.msk.bf16.gmra.mxu3 %vm462_vm0, %v1099_v20 }
  0x60   : > { %1042 = vmatmul.msk.bf16.gmra.mxu0 %vm462_vm0, %v1076_v21 }
  0x61   : > { %1050 = vmatmul.msk.bf16.gmra.mxu1 %vm462_vm0, %v1084_v22 }
  0x62   : > { %1058 = vmatmul.msk.bf16.gmra.mxu2 %vm462_vm0, %v1092_v23 }
  0x63   : > { %1066 = vmatmul.msk.bf16.gmra.mxu3 %vm462_vm0, %v1100_v24 }
  0x70   : > { %1043 = vmatmul.msk.bf16.gmra.mxu0 %vm462_vm0, %v1077_v25 }
  0x71   : > { %1051 = vmatmul.msk.bf16.gmra.mxu1 %vm462_vm0, %v1085_v26 }
  0x72   : > { %1059 = vmatmul.msk.bf16.gmra.mxu2 %vm462_vm0, %v1093_v27 }
  0x73   : > { %1067 = vmatmul.msk.bf16.gmra.mxu3 %vm462_vm0, %v1101_v28 }
  0x80   : > { %1044 = vmatmul.msk.bf16.gmra.mxu0 %vm462_vm0, %v1078_v29 }
  0x81   : > { %1052 = vmatmul.msk.bf16.gmra.mxu1 %vm462_vm0, %v1086_v30 }
  0x82   : > { %1060 = vmatmul.msk.bf16.gmra.mxu2 %vm462_vm0, %v1094_v31 }
  0x83   : > { %1068 = vmatmul.msk.bf16.gmra.mxu3 %vm462_vm0, %v1102_v32 }
  0x8d   : > { %v568_v34 = vpop.f32.mrf.mxu0 }
  0x8e   : > { %v608_v35 = vpop.f32.mrf.mxu1  ;;  %v569_v36 = vadd.f32 %v1273_v33, %v568_v34 }
  0x8f   : > { %v609_v37 = vadd.f32 %v1273_v33, %v608_v35 }
  0x90   : > { %728 = vst [vmem:[%s1278_s28] sm:$0xff] %v569_v36 }
  0x91   : > { %744 = vst [vmem:[%s1278_s28 + $0x80] sm:$0xff] %v609_v37 }
  0x95   : > { %v648_v38 = vpop.f32.mrf.mxu2  ;;  %v570_v42 = vpop.f32.mrf.mxu0 }
  0x96   : > { %v688_v39 = vpop.f32.mrf.mxu3  ;;  %v649_v40 = vadd.f32 %v1273_v33, %v648_v38  ;;  %v610_v43 = vpop.f32.mrf.mxu1  ;;  %v571_v44 = vadd.f32 %v1273_v33, %v570_v42 }
  0x97   : > { %v689_v41 = vadd.f32 %v1273_v33, %v688_v39  ;;  %v611_v45 = vadd.f32 %v1273_v33, %v610_v43 }
  0x98   : > { %760 = vst [vmem:[%s1278_s28 + $0x100] sm:$0xff] %v649_v40 }
  0x99   : > { %776 = vst [vmem:[%s1278_s28 + $0x180] sm:$0xff] %v689_v41 }
  0x9a   : > { %729 = vst [vmem:[%s1278_s28 + $0x8] sm:$0xff] %v571_v44 }
  0x9b   : > { %745 = vst [vmem:[%s1278_s28 + $0x88] sm:$0xff] %v611_v45 }
  0x9d   : > { %v650_v46 = vpop.f32.mrf.mxu2  ;;  %v573_v50 = vpop.f32.mrf.mxu0 }
  0x9e   : > { %v690_v47 = vpop.f32.mrf.mxu3  ;;  %v651_v48 = vadd.f32 %v1273_v33, %v650_v46  ;;  %v613_v51 = vpop.f32.mrf.mxu1  ;;  %v574_v52 = vadd.f32 %v1273_v33, %v573_v50 }
  0x9f   : > { %v691_v49 = vadd.f32 %v1273_v33, %v690_v47  ;;  %v614_v53 = vadd.f32 %v1273_v33, %v613_v51 }
  0xa0   : > { %761 = vst [vmem:[%s1278_s28 + $0x108] sm:$0xff] %v651_v48 }
  0xa1   : > { %777 = vst [vmem:[%s1278_s28 + $0x188] sm:$0xff] %v691_v49 }
  0xa2   : > { %730 = vst [vmem:[%s1278_s28 + $0x10] sm:$0xff] %v574_v52 }
  0xa3   : > { %746 = vst [vmem:[%s1278_s28 + $0x90] sm:$0xff] %v614_v53 }
  0xa5   : > { %v653_v54 = vpop.f32.mrf.mxu2  ;;  %v575_v58 = vpop.f32.mrf.mxu0 }
  0xa6   : > { %v693_v55 = vpop.f32.mrf.mxu3  ;;  %v654_v56 = vadd.f32 %v1273_v33, %v653_v54  ;;  %v615_v59 = vpop.f32.mrf.mxu1  ;;  %v576_v60 = vadd.f32 %v1273_v33, %v575_v58 }
  0xa7   : > { %v694_v57 = vadd.f32 %v1273_v33, %v693_v55  ;;  %v616_v61 = vadd.f32 %v1273_v33, %v615_v59 }
  0xa8   : > { %762 = vst [vmem:[%s1278_s28 + $0x110] sm:$0xff] %v654_v56 }
  0xa9   : > { %778 = vst [vmem:[%s1278_s28 + $0x190] sm:$0xff] %v694_v57 }
  0xaa   : > { %731 = vst [vmem:[%s1278_s28 + $0x18] sm:$0xff] %v576_v60 }
  0xab   : > { %747 = vst [vmem:[%s1278_s28 + $0x98] sm:$0xff] %v616_v61 }
  0xad   : > { %v655_v62 = vpop.f32.mrf.mxu2  ;;  %v578_v2 = vpop.f32.mrf.mxu0 }
  0xae   : > { %v695_v63 = vpop.f32.mrf.mxu3  ;;  %v656_v0 = vadd.f32 %v1273_v33, %v655_v62  ;;  %v618_v3 = vpop.f32.mrf.mxu1  ;;  %v579_v4 = vadd.f32 %v1273_v33, %v578_v2 }
  0xaf   : > { %v696_v1 = vadd.f32 %v1273_v33, %v695_v63  ;;  %v619_v5 = vadd.f32 %v1273_v33, %v618_v3 }
  0xb0   : > { %763 = vst [vmem:[%s1278_s28 + $0x118] sm:$0xff] %v656_v0 }
  0xb1   : > { %779 = vst [vmem:[%s1278_s28 + $0x198] sm:$0xff] %v696_v1 }
  0xb2   : > { %732 = vst [vmem:[%s1278_s28 + $0x20] sm:$0xff] %v579_v4 }
  0xb3   : > { %748 = vst [vmem:[%s1278_s28 + $0xa0] sm:$0xff] %v619_v5 }
  0xb5   : > { %v658_v6 = vpop.f32.mrf.mxu2  ;;  %v580_v10 = vpop.f32.mrf.mxu0 }
  0xb6   : > { %v698_v7 = vpop.f32.mrf.mxu3  ;;  %v659_v8 = vadd.f32 %v1273_v33, %v658_v6  ;;  %v620_v11 = vpop.f32.mrf.mxu1  ;;  %v581_v12 = vadd.f32 %v1273_v33, %v580_v10 }
  0xb7   : > { %v699_v9 = vadd.f32 %v1273_v33, %v698_v7  ;;  %v621_v13 = vadd.f32 %v1273_v33, %v620_v11 }
  0xb8   : > { %764 = vst [vmem:[%s1278_s28 + $0x120] sm:$0xff] %v659_v8 }
  0xb9   : > { %780 = vst [vmem:[%s1278_s28 + $0x1a0] sm:$0xff] %v699_v9 }
  0xba   : > { %733 = vst [vmem:[%s1278_s28 + $0x28] sm:$0xff] %v581_v12 }
  0xbb   : > { %749 = vst [vmem:[%s1278_s28 + $0xa8] sm:$0xff] %v621_v13 }
  0xbd   : > { %v660_v14 = vpop.f32.mrf.mxu2  ;;  %v583_v18 = vpop.f32.mrf.mxu0 }
  0xbe   : > { %v700_v15 = vpop.f32.mrf.mxu3  ;;  %v661_v16 = vadd.f32 %v1273_v33, %v660_v14  ;;  %v623_v19 = vpop.f32.mrf.mxu1  ;;  %v584_v20 = vadd.f32 %v1273_v33, %v583_v18 }
  0xbf   : > { %v701_v17 = vadd.f32 %v1273_v33, %v700_v15  ;;  %v624_v21 = vadd.f32 %v1273_v33, %v623_v19 }
  0xc0   : > { %765 = vst [vmem:[%s1278_s28 + $0x128] sm:$0xff] %v661_v16 }
  0xc1   : > { %781 = vst [vmem:[%s1278_s28 + $0x1a8] sm:$0xff] %v701_v17 }
  0xc2   : > { %734 = vst [vmem:[%s1278_s28 + $0x30] sm:$0xff] %v584_v20 }
  0xc3   : > { %750 = vst [vmem:[%s1278_s28 + $0xb0] sm:$0xff] %v624_v21 }
  0xc5   : > { %v663_v22 = vpop.f32.mrf.mxu2  ;;  %v585_v26 = vpop.f32.mrf.mxu0 }
  0xc6   : > { %v703_v23 = vpop.f32.mrf.mxu3  ;;  %v664_v24 = vadd.f32 %v1273_v33, %v663_v22  ;;  %v625_v27 = vpop.f32.mrf.mxu1  ;;  %v586_v28 = vadd.f32 %v1273_v33, %v585_v26 }
  0xc7   : > { %v704_v25 = vadd.f32 %v1273_v33, %v703_v23  ;;  %v626_v29 = vadd.f32 %v1273_v33, %v625_v27 }
  0xc8   : > { %766 = vst [vmem:[%s1278_s28 + $0x130] sm:$0xff] %v664_v24 }
  0xc9   : > { %782 = vst [vmem:[%s1278_s28 + $0x1b0] sm:$0xff] %v704_v25 }
  0xca   : > { %735 = vst [vmem:[%s1278_s28 + $0x38] sm:$0xff] %v586_v28 }
  0xcb   : > { %751 = vst [vmem:[%s1278_s28 + $0xb8] sm:$0xff] %v626_v29 }
  0xcd   : > { %v665_v30 = vpop.f32.mrf.mxu2  ;;  %v588_v35 = vpop.f32.mrf.mxu0 }
  0xce   : > { %v705_v31 = vpop.f32.mrf.mxu3  ;;  %v666_v32 = vadd.f32 %v1273_v33, %v665_v30  ;;  %v628_v36 = vpop.f32.mrf.mxu1  ;;  %v589_v37 = vadd.f32 %v1273_v33, %v588_v35 }
  0xcf   : > { %v706_v34 = vadd.f32 %v1273_v33, %v705_v31  ;;  %v629_v38 = vadd.f32 %v1273_v33, %v628_v36 }
  0xd0   : > { %767 = vst [vmem:[%s1278_s28 + $0x138] sm:$0xff] %v666_v32 }
  0xd1   : > { %783 = vst [vmem:[%s1278_s28 + $0x1b8] sm:$0xff] %v706_v34 }
  0xd2   : > { %736 = vst [vmem:[%s1278_s28 + $0x40] sm:$0xff] %v589_v37 }
  0xd3   : > { %752 = vst [vmem:[%s1278_s28 + $0xc0] sm:$0xff] %v629_v38 }
  0xd5   : > { %v668_v39 = vpop.f32.mrf.mxu2  ;;  %v590_v43 = vpop.f32.mrf.mxu0 }
  0xd6   : > { %v708_v40 = vpop.f32.mrf.mxu3  ;;  %v669_v41 = vadd.f32 %v1273_v33, %v668_v39  ;;  %v630_v44 = vpop.f32.mrf.mxu1  ;;  %v591_v45 = vadd.f32 %v1273_v33, %v590_v43 }
  0xd7   : > { %v709_v42 = vadd.f32 %v1273_v33, %v708_v40  ;;  %v631_v46 = vadd.f32 %v1273_v33, %v630_v44 }
  0xd8   : > { %768 = vst [vmem:[%s1278_s28 + $0x140] sm:$0xff] %v669_v41 }
  0xd9   : > { %784 = vst [vmem:[%s1278_s28 + $0x1c0] sm:$0xff] %v709_v42 }
  0xda   : > { %737 = vst [vmem:[%s1278_s28 + $0x48] sm:$0xff] %v591_v45 }
  0xdb   : > { %753 = vst [vmem:[%s1278_s28 + $0xc8] sm:$0xff] %v631_v46 }
  0xdd   : > { %v670_v47 = vpop.f32.mrf.mxu2  ;;  %v593_v51 = vpop.f32.mrf.mxu0 }
  0xde   : > { %v710_v48 = vpop.f32.mrf.mxu3  ;;  %v671_v49 = vadd.f32 %v1273_v33, %v670_v47  ;;  %v633_v52 = vpop.f32.mrf.mxu1  ;;  %v594_v53 = vadd.f32 %v1273_v33, %v593_v51 }
  0xdf   : > { %v711_v50 = vadd.f32 %v1273_v33, %v710_v48  ;;  %v634_v54 = vadd.f32 %v1273_v33, %v633_v52 }
  0xe0   : > { %769 = vst [vmem:[%s1278_s28 + $0x148] sm:$0xff] %v671_v49 }
  0xe1   : > { %785 = vst [vmem:[%s1278_s28 + $0x1c8] sm:$0xff] %v711_v50 }
  0xe2   : > { %738 = vst [vmem:[%s1278_s28 + $0x50] sm:$0xff] %v594_v53 }
  0xe3   : > { %754 = vst [vmem:[%s1278_s28 + $0xd0] sm:$0xff] %v634_v54 }
  0xe5   : > { %v673_v55 = vpop.f32.mrf.mxu2  ;;  %v595_v59 = vpop.f32.mrf.mxu0 }
  0xe6   : > { %v713_v56 = vpop.f32.mrf.mxu3  ;;  %v674_v57 = vadd.f32 %v1273_v33, %v673_v55  ;;  %v635_v60 = vpop.f32.mrf.mxu1  ;;  %v596_v61 = vadd.f32 %v1273_v33, %v595_v59 }
  0xe7   : > { %v714_v58 = vadd.f32 %v1273_v33, %v713_v56  ;;  %v636_v62 = vadd.f32 %v1273_v33, %v635_v60 }
  0xe8   : > { %770 = vst [vmem:[%s1278_s28 + $0x150] sm:$0xff] %v674_v57 }
  0xe9   : > { %786 = vst [vmem:[%s1278_s28 + $0x1d0] sm:$0xff] %v714_v58 }
  0xea   : > { %739 = vst [vmem:[%s1278_s28 + $0x58] sm:$0xff] %v596_v61 }
  0xeb   : > { %755 = vst [vmem:[%s1278_s28 + $0xd8] sm:$0xff] %v636_v62 }
  0xed   : > { %v675_v63 = vpop.f32.mrf.mxu2  ;;  %v598_v3 = vpop.f32.mrf.mxu0 }
  0xee   : > { %v715_v0 = vpop.f32.mrf.mxu3  ;;  %v676_v1 = vadd.f32 %v1273_v33, %v675_v63  ;;  %v638_v4 = vpop.f32.mrf.mxu1  ;;  %v599_v5 = vadd.f32 %v1273_v33, %v598_v3 }
  0xef   : > { %v716_v2 = vadd.f32 %v1273_v33, %v715_v0  ;;  %v639_v6 = vadd.f32 %v1273_v33, %v638_v4 }
  0xf0   : > { %771 = vst [vmem:[%s1278_s28 + $0x158] sm:$0xff] %v676_v1 }
  0xf1   : > { %787 = vst [vmem:[%s1278_s28 + $0x1d8] sm:$0xff] %v716_v2 }
  0xf2   : > { %740 = vst [vmem:[%s1278_s28 + $0x60] sm:$0xff] %v599_v5 }
  0xf3   : > { %756 = vst [vmem:[%s1278_s28 + $0xe0] sm:$0xff] %v639_v6 }
  0xf5   : > { %v678_v7 = vpop.f32.mrf.mxu2  ;;  %v600_v11 = vpop.f32.mrf.mxu0 }
  0xf6   : > { %v718_v8 = vpop.f32.mrf.mxu3  ;;  %v679_v9 = vadd.f32 %v1273_v33, %v678_v7  ;;  %v640_v12 = vpop.f32.mrf.mxu1  ;;  %v601_v13 = vadd.f32 %v1273_v33, %v600_v11 }
  0xf7   : > { %v719_v10 = vadd.f32 %v1273_v33, %v718_v8  ;;  %v641_v14 = vadd.f32 %v1273_v33, %v640_v12 }
  0xf8   : > { %772 = vst [vmem:[%s1278_s28 + $0x160] sm:$0xff] %v679_v9 }
  0xf9   : > { %788 = vst [vmem:[%s1278_s28 + $0x1e0] sm:$0xff] %v719_v10 }
  0xfa   : > { %741 = vst [vmem:[%s1278_s28 + $0x68] sm:$0xff] %v601_v13 }
  0xfb   : > { %757 = vst [vmem:[%s1278_s28 + $0xe8] sm:$0xff] %v641_v14 }
  0xfd   : > { %v680_v15 = vpop.f32.mrf.mxu2  ;;  %v603_v19 = vpop.f32.mrf.mxu0 }
  0xfe   : > { %v720_v16 = vpop.f32.mrf.mxu3  ;;  %v681_v17 = vadd.f32 %v1273_v33, %v680_v15  ;;  %v643_v20 = vpop.f32.mrf.mxu1  ;;  %v604_v21 = vadd.f32 %v1273_v33, %v603_v19 }
  0xff   : > { %v721_v18 = vadd.f32 %v1273_v33, %v720_v16  ;;  %v644_v22 = vadd.f32 %v1273_v33, %v643_v20 }
 0x100   : > { %773 = vst [vmem:[%s1278_s28 + $0x168] sm:$0xff] %v681_v17 }
 0x101   : > { %789 = vst [vmem:[%s1278_s28 + $0x1e8] sm:$0xff] %v721_v18 }
 0x102   : > { %742 = vst [vmem:[%s1278_s28 + $0x70] sm:$0xff] %v604_v21 }
 0x103   : > { %758 = vst [vmem:[%s1278_s28 + $0xf0] sm:$0xff] %v644_v22 }
 0x105   : > { %v683_v23 = vpop.f32.mrf.mxu2  ;;  %v605_v27 = vpop.f32.mrf.mxu0 }
 0x106   : > { %v723_v24 = vpop.f32.mrf.mxu3  ;;  %v684_v25 = vadd.f32 %v1273_v33, %v683_v23  ;;  %v645_v28 = vpop.f32.mrf.mxu1  ;;  %v606_v29 = vadd.f32 %v1273_v33, %v605_v27 }
 0x107   : > { %v724_v26 = vadd.f32 %v1273_v33, %v723_v24  ;;  %v646_v30 = vadd.f32 %v1273_v33, %v645_v28 }
 0x108   : > { %774 = vst [vmem:[%s1278_s28 + $0x170] sm:$0xff] %v684_v25 }
 0x109   : > { %790 = vst [vmem:[%s1278_s28 + $0x1f0] sm:$0xff] %v724_v26 }
 0x10a   : > { %743 = vst [vmem:[%s1278_s28 + $0x78] sm:$0xff] %v606_v29 }
 0x10b   : > { %759 = vst [vmem:[%s1278_s28 + $0xf8] sm:$0xff] %v646_v30 }
 0x10d   : > { %v685_v31 = vpop.f32.mrf.mxu2 }
 0x10e   : > { %v725_v32 = vpop.f32.mrf.mxu3  ;;  %v686_v34 = vadd.f32 %v1273_v33, %v685_v31 }
 0x10f   : > { %v726_v35 = vadd.f32 %v1273_v33, %v725_v32 }
 0x110   : > { %775 = vst [vmem:[%s1278_s28 + $0x178] sm:$0xff] %v686_v34 }
 0x111   : > { %791 = vst [vmem:[%s1278_s28 + $0x1f8] sm:$0xff] %v726_v35 }
 0x112 PF: > { %s13_s14 = sadd.s32 1, %s1154_s14   ;;  %s1421_s12 = smov %s1150_s13 }
 0x113   : > { %p10_p5 = scmp.ge.s32.totalorder %s13_s14, 6   ;;  %s1422_s13 = smov %s1424_s15 }
 0x115   :  { %12 = sbr.rel (!%p10_p5) target bundleno = 2 (0x2), region = 68 }

</bundles_post_ra>
